<compile_context>
chip_gen: v5e
topology: v5e:2x2
jax: 0.10.0
libtpu: 0.0.40
codegen_flags: <defaults>
</compile_context>

<pallas_src>
import functools

import jax
import jax.numpy as jnp
import numpy as np
from jax import lax
from jax.experimental import pallas as pl
from jax.experimental.pallas import tpu as pltpu

NEG_INIT = -1e30      # finite "-inf" for the running max
MASK_VALUE = -1e9     # matches the torch masked_fill value
N_CHUNKS = 2          # leading "parallel" grid axis (v7x: one chunk per TC)


def attnmil6_kernel(x_ref, wdim_ref, wvu_ref, bvu_ref, wa_ref, ba_ref,
                    a_out_ref, m_ref, l_ref, acc_ref,
                    *, tile_n, d_attn, n_valid, tiles_per_chunk, needs_mask):
    c = pl.program_id(0)                      # chunk (parallel axis)
    j = pl.program_id(1)                      # tile within chunk (reduction)
    t = c * tiles_per_chunk + j               # global tile index along N

    # ---- init this chunk's running softmax state (held in the resident
    #      output blocks themselves; written back automatically) ----
    @pl.when(j == 0)
    def _init():
        m_ref[...] = jnp.full_like(m_ref, NEG_INIT)
        l_ref[...] = jnp.zeros_like(l_ref)
        acc_ref[...] = jnp.zeros_like(acc_ref)

    # ---- DimReduction: Linear(no bias) + ReLU  (bf16 MXU, f32 accumulate) ----
    x_bf = x_ref[...].astype(jnp.bfloat16)                       # (tile_n, D_feat)
    h = jnp.maximum(
        jnp.dot(x_bf, wdim_ref[...], preferred_element_type=jnp.float32), 0.0)

    # Zero rows beyond N (kills any NaN/Inf from undefined tail-of-block VMEM
    # before it can reach the MXU); only emitted if the grid over-covers N.
    if needs_mask:
        row = t * tile_n + lax.broadcasted_iota(jnp.int32, (tile_n, 1), 0)
        valid = row < n_valid                                    # (tile_n, 1)
        h = jnp.where(valid, h, 0.0)

    h_bf = h.astype(jnp.bfloat16)                                # (tile_n, D_inner)

    # ---- Gated attention: fused V/U matmul (256-wide MXU output) ----
    vu = jnp.dot(h_bf, wvu_ref[...],
                 preferred_element_type=jnp.float32) + bvu_ref[...]
    a_v = jnp.tanh(vu[:, :d_attn])
    a_u = jax.nn.sigmoid(vu[:, d_attn:])
    gated = (a_v * a_u).astype(jnp.bfloat16)
    logits = jnp.dot(gated, wa_ref[...],
                     preferred_element_type=jnp.float32) + ba_ref[...]  # (tile_n, K)

    # Lane-dense layout: K on sublanes, instances on lanes.
    logits_t = logits.T                                          # (K, tile_n)
    a_out_ref[...] = logits_t                                    # stream A_out tile

    if needs_mask:
        logits_t = jnp.where(valid.T, logits_t, MASK_VALUE)

    # ---- online softmax update over the N axis ----
    tile_max = jnp.max(logits_t, axis=1, keepdims=True)          # (K, 1)
    m_prev = m_ref[...]
    m_new = jnp.maximum(m_prev, tile_max)
    alpha = jnp.exp(m_prev - m_new)                              # (K, 1)
    p = jnp.exp(logits_t - m_new)                                # (K, tile_n)
    l_ref[...] = alpha * l_ref[...] + jnp.sum(p, axis=1, keepdims=True)
    # p @ h kept in f32 (K rows -> negligible MXU time, better accuracy).
    acc_ref[...] = alpha * acc_ref[...] + jnp.dot(
        p, h, preferred_element_type=jnp.float32)                # (K, D_inner)
    m_ref[...] = m_new


def attnmil6_forward(x, params, *, tile_n=2048):
    """x: (1, N, D_feat), f32 or bf16.

    Returns (outputs (K, n_class), slide (1, n_class), A (1, K, N)).
    """
    x0 = x[0]
    N, D_feat = x0.shape
    n_token, D_inner, n_class = params["W_cls"].shape
    D_attn = params["W_v"].shape[1]

    # tile_n: multiple of 128, no larger than needed.
    tile_n = min(tile_n, ((N + 127) // 128) * 128)
    tile_n = max(128, (tile_n // 128) * 128)

    n_tiles = pl.cdiv(N, tile_n)
    tiles_per_chunk = pl.cdiv(n_tiles, N_CHUNKS)
    total_tiles = N_CHUNKS * tiles_per_chunk
    total_cols = total_tiles * tile_n
    needs_mask = (total_cols != N)

    # Weights feeding the big MXU matmuls go in as bf16 (one-time tiny cast).
    # W_v/W_u (+ biases) are fused so the gating stage is one 2*D_attn-wide matmul.
    bf = jnp.bfloat16
    w_dim = params["W_dim"].astype(bf)
    w_vu = jnp.concatenate([params["W_v"], params["W_u"]], axis=1).astype(bf)
    b_vu = jnp.concatenate([params["b_v"], params["b_u"]], axis=1)
    w_a = params["W_a"].astype(bf)
    b_a = params["b_a"]

    def const2(c, j):
        return (0, 0)

    def x_map(c, j):
        # Clamp so an over-covering ("dead") tile re-reads the last real block
        # instead of issuing an out-of-bounds DMA; its rows are fully masked.
        return (jnp.minimum(c * tiles_per_chunk + j, n_tiles - 1), 0)

    def aout_map(c, j):
        return (0, c * tiles_per_chunk + j)

    def part_map(c, j):
        return (c, 0, 0)

    in_specs = [
        pl.BlockSpec((tile_n, D_feat), x_map),                   # x (streamed, any dtype)
        pl.BlockSpec((D_feat, D_inner), const2),                 # W_dim (bf16)
        pl.BlockSpec((D_inner, 2 * D_attn), const2),             # W_vu  (bf16, fused)
        pl.BlockSpec((1, 2 * D_attn), const2),                   # b_vu
        pl.BlockSpec((D_attn, n_token), const2),                 # W_a   (bf16)
        pl.BlockSpec((1, n_token), const2),                      # b_a
    ]
    out_specs = (
        pl.BlockSpec((n_token, tile_n), aout_map),               # A_out streamed
        pl.BlockSpec((None, n_token, 1), part_map),              # per-chunk running max
        pl.BlockSpec((None, n_token, 1), part_map),              # per-chunk denom
        pl.BlockSpec((None, n_token, D_inner), part_map),        # per-chunk acc
    )
    out_shape = (
        jax.ShapeDtypeStruct((n_token, total_cols), jnp.float32),
        jax.ShapeDtypeStruct((N_CHUNKS, n_token, 1), jnp.float32),
        jax.ShapeDtypeStruct((N_CHUNKS, n_token, 1), jnp.float32),
        jax.ShapeDtypeStruct((N_CHUNKS, n_token, D_inner), jnp.float32),
    )

    # ---- VMEM budget (double-buffered x tile + weights + outputs + temporaries) ----
    itemsize_x = x0.dtype.itemsize
    x_tile_bytes = tile_n * D_feat * itemsize_x
    weight_bytes = ((D_feat * D_inner + D_inner * 2 * D_attn + D_attn * n_token) * 2
                    + (2 * D_attn + n_token) * 4)
    out_block_bytes = (n_token * tile_n * 4 + 2 * n_token * 4 + n_token * D_inner * 4)
    interm_bytes = tile_n * (D_inner * 6 + D_attn * 18 + n_token * 8)
    vmem_est = 2 * x_tile_bytes + 2 * weight_bytes + 2 * out_block_bytes + interm_bytes
    vmem_limit = int(min(max(vmem_est + (8 << 20), 16 << 20), 48 << 20))

    flops = (2 * N * D_feat * D_inner
             + 2 * N * D_inner * (2 * D_attn)
             + 2 * N * D_attn * n_token
             + 2 * n_token * N * D_inner)
    transcendentals = N * (2 * D_attn + n_token)
    bytes_accessed = (N * D_feat * itemsize_x
                      + weight_bytes
                      + 4 * (n_token * total_cols
                             + 2 * N_CHUNKS * n_token
                             + N_CHUNKS * n_token * D_inner))

    kernel = functools.partial(
        attnmil6_kernel, tile_n=tile_n, d_attn=D_attn, n_valid=N,
        tiles_per_chunk=tiles_per_chunk, needs_mask=needs_mask)

    a_full, m_part, l_part, acc_part = pl.pallas_call(
        kernel,
        grid_spec=pltpu.PrefetchScalarGridSpec(
            num_scalar_prefetch=0,
            grid=(N_CHUNKS, tiles_per_chunk),
            in_specs=in_specs,
            out_specs=out_specs,
            scratch_shapes=[]),
        out_shape=out_shape,
        compiler_params=pltpu.CompilerParams(
            dimension_semantics=("parallel", "arbitrary"),
            vmem_limit_bytes=vmem_limit),
        cost_estimate=pl.CostEstimate(
            flops=flops, transcendentals=transcendentals,
            bytes_accessed=bytes_accessed),
    )(x0, w_dim, w_vu, b_vu, w_a, b_a)

    # ---- tiny pure-JAX epilogue: merge per-chunk online-softmax states and
    #      run the per-token classifier heads + slide head ----
    m = jnp.max(m_part, axis=0)                                  # (K, 1)
    scale = jnp.exp(m_part - m)                                  # (chunks, K, 1)
    l = jnp.sum(l_part * scale, axis=0)                          # (K, 1)
    acc = jnp.sum(acc_part * scale, axis=0)                      # (K, D_inner)
    afeat = acc / l                                              # (K, D_inner)

    out_cls = jnp.einsum("kd,kdc->kc", afeat, params["W_cls"]) + params["b_cls"]
    # mean(A_sm, 0) @ h == mean(A_sm @ h, 0) == mean(afeat, 0)
    bag_feat = jnp.mean(afeat, axis=0, keepdims=True)            # (1, D_inner)
    out_slide = bag_feat @ params["W_slide"] + params["b_slide"]

    a_out = a_full[:, :N][None]                                  # (1, K, N)
    return out_cls, out_slide, a_out


def attnmil6_reference(x, params, matmul_dtype=jnp.bfloat16):
    """Pure-JAX reference; big matmuls in matmul_dtype (mirrors kernel numerics)."""
    x0 = x[0]
    md = matmul_dtype

    def mm(a, b):
        return jnp.dot(a.astype(md), b.astype(md),
                       preferred_element_type=jnp.float32)

    h = jnp.maximum(mm(x0, params["W_dim"]), 0.0)
    a_v = jnp.tanh(mm(h, params["W_v"]) + params["b_v"])
    a_u = jax.nn.sigmoid(mm(h, params["W_u"]) + params["b_u"])
    A = (mm(a_v * a_u, params["W_a"]) + params["b_a"]).T          # (K, N)
    A_sm = jax.nn.softmax(A, axis=1)
    afeat = A_sm @ h                                              # (K, D_inner)
    outs = jnp.stack(
        [afeat[i] @ params["W_cls"][i] + params["b_cls"][i]
         for i in range(params["W_cls"].shape[0])], axis=0)
    bag_A = jnp.mean(A_sm, axis=0, keepdims=True)
    bag_feat = bag_A @ h
    slide = bag_feat @ params["W_slide"] + params["b_slide"]
    return outs, slide, A[None]


def init_params(key, D_feat, D_inner, D_attn, n_token, n_class):
    ks = jax.random.split(key, 12)
    s = 0.1
    return {
        "W_dim":   s * jax.random.normal(ks[0], (D_feat, D_inner), jnp.float32),
        "W_v":     s * jax.random.normal(ks[1], (D_inner, D_attn), jnp.float32),
        "b_v":     s * jax.random.normal(ks[2], (1, D_attn), jnp.float32),
        "W_u":     s * jax.random.normal(ks[3], (D_inner, D_attn), jnp.float32),
        "b_u":     s * jax.random.normal(ks[4], (1, D_attn), jnp.float32),
        "W_a":     s * jax.random.normal(ks[5], (D_attn, n_token), jnp.float32),
        "b_a":     s * jax.random.normal(ks[6], (1, n_token), jnp.float32),
        "W_cls":   s * jax.random.normal(ks[7], (n_token, D_inner, n_class), jnp.float32),
        "b_cls":   s * jax.random.normal(ks[8], (n_token, n_class), jnp.float32),
        "W_slide": s * jax.random.normal(ks[9], (D_inner, n_class), jnp.float32),
        "b_slide": s * jax.random.normal(ks[10], (1, n_class), jnp.float32),
    }


if __name__ == "__main__":
    # Small-but-nontrivial config exercising: 2 chunks, multiple tiles/chunk,
    # a ragged last tile and a fully-masked "dead" tile (N=1200, tile_n=256 ->
    # 5 real tiles, grid (2, 3)).
    D_feat, D_inner, D_attn = 256, 128, 128
    n_token, n_class, N = 4, 2, 1200
    TILE_N = 256

    key = jax.random.PRNGKey(0)
    kx, kp = jax.random.split(key)
    # Upstream features stored as bf16 -> halves the dominant x HBM traffic.
    x = jax.random.normal(kx, (1, N, D_feat), jnp.bfloat16)
    params = init_params(kp, D_feat, D_inner, D_attn, n_token, n_class)

    out_cls, out_slide, a_out = attnmil6_forward(x, params, tile_n=TILE_N)
    jax.block_until_ready((out_cls, out_slide, a_out))

    assert out_cls.shape == (n_token, n_class)
    assert out_slide.shape == (1, n_class)
    assert a_out.shape == (1, n_token, N)

    # Check against a numerics-matched reference (same bf16 MXU inputs).
    ref_cls, ref_slide, ref_a = attnmil6_reference(x, params, matmul_dtype=jnp.bfloat16)
    np.testing.assert_allclose(np.asarray(out_cls), np.asarray(ref_cls), atol=2e-3, rtol=2e-3)
    np.testing.assert_allclose(np.asarray(out_slide), np.asarray(ref_slide), atol=2e-3, rtol=2e-3)
    np.testing.assert_allclose(np.asarray(a_out), np.asarray(ref_a), atol=2e-3, rtol=2e-3)

    print("KERNEL_OK")
</pallas_src>

<mosaic_0001>
module attributes {stable_mosaic.version = 11 : i64} {
  func.func @attnmil6_kernel(%arg0: i32, %arg1: i32, %arg2: memref<256x256xbf16, #tpu.memory_space<vmem>>, %arg3: memref<256x128xbf16, #tpu.memory_space<vmem>>, %arg4: memref<128x256xbf16, #tpu.memory_space<vmem>>, %arg5: memref<1x256xf32, #tpu.memory_space<vmem>>, %arg6: memref<128x4xbf16, #tpu.memory_space<vmem>>, %arg7: memref<1x4xf32, #tpu.memory_space<vmem>>, %arg8: memref<4x256xf32, #tpu.memory_space<vmem>>, %arg9: memref<1x4x1xf32, #tpu.memory_space<vmem>>, %arg10: memref<1x4x1xf32, #tpu.memory_space<vmem>>, %arg11: memref<1x4x128xf32, #tpu.memory_space<vmem>>) attributes {dimension_semantics = [#tpu.dimension_semantics<parallel>, #tpu.dimension_semantics<arbitrary>], iteration_bounds = array<i64: 2, 3>, scalar_prefetch = 0 : i64, scratch_operands = 0 : i64, tpu.core_type = #tpu.core_type<tc>, window_params = [{transform_indices = @transform_0, window_bounds = array<i64: 256, 256>}, {pipeline_mode = #tpu.pipeline_mode<synchronous>, transform_indices = @transform_1, window_bounds = array<i64: 256, 128>}, {pipeline_mode = #tpu.pipeline_mode<synchronous>, transform_indices = @transform_2, window_bounds = array<i64: 128, 256>}, {pipeline_mode = #tpu.pipeline_mode<synchronous>, transform_indices = @transform_3, window_bounds = array<i64: 1, 256>}, {pipeline_mode = #tpu.pipeline_mode<synchronous>, transform_indices = @transform_4, window_bounds = array<i64: 128, 4>}, {pipeline_mode = #tpu.pipeline_mode<synchronous>, transform_indices = @transform_5, window_bounds = array<i64: 1, 4>}, {transform_indices = @transform_6, window_bounds = array<i64: 4, 256>}, {transform_indices = @transform_7, window_bounds = array<i64: 1, 4, 1>}, {transform_indices = @transform_8, window_bounds = array<i64: 1, 4, 1>}, {transform_indices = @transform_9, window_bounds = array<i64: 1, 4, 128>}]} {
    %c3_i32 = arith.constant 3 : i32
    %0 = arith.muli %arg0, %c3_i32 : i32
    %1 = arith.addi %0, %arg1 : i32
    %c0_i32 = arith.constant 0 : i32
    %2 = arith.cmpi eq, %arg1, %c0_i32 : i32
    %3 = arith.extui %2 : i1 to i32
    %c0_i32_0 = arith.constant 0 : i32
    %4 = arith.cmpi ne, %3, %c0_i32_0 : i32
    scf.if %4 {
      %cst_41 = arith.constant -1.000000e+30 : f32
      %79 = vector.broadcast %cst_41 : f32 to vector<4x1xf32>
      %c0_42 = arith.constant 0 : index
      %c0_43 = arith.constant 0 : index
      %c0_44 = arith.constant 0 : index
      %80 = vector.load %arg9[%c0_42, %c0_43, %c0_44] : memref<1x4x1xf32, #tpu.memory_space<vmem>>, vector<1x4x1xf32>
      %81 = vector.shape_cast %80 : vector<1x4x1xf32> to vector<4x1xf32>
      %82 = vector.shape_cast %79 : vector<4x1xf32> to vector<1x4x1xf32>
      tpu.vector_store %arg9[%c0_42, %c0_43, %c0_44], %82 {strides = array<i32>} : memref<1x4x1xf32, #tpu.memory_space<vmem>>, vector<1x4x1xf32>,
      %cst_45 = arith.constant 0.000000e+00 : f32
      %83 = vector.broadcast %cst_45 : f32 to vector<4x1xf32>
      %c0_46 = arith.constant 0 : index
      %c0_47 = arith.constant 0 : index
      %c0_48 = arith.constant 0 : index
      %84 = vector.load %arg10[%c0_46, %c0_47, %c0_48] : memref<1x4x1xf32, #tpu.memory_space<vmem>>, vector<1x4x1xf32>
      %85 = vector.shape_cast %84 : vector<1x4x1xf32> to vector<4x1xf32>
      %86 = vector.shape_cast %83 : vector<4x1xf32> to vector<1x4x1xf32>
      tpu.vector_store %arg10[%c0_46, %c0_47, %c0_48], %86 {strides = array<i32>} : memref<1x4x1xf32, #tpu.memory_space<vmem>>, vector<1x4x1xf32>,
      %cst_49 = arith.constant 0.000000e+00 : f32
      %87 = vector.broadcast %cst_49 : f32 to vector<4x128xf32>
      %c0_50 = arith.constant 0 : index
      %c0_51 = arith.constant 0 : index
      %c0_52 = arith.constant 0 : index
      %88 = vector.load %arg11[%c0_50, %c0_51, %c0_52] : memref<1x4x128xf32, #tpu.memory_space<vmem>>, vector<1x4x128xf32>
      %89 = vector.shape_cast %88 : vector<1x4x128xf32> to vector<4x128xf32>
      %90 = vector.shape_cast %87 : vector<4x128xf32> to vector<1x4x128xf32>
      tpu.vector_store %arg11[%c0_50, %c0_51, %c0_52], %90 {strides = array<i32>} : memref<1x4x128xf32, #tpu.memory_space<vmem>>, vector<1x4x128xf32>,
    } else {
    }
    %c0 = arith.constant 0 : index
    %c0_1 = arith.constant 0 : index
    %5 = vector.load %arg2[%c0, %c0_1] : memref<256x256xbf16, #tpu.memory_space<vmem>>, vector<256x256xbf16>
    %c0_2 = arith.constant 0 : index
    %c0_3 = arith.constant 0 : index
    %6 = vector.load %arg3[%c0_2, %c0_3] : memref<256x128xbf16, #tpu.memory_space<vmem>>, vector<256x128xbf16>
    %cst = arith.constant dense<0.000000e+00> : vector<256x128xf32>
    %7 = tpu.matmul %5, %6, %cst {dimension_numbers = #tpu.dot_dimension_numbers<[1], [0], [0], [1], [0, 0, 1, 1], [], []>} : vector<256x256xbf16>, vector<256x128xbf16>, vector<256x128xf32> -> vector<256x128xf32>
    %cst_4 = arith.constant 0.000000e+00 : f32
    %8 = vector.broadcast %cst_4 : f32 to vector<256x128xf32>
    %9 = arith.maximumf %7, %8 : vector<256x128xf32>
    %c256_i32 = arith.constant 256 : i32
    %10 = arith.muli %1, %c256_i32 : i32
    %11 = tpu.iota {dimensions = array<i32: 0>} : vector<256x1xi32>
    %12 = vector.broadcast %10 : i32 to vector<256x1xi32>
    %13 = arith.addi %12, %11 : vector<256x1xi32>
    %c1200_i32 = arith.constant 1200 : i32
    %14 = vector.broadcast %c1200_i32 : i32 to vector<256x1xi32>
    %15 = arith.cmpi slt, %13, %14 : vector<256x1xi32>
    %cst_5 = arith.constant 0.000000e+00 : f32
    %16 = vector.shape_cast %15 : vector<256x1xi1> to vector<256x1xi1>
    %17 = vector.broadcast %16 : vector<256x1xi1> to vector<256x128xi1>
    %18 = vector.broadcast %cst_5 : f32 to vector<256x128xf32>
    %19 = arith.select %17, %9, %18 : vector<256x128xi1>, vector<256x128xf32>
    %20 = arith.truncf %19 : vector<256x128xf32> to vector<256x128xbf16>
    %c0_6 = arith.constant 0 : index
    %c0_7 = arith.constant 0 : index
    %21 = vector.load %arg4[%c0_6, %c0_7] : memref<128x256xbf16, #tpu.memory_space<vmem>>, vector<128x256xbf16>
    %cst_8 = arith.constant dense<0.000000e+00> : vector<256x256xf32>
    %22 = tpu.matmul %20, %21, %cst_8 {dimension_numbers = #tpu.dot_dimension_numbers<[1], [0], [0], [1], [0, 0, 1, 1], [], []>} : vector<256x128xbf16>, vector<128x256xbf16>, vector<256x256xf32> -> vector<256x256xf32>
    %c0_9 = arith.constant 0 : index
    %c0_10 = arith.constant 0 : index
    %23 = vector.load %arg5[%c0_9, %c0_10] : memref<1x256xf32, #tpu.memory_space<vmem>>, vector<1x256xf32>
    %24 = vector.broadcast %23 : vector<1x256xf32> to vector<256x256xf32>
    %25 = arith.addf %22, %24 : vector<256x256xf32>
    %26 = vector.extract_strided_slice %25 {offsets = [0, 0], sizes = [256, 128], strides = [1, 1]} : vector<256x256xf32> to vector<256x128xf32>
    %27 = math.tanh %26 : vector<256x128xf32>
    %28 = vector.extract_strided_slice %25 {offsets = [0, 128], sizes = [256, 128], strides = [1, 1]} : vector<256x256xf32> to vector<256x128xf32>
    %29 = arith.negf %28 : vector<256x128xf32>
    %30 = math.exp %29 : vector<256x128xf32>
    %cst_11 = arith.constant 1.000000e+00 : f32
    %31 = vector.broadcast %cst_11 : f32 to vector<256x128xf32>
    %32 = arith.addf %31, %30 : vector<256x128xf32>
    %33 = arith.divf %31, %32 : vector<256x128xf32>
    %34 = arith.mulf %27, %33 : vector<256x128xf32>
    %35 = arith.truncf %34 : vector<256x128xf32> to vector<256x128xbf16>
    %c0_12 = arith.constant 0 : index
    %c0_13 = arith.constant 0 : index
    %36 = vector.load %arg6[%c0_12, %c0_13] : memref<128x4xbf16, #tpu.memory_space<vmem>>, vector<128x4xbf16>
    %cst_14 = arith.constant dense<0.000000e+00> : vector<256x4xf32>
    %37 = tpu.matmul %35, %36, %cst_14 {dimension_numbers = #tpu.dot_dimension_numbers<[1], [0], [0], [1], [0, 0, 1, 1], [], []>} : vector<256x128xbf16>, vector<128x4xbf16>, vector<256x4xf32> -> vector<256x4xf32>
    %c0_15 = arith.constant 0 : index
    %c0_16 = arith.constant 0 : index
    %38 = vector.load %arg7[%c0_15, %c0_16] : memref<1x4xf32, #tpu.memory_space<vmem>>, vector<1x4xf32>
    %39 = vector.broadcast %38 : vector<1x4xf32> to vector<256x4xf32>
    %40 = arith.addf %37, %39 : vector<256x4xf32>
    %41 = tpu.transpose %40, [1, 0] : vector<256x4xf32> -> vector<4x256xf32>
    %c0_17 = arith.constant 0 : index
    %c0_18 = arith.constant 0 : index
    %42 = vector.load %arg8[%c0_17, %c0_18] : memref<4x256xf32, #tpu.memory_space<vmem>>, vector<4x256xf32>
    tpu.vector_store %arg8[%c0_17, %c0_18], %41 {strides = array<i32>} : memref<4x256xf32, #tpu.memory_space<vmem>>, vector<4x256xf32>,
    %43 = tpu.transpose %15, [1, 0] : vector<256x1xi1> -> vector<1x256xi1>
    %cst_19 = arith.constant -1.000000e+09 : f32
    %44 = vector.shape_cast %43 : vector<1x256xi1> to vector<1x256xi1>
    %45 = vector.broadcast %44 : vector<1x256xi1> to vector<4x256xi1>
    %46 = vector.broadcast %cst_19 : f32 to vector<4x256xf32>
    %47 = arith.select %45, %41, %46 : vector<4x256xi1>, vector<4x256xf32>
    %cst_20 = arith.constant dense<0xFF800000> : vector<4xf32>
    %48 = vector.multi_reduction <maximumf>, %47, %cst_20 [1] : vector<4x256xf32> to vector<4xf32>
    %49 = vector.shape_cast %48 : vector<4xf32> to vector<4x1xf32>
    %c0_21 = arith.constant 0 : index
    %c0_22 = arith.constant 0 : index
    %c0_23 = arith.constant 0 : index
    %50 = vector.load %arg9[%c0_21, %c0_22, %c0_23] : memref<1x4x1xf32, #tpu.memory_space<vmem>>, vector<1x4x1xf32>
    %51 = vector.shape_cast %50 : vector<1x4x1xf32> to vector<4x1xf32>
    %52 = arith.maximumf %51, %49 : vector<4x1xf32>
    %53 = arith.subf %51, %52 : vector<4x1xf32>
    %54 = math.exp %53 : vector<4x1xf32>
    %55 = vector.broadcast %52 : vector<4x1xf32> to vector<4x256xf32>
    %56 = arith.subf %47, %55 : vector<4x256xf32>
    %57 = math.exp %56 : vector<4x256xf32>
    %c0_24 = arith.constant 0 : index
    %c0_25 = arith.constant 0 : index
    %c0_26 = arith.constant 0 : index
    %58 = vector.load %arg10[%c0_24, %c0_25, %c0_26] : memref<1x4x1xf32, #tpu.memory_space<vmem>>, vector<1x4x1xf32>
    %59 = vector.shape_cast %58 : vector<1x4x1xf32> to vector<4x1xf32>
    %60 = arith.mulf %54, %59 : vector<4x1xf32>
    %cst_27 = arith.constant dense<0.000000e+00> : vector<4xf32>
    %61 = vector.multi_reduction <add>, %57, %cst_27 [1] : vector<4x256xf32> to vector<4xf32>
    %62 = vector.shape_cast %61 : vector<4xf32> to vector<4x1xf32>
    %63 = arith.addf %60, %62 : vector<4x1xf32>
    %c0_28 = arith.constant 0 : index
    %c0_29 = arith.constant 0 : index
    %c0_30 = arith.constant 0 : index
    %64 = vector.load %arg10[%c0_28, %c0_29, %c0_30] : memref<1x4x1xf32, #tpu.memory_space<vmem>>, vector<1x4x1xf32>
    %65 = vector.shape_cast %64 : vector<1x4x1xf32> to vector<4x1xf32>
    %66 = vector.shape_cast %63 : vector<4x1xf32> to vector<1x4x1xf32>
    tpu.vector_store %arg10[%c0_28, %c0_29, %c0_30], %66 {strides = array<i32>} : memref<1x4x1xf32, #tpu.memory_space<vmem>>, vector<1x4x1xf32>,
    %c0_31 = arith.constant 0 : index
    %c0_32 = arith.constant 0 : index
    %c0_33 = arith.constant 0 : index
    %67 = vector.load %arg11[%c0_31, %c0_32, %c0_33] : memref<1x4x128xf32, #tpu.memory_space<vmem>>, vector<1x4x128xf32>
    %68 = vector.shape_cast %67 : vector<1x4x128xf32> to vector<4x128xf32>
    %69 = vector.broadcast %54 : vector<4x1xf32> to vector<4x128xf32>
    %70 = arith.mulf %69, %68 : vector<4x128xf32>
    %cst_34 = arith.constant dense<0.000000e+00> : vector<4x128xf32>
    %71 = tpu.matmul %57, %19, %cst_34 {dimension_numbers = #tpu.dot_dimension_numbers<[1], [0], [0], [1], [0, 0, 1, 1], [], []>} : vector<4x256xf32>, vector<256x128xf32>, vector<4x128xf32> -> vector<4x128xf32>
    %72 = arith.addf %70, %71 : vector<4x128xf32>
    %c0_35 = arith.constant 0 : index
    %c0_36 = arith.constant 0 : index
    %c0_37 = arith.constant 0 : index
    %73 = vector.load %arg11[%c0_35, %c0_36, %c0_37] : memref<1x4x128xf32, #tpu.memory_space<vmem>>, vector<1x4x128xf32>
    %74 = vector.shape_cast %73 : vector<1x4x128xf32> to vector<4x128xf32>
    %75 = vector.shape_cast %72 : vector<4x128xf32> to vector<1x4x128xf32>
    tpu.vector_store %arg11[%c0_35, %c0_36, %c0_37], %75 {strides = array<i32>} : memref<1x4x128xf32, #tpu.memory_space<vmem>>, vector<1x4x128xf32>,
    %c0_38 = arith.constant 0 : index
    %c0_39 = arith.constant 0 : index
    %c0_40 = arith.constant 0 : index
    %76 = vector.load %arg9[%c0_38, %c0_39, %c0_40] : memref<1x4x1xf32, #tpu.memory_space<vmem>>, vector<1x4x1xf32>
    %77 = vector.shape_cast %76 : vector<1x4x1xf32> to vector<4x1xf32>
    %78 = vector.shape_cast %52 : vector<4x1xf32> to vector<1x4x1xf32>
    tpu.vector_store %arg9[%c0_38, %c0_39, %c0_40], %78 {strides = array<i32>} : memref<1x4x1xf32, #tpu.memory_space<vmem>>, vector<1x4x1xf32>,
    return
  }
  func.func @transform_0(%arg0: i32, %arg1: i32) -> (i32, i32) {
    %c3_i32 = arith.constant 3 : i32
    %0 = arith.muli %arg0, %c3_i32 : i32
    %1 = arith.addi %0, %arg1 : i32
    %c4_i32 = arith.constant 4 : i32
    %2 = arith.minsi %1, %c4_i32 : i32
    %c0_i32 = arith.constant 0 : i32
    %c0_i32_0 = arith.constant 0 : i32
    return %2, %c0_i32 : i32, i32
  }
  func.func @transform_1(%arg0: i32, %arg1: i32) -> (i32, i32) {
    %c0_i32 = arith.constant 0 : i32
    %c0_i32_0 = arith.constant 0 : i32
    %c0_i32_1 = arith.constant 0 : i32
    return %c0_i32, %c0_i32_0 : i32, i32
  }
  func.func @transform_2(%arg0: i32, %arg1: i32) -> (i32, i32) {
    %c0_i32 = arith.constant 0 : i32
    %c0_i32_0 = arith.constant 0 : i32
    %c0_i32_1 = arith.constant 0 : i32
    return %c0_i32, %c0_i32_0 : i32, i32
  }
  func.func @transform_3(%arg0: i32, %arg1: i32) -> (i32, i32) {
    %c0_i32 = arith.constant 0 : i32
    %c0_i32_0 = arith.constant 0 : i32
    %c0_i32_1 = arith.constant 0 : i32
    return %c0_i32, %c0_i32_0 : i32, i32
  }
  func.func @transform_4(%arg0: i32, %arg1: i32) -> (i32, i32) {
    %c0_i32 = arith.constant 0 : i32
    %c0_i32_0 = arith.constant 0 : i32
    %c0_i32_1 = arith.constant 0 : i32
    return %c0_i32, %c0_i32_0 : i32, i32
  }
  func.func @transform_5(%arg0: i32, %arg1: i32) -> (i32, i32) {
    %c0_i32 = arith.constant 0 : i32
    %c0_i32_0 = arith.constant 0 : i32
    %c0_i32_1 = arith.constant 0 : i32
    return %c0_i32, %c0_i32_0 : i32, i32
  }
  func.func @transform_6(%arg0: i32, %arg1: i32) -> (i32, i32) {
    %c3_i32 = arith.constant 3 : i32
    %0 = arith.muli %arg0, %c3_i32 : i32
    %1 = arith.addi %0, %arg1 : i32
    %c0_i32 = arith.constant 0 : i32
    %c0_i32_0 = arith.constant 0 : i32
    return %c0_i32, %1 : i32, i32
  }
  func.func @transform_7(%arg0: i32, %arg1: i32) -> (i32, i32, i32) {
    %c0_i32 = arith.constant 0 : i32
    %c0_i32_0 = arith.constant 0 : i32
    %c0_i32_1 = arith.constant 0 : i32
    return %arg0, %c0_i32, %c0_i32_0 : i32, i32, i32
  }
  func.func @transform_8(%arg0: i32, %arg1: i32) -> (i32, i32, i32) {
    %c0_i32 = arith.constant 0 : i32
    %c0_i32_0 = arith.constant 0 : i32
    %c0_i32_1 = arith.constant 0 : i32
    return %arg0, %c0_i32, %c0_i32_0 : i32, i32, i32
  }
  func.func @transform_9(%arg0: i32, %arg1: i32) -> (i32, i32, i32) {
    %c0_i32 = arith.constant 0 : i32
    %c0_i32_0 = arith.constant 0 : i32
    %c0_i32_1 = arith.constant 0 : i32
    return %arg0, %c0_i32, %c0_i32_0 : i32, i32, i32
  }
}

</mosaic_0001>

<bundles_post_ra>
// kernel: tpu_custom_call.1
= control target key start
LH: loop header
LB: loop body
LE: loop exit
PB: predicated region body
PF: predicated region fallthrough
CT: control target
= control target key end

     0   :  { %s6345_s0 = inlined_call_operand.hbm [shape: bf16[1200,256], index: 0, kind: input, shape index: {}]   ;;  %s6346_s1 = inlined_call_operand.hbm [shape: bf16[256,128], index: 1, kind: input, shape index: {}]   ;;  %s6347_s2 = inlined_call_operand.hbm [shape: bf16[128,256], index: 2, kind: input, shape index: {}]   ;;  %s6348_s3 = inlined_call_operand.vmem [shape: f32[1,256], index: 3, kind: input, shape index: {}]   ;;  %s6349_s4 = inlined_call_operand.vmem [shape: bf16[128,4], index: 4, kind: input, shape index: {}]   ;;  %s6350_s5 = inlined_call_operand.vmem [shape: f32[1,4], index: 5, kind: input, shape index: {}]   ;;  %s6351_s6 = inlined_call_operand.hbm [shape: f32[4,1536], index: 6, kind: output, shape index: {0}]   ;;  %s6352_s7 = inlined_call_operand.vmem [shape: f32[2,4,1], index: 7, kind: output, shape index: {1}]   ;;  %s6353_s8 = inlined_call_operand.vmem [shape: f32[2,4,1], index: 8, kind: output, shape index: {2}]   ;;  %s6354_s9 = inlined_call_operand.hbm [shape: f32[2,4,128], index: 9, kind: output, shape index: {3}]  }
   0x1   :  { %6425 = sst [smem:[#allocation38_spill]] %s6345_s0 }
   0x2   :  { %6426 = sst [smem:[#allocation39_spill]] %s6346_s1 }
   0x3   :  { %6427 = sst [smem:[#allocation40_spill]] %s6347_s2 }
   0x4   :  { %6428 = sst [smem:[#allocation41_spill]] %s6348_s3 }
   0x5   :  { %6429 = sst [smem:[#allocation42_spill]] %s6349_s4 }
   0x6   :  { %6430 = sst [smem:[#allocation43_spill]] %s6350_s5 }
   0x7   :  { %6431 = sst [smem:[#allocation44_spill]] %s6351_s6 }
   0x8   :  { %6432 = sst [smem:[#allocation45_spill]] %s6352_s7 }
   0x9   :  { %6433 = sst [smem:[#allocation46_spill]] %s6353_s8 }
   0xa   :  { %6434 = sst [smem:[#allocation47_spill]] %s6354_s9 }
   0xb   :  { %15 = vsyncpa [#allocation3], 0 }
   0xc   :  { %17 = vsyncpa [#allocation3 + $0x1], 0 }
   0xd   :  { %18 = vsyncpa [#allocation6], 0 }
   0xe   :  { %19 = vsyncpa [#allocation4], 0 }
   0xf   :  { %21 = vsyncpa [#allocation4 + $0x1], 0 }
  0x10   :  { %22 = vsyncpa [#allocation10], 0 }
  0x11   :  { %24 = vsyncpa [#allocation10 + $0x1], 0  ;;  %s4370_s30 = smov 0   ;;  %s4372_s10 = smov 0  }
  0x12   :  { %s4374_s11 = smov 0   ;;  %s4376_s12 = smov 0  }
  0x13   :  { %s4378_s13 = smov 0   ;;  %s4380_s14 = smov 0  }
  0x14   :  { %s4382_s15 = smov 0   ;;  %s4384_s16 = smov 0  }
  0x15   :  { %s4386_s17 = smov 0   ;;  %s4388_s18 = smov 0  }
  0x16   :  { %s4390_s19 = smov 0   ;;  %s4392_s20 = smov 0  }
  0x17   :  { %s4394_s21 = smov 0   ;;  %s4396_s22 = smov 0  }
  0x18 LB: > { %6435 = sst [smem:[#allocation15_spill]] %s4262_s11  ;;  %s3043_s23 = sadd.s32 4294967295, %s4306_s22   ;;  %s4306_s22 = sphi %s4396_s22, %s30_s22   ;;  %s4302_s21 = sphi %s4394_s21, %s6641_s21   ;;  %s4298_s20 = sphi %s4392_s20, %s6640_s20   ;;  %s4294_s19 = sphi %s4390_s19, %s6639_s19   ;;  %s4290_s18 = sphi %s4388_s18, %s6638_s18   ;;  %s4286_s17 = sphi %s4386_s17, %s6649_s17   ;;  %s4282_s16 = sphi %s4384_s16, %s6648_s16   ;;  %s4278_s15 = sphi %s4382_s15, %s6647_s15   ;;  %s4274_s14 = sphi %s4380_s14, %s6646_s14   ;;  %s4270_s13 = sphi %s4378_s13, %s6645_s13   ;;  %s4266_s12 = sphi %s4376_s12, %s6644_s12   ;;  %s4262_s11 = sphi %s4374_s11, %s6634_s11   ;;  %s4258_s10 = sphi %s4372_s10, %s6643_s10   ;;  %s4254_s30 = sphi %s4370_s30, %s6642_s30  }
  0x19   : > { %6436 = sst [smem:[#allocation16_spill]] %s4274_s14  ;;  %s39_s25 = sadd.s32 1, %s4298_s20 }
  0x1a   : > { %6437 = sst [smem:[#allocation17_spill]] %s4298_s20  ;;  %s42_s26 = sadd.s32 1, %s4302_s21 }
  0x1b   : > { %6438 = sst [smem:[#allocation18_spill]] %s4302_s21  ;;  %p40_p0 = scmp.ge.s32.totalorder %s39_s25, 3 }
  0x1c   : > { %s46_s27 = smul.u32 3, %s4302_s21  ;;  %p64_p1 = scmp.ne.s32.totalorder %s4286_s17, %s4282_s16 }
  0x1d   : > { %s6651_s25 = smov (%p40_p0, %s39_s25), 0  ;;  %s6653_s26 = smov (!%p40_p0, %s42_s26), %s4302_s21 }
  0x1e   : > { %6439 = sst [smem:[#allocation19_spill]] %s6651_s25  ;;  %s47_s29 = sadd.s32 %s4298_s20, %s46_s27 }
  0x1f   : > { %p65_p2 = scmp.eq.s32.totalorder %s4306_s22, 0  ;;  %p44_p3 = scmp.ge.s32.totalorder %s6653_s26, 2 }
  0x20   : > { %p48_p4 = scmp.lt.s32.totalorder %s47_s29, 4  ;;  %p70_p6 = scmp.ne.s32.totalorder %s4282_s16, %s4278_s15 }
  0x21   : > { %p4453_p5 = por %p65_p2, %p64_p1  ;;  %s6655_s26 = smov (%p44_p3, %s6653_s26), 0 }
  0x22   : > { %6441 = sst [smem:[#allocation20_spill]] %s6655_s26  ;;  %s50_s28 = smul.u32 3, %s6655_s26 }
  0x23   : > { %s4461_s9 = scalar_select %p48_p4, %s47_s29, 4 }
  0x24   : > { %p4464_p7 = scmp.eq.s32.totalorder %s3043_s23, 0  ;;  %s192_s20 = sadd.s32 1, %s4274_s14 }
  0x25   : > { %p202_p8 = scmp.ne.s32.totalorder %s4274_s14, %s4270_s13  ;;  %s51_s15 = sadd.s32 %s50_s28, %s6651_s25 }
  0x26   : > { %p4474_p9 = por %p4464_p7, %p70_p6  ;;  %p52_p10 = scmp.lt.s32.totalorder %s51_s15, 4 }
  0x27   : > { %s189_s5 = ssub.s32 %s47_s29, %s51_s15  ;;  %p4478_p12 = scmp.eq.s32.totalorder %s3043_s23, 5 }
  0x28   : > { %p190_p11 = scmp.eq.s32.totalorder %s189_s5, 0  ;;  %s6657_s15 = smov (!%p52_p10, %s51_s15), 4 }
  0x29   : > { %s54_s25 = ssub.s32 %s4461_s9, %s6657_s15  ;;  %p4488_p13 = por %p4478_p12, %p202_p8 }
  0x2a   : > { %s4483_s28 = scalar_select %p190_p11, %s4274_s14, %s192_s20  }
  0x2b   : > { %s6446_s4 = scalar_select %p4488_p13, 1, 0 }
  0x2c   : > { %6445 = sst [smem:[#allocation21_spill]] %s4483_s28  ;;  %p55_p0 = scmp.eq.s32.totalorder %s54_s25, 0 }
  0x2d   : > { %p208_p1 = scmp.ne.s32.totalorder %s4270_s13, %s4266_s12  ;;  %s6447_s5 = sadd.s32 4294967294, %s4306_s22  }
  0x2e   : > { %p209_p2 = scmp.eq.s32.totalorder %s6447_s5, 5  ;;  %s267_s23 = ssub.s32 %s4302_s21, %s6655_s26 }
  0x2f   : > { %s6448_s29 = sadd.s32 1, %s4286_s17  ;;  %p268_p4 = scmp.eq.s32.totalorder %s267_s23, 0 }
  0x30   : > { %s4501_s8 = scalar_select %p55_p0, %s4286_s17, %s6448_s29  }
  0x31   : > { %p4503_p3 = por %p209_p2, %p208_p1  ;;  %s270_s20 = sadd.s32 1, %s4262_s11 }
  0x32   : > { %6449 = sst [smem:[#allocation22_spill]] %s4501_s8  ;;  %p280_p6 = scmp.ne.s32.totalorder %s4262_s11, %s4258_s10 }
  0x33   : > { %s4511_s15 = scalar_select %p268_p4, %s4262_s11, %s270_s20  }
  0x34   : > { %p4515_p8 = por %p280_p6, %p4478_p12  ;;  %p286_p10 = scmp.ne.s32.totalorder %s4258_s10, %s4254_s30 }
  0x35   : > { %6451 = sst [smem:[#allocation23_spill]] %s4511_s15  ;;  %p3045_p11 = scmp.ge.s32.totalorder %s4306_s22, 1 }
  0x36   : > { %p294_p13 = scmp.lt.s32.totalorder %s4306_s22, 7  ;;  %p4523_p0 = por %p286_p10, %p209_p2 }
  0x37   : > { %s6456_s1 = sld [smem:[#allocation39_spill]]  ;;  %s4308_s20 = smov [#allocation5]  }
  0x38   : > { %s6453_s5 = scalar_select %p4523_p0, 1, 0 }
  0x39   : > { %p4527_p1 = pnand %p3045_p11, %p294_p13  ;;  %s307_s21 = sshll.u32 %s4308_s20, 4  ;;  %s308_s21 = int_to_ptr.vmem [resolvable:$true] %s307_s21 }
  0x3a   : > { %6454 = sst [smem:[#allocation24_spill]] %s6453_s5  ;;  %s4309_s15 = smov 64  }
  0x3b   : > { %p3670_p12 = pneg %p4527_p1  ;;  %s6457_s2 = sld [smem:[#allocation40_spill]] }
  0x3c   : > { %s4310_s11 = smov 4   ;;  %s4311_s5 = smov [#allocation7]  }
  0x3d   : > { %s305_s3 = sshll.u32 %s6456_s1, 4  ;;  %p3671_p2 = pnand %p3670_p12, %p4464_p7  ;;  %s306_s3 = int_to_ptr.hbm [resolvable:$true] %s305_s3 }
  0x3e   : > { %s321_s26 = sshll.u32 %s4311_s5, 4  ;;  %s4312_s23 = smov 128   ;;  %s322_s26 = int_to_ptr.vmem [resolvable:$true] %s321_s26 }
  0x3f   : > { %3673 = dma.hbm_to_vmem [thread:$0]  (!%p3671_p2), %s306_s3, 2048, %s308_s21, [#allocation6], %s4309_s15, %s4309_s15, %s4310_s11  }
  0x40   : > { %s4313_s1 = smov 8   ;;  %p3048_p13 = scmp.ge.s32.totalorder %s4306_s22, 6 }
  0x41   : > { %s319_s14 = sshll.u32 %s6457_s2, 4  ;;  %s320_s14 = int_to_ptr.hbm [resolvable:$true] %s319_s14 }
  0x42   : > { %3676 = dma.hbm_to_vmem [thread:$0]  (!%p3671_p2), %s320_s14, 2048, %s322_s26, [#allocation6], %s4312_s23, %s4312_s23, %s4313_s1  }
  0x43   : > { %340 = sbr.rel (%p3048_p13) target bundleno = 114 (0x72), region = 36 }
  0x48   : > { %343 = sbr.rel (!%p4453_p5) target bundleno = 114 (0x72), region = 40  ;;  %s344_s8 = sand.u32 (%p4453_p5), 1, %s4286_s17  }
  0x49   : > { %s3050_s28 = sshll.u32 (%p4453_p5), %s4461_s9, 5  ;;  %s3049_s20 = sshll.u32 (%p4453_p5), %s344_s8, 8 }
  0x4a   : > { %s354_s2 = ssub.s32 (%p4453_p5), 150, %s3050_s28  ;;  %s4549_s1 = scalar_lea.sflag (%p4453_p5), [#allocation3], %s344_s8 }
  0x4b   : > { %p355_p4 = scmp.lt.s32.totalorder (%p4453_p5), %s354_s2, 32  ;;  %s348_s14 = scalar_lea.vmem (%p4453_p5), [#allocation2], %s3049_s20 }
  0x4d   : > { %s6659_s2 = smov (!%p355_p4, %s354_s2), 32 }
  0x4e   : > { %s3557_s11 = sshll.u32 %s6659_s2, 3 }
  0x4f   : > { %s359_s21 = ssub.s32 256, %s3557_s11 }
  0x50   : > { %s360_s15 = sshll.u32 %s359_s21, 4 }
  0x51   : > { %361 = vsyncadd %s4549_s1, %s360_s15  ;;  %p4552_p5 = scmp.ne.s32.totalorder %s3557_s11, 0  ;;  %s3559_s5 = sshll.u32 %s4461_s9, 8 }
  0x52   : > { %s6459_s0 = sld [smem:[#allocation38_spill]]  ;;  %s4560_s28 = sshll.u32 %s348_s14, 4  ;;  %s370_s28 = int_to_ptr.vmem [resolvable:$true] %s4560_s28 }
  0x53   : > { %s3057_s20 = sshll.u32 %s6659_s2, 7 }
  0x54   : > { %s4087_s11 = sshrl.u32 %s3057_s20, 4 }
  0x58   : > { %s365_s23 = scalar_lea.hbm %s6459_s0, %s3559_s5  ;;  %s4096_s14 = scalar_lea.hbm %s6459_s0, 1200 }
  0x59   : > { %s367_s8 = sshll.u32 %s365_s23, 4  ;;  %s4563_s8 = int_to_ptr.hbm [resolvable:$true] %s367_s8 }
  0x5a   : > { %s4085_s21 = sshra.s32 %s4563_s8, 4  ;;  %s4086_s21 = int_to_ptr.hbm [resolvable:$true] %s4085_s21 }
  0x5b   : > { %s4092_s15 = scalar_lea.hbm %s4086_s21, %s4087_s11 }
  0x5c   : > { %p4093_p6 = scmp.ne.s32.totalorder %s4086_s21, %s4092_s15  ;;  %p4098_p12 = scmp.lt.s32.totalorder %s4096_s14, %s4092_s15 }
  0x5e   : > { %p4094_p10 = pnand %p4093_p6, %p4552_p5 }
  0x60   : > { %p4095_p11 = pneg %p4094_p10 }
  0x62   : > { %p4100_p2 = pnand %p4098_p12, %p4095_p11 }
  0x64   : > { %4103 = shalt.err (!%p4100_p2)
}
  0x65   : > { %s4104_s3 = sshra.s32 %s370_s28, 4  ;;  %s4314_s23 = smov [#allocation2]   ;;  %s4105_s3 = int_to_ptr.vmem [resolvable:$true] %s4104_s3 }
  0x66   : > { %s4111_s26 = scalar_lea.vmem %s4105_s3, %s4087_s11  ;;  %s4115_s21 = scalar_lea.vmem %s4314_s23, 512 }
  0x67   : > { %p4112_p13 = scmp.ne.s32.totalorder %s4105_s3, %s4111_s26  ;;  %p4117_p6 = scmp.lt.s32.totalorder %s4115_s21, %s4111_s26 }
  0x69   : > { %p4113_p4 = pnand %p4112_p13, %p4552_p5 }
  0x6b   : > { %p4114_p0 = pneg %p4113_p4 }
  0x6d   : > { %p4119_p10 = pnand %p4117_p6, %p4114_p0 }
  0x6f   : > { %4122 = shalt.err (!%p4119_p10)
}
  0x70   : > { %s4315_s9 = smov 128   ;;  %s4316_s15 = smov 8  }
  0x71   : > { %375 = dma.hbm_to_vmem [thread:$0]  (%p4552_p5), %s4563_s8, %s3057_s20, %s370_s28, %s4549_s1, %s4315_s9, %s4315_s9, %s4316_s15  }
  0x72 PF: > { %381 = sbr.rel (%p4527_p1) target bundleno = 1320 (0x528), region = 44 }
  0x77   : > { %s383_s11 = sand.u32 1, %s4282_s16  }
  0x78   : > { %s3059_s5 = sshll.u32 %s383_s11, 8  ;;  %s384_s14 = scalar_lea.sflag [#allocation3], %s383_s11 }
  0x79   : > { %s4589_s3 = scalar_lea.vmem [#allocation2], %s3059_s5 }
  0x7a   : > { %4237 = dma.done.wait (%p4474_p9), %s384_s14, 4096  }
  0x7b   : > { %4239 = vsyncadd (%p4474_p9), %s384_s14, 4294963200 }
  0x7c   : > { %4241 = dma.done.wait (%p4464_p7), [#allocation6], 4096  }
  0x7d   : > { %4243 = vsyncadd (%p4464_p7), [#allocation6], 4294963200  ;;  %s6367_s2 = sand.u32 1, %s4270_s13   ;;  %s6424_s29 = sand.u32 1, %s4258_s10  }
  0x7e   : > { %s4603_s1 = sshll.u32 %s6367_s2, 3  ;;  %s3063_s6 = sshll.u32 %s6424_s29, 2 }
  0x7f   : > { %p459_p9 = scmp.lt.s32.totalorder %s4294_s19, 1  ;;  %s469_s24 = smul.u32 3, %s4294_s19 }
  0x80   : > { %s6460_s23 = sld [smem:[#allocation45_spill]]  ;;  %s426_s14 = scalar_lea.vmem [#allocation8], %s4603_s1 }
  0x81   : > { %s460_s27 = scalar_select %p459_p9, %s4294_s19, 1 }
  0x82   : > { %s4611_s28 = sadd.s32 %s4290_s18, %s469_s24  ;;  %s6461_s11 = sld [smem:[#allocation46_spill]] }
  0x83   : > { %s3064_s8 = sshll.u32 %s460_s27, 2  ;;  %s4624_s2 = scalar_lea.vmem [#allocation9], %s3063_s6 }
  0x84   : > { %p3066_p7 = scmp.ne.s32.totalorder %s4290_s18, 0 }
  0x86   : > { %s4616_s21 = scalar_lea.vmem %s6460_s23, %s3064_s8  ;;  %474 = sbr.rel (%p3066_p7) target bundleno = 143 (0x8f), region = 60 }
  0x88   : > { %s4621_s5 = scalar_lea.vmem %s6461_s11, %s3064_s8 }
  0x8b   : > { %vm475_vm0 = vcmask 3072   ;;  %v4317_v0 = vmov -1e+30   ;;  %v4318_v1 = vmov 0.0  }
  0x8c   : > { %476 = vst.msk [vmem:[%s4616_s21] sm:$0xf] %vm475_vm0, %v4317_v0 }
  0x8d   : > { %477 = vst.msk [vmem:[%s4621_s5] sm:$0xf] %vm475_vm0, %v4318_v1 }
  0x8e   : > { %478 = vst [vmem:[%s4624_s2] sm:$0xf] %v4318_v1 }
  0x8f PF: > { %v3599_v2 = vld [vmem:[#allocation5 + $0x38] sm:$0xff]  ;;  %v3598_v3 = vld [vmem:[#allocation5 + $0x30] sm:$0xff]  ;;  %v3597_v4 = vld [vmem:[#allocation5 + $0x28] sm:$0xff]  ;;  %s3259_s18 = sshll.u32 %s4611_s28, 8  ;;  %s6469_s27 = sld [smem:[#allocation42_spill]] }
  0x90   : > { %3633 = vmatpush.bf16.msra.mxu1 %v3599_v2  ;;  %799 = vmatpush.bf16.msra.mxu0 %v3599_v2  ;;  %v3596_v5 = vld [vmem:[#allocation5 + $0x20] sm:$0xff]  ;;  %v3595_v6 = vld [vmem:[#allocation5 + $0x18] sm:$0xff]  ;;  %v3594_v7 = vld [vmem:[#allocation5 + $0x10] sm:$0xff]  ;;  %s6476_s24 = sld [smem:[#allocation41_spill]]  ;;  %s2837_s15 = sshll.u32 %s426_s14, 4  ;;  %s2838_s15 = int_to_ptr.vmem [resolvable:$true] %s2837_s15 }
  0x91   : > { %3635 = vmatpush.bf16.msra.mxu3 %v3599_v2  ;;  %3634 = vmatpush.bf16.msra.mxu2 %v3599_v2  ;;  %v3593_v8 = vld [vmem:[#allocation5 + $0x8] sm:$0xff]  ;;  %v3592_v9 = vld [vmem:[#allocation5] sm:$0xff]  ;;  %v3109_v10 = vld [vmem:[%s4589_s3 + $0x50] sm:$0xf]  ;;  %s6624_s23 = sld [smem:[#allocation44_spill]]  ;;  %s6625_s11 = sand.u32 1, %s4270_s13  }
  0x92   : > { %v3571_v11 = vld [vmem:[%s4589_s3 + $0x54] sm:$0xf0]  ;;  %v3069_v12 = vld [vmem:[%s4589_s3] sm:$0xf]  ;;  %v3561_v13 = vld [vmem:[%s4589_s3 + $0x4] sm:$0xf0] }
  0x93   : > { %v3607_v14 = vld [vmem:[#allocation5 + $0x78] sm:$0xff]  ;;  %v3110_v15 = vor.u32 %v3571_v11, %v3109_v10  ;;  %v3070_v16 = vor.u32 %v3561_v13, %v3069_v12  ;;  %v3606_v17 = vld [vmem:[#allocation5 + $0x70] sm:$0xff]  ;;  %v3605_v18 = vld [vmem:[#allocation5 + $0x68] sm:$0xff]  ;;  %p6626_p1 = scmp.ne.s32.totalorder %s6446_s4, 0 }
  0x94   : > { %3636 = vmatpush.bf16.msra.mxu1 %v3598_v3  ;;  %800 = vmatpush.bf16.msra.mxu0 %v3598_v3  ;;  %v3604_v19 = vld [vmem:[#allocation5 + $0x60] sm:$0xff]  ;;  %v3573_v21 = vld [vmem:[%s4589_s3 + $0x64] sm:$0xf0]  ;;  %v3077_v22 = vld [vmem:[%s4589_s3 + $0x10] sm:$0xf] }
  0x95   : > { %3638 = vmatpush.bf16.msra.mxu3 %v3598_v3  ;;  %3637 = vmatpush.bf16.msra.mxu2 %v3598_v3  ;;  %v3117_v20 = vld [vmem:[%s4589_s3 + $0x60] sm:$0xf]  ;;  %v3563_v23 = vld [vmem:[%s4589_s3 + $0x14] sm:$0xf0]  ;;  %v3602_v27 = vld [vmem:[#allocation5 + $0x50] sm:$0xff] }
  0x96   : > { %v3603_v24 = vld [vmem:[#allocation5 + $0x58] sm:$0xff]  ;;  %v3118_v25 = vor.u32 %v3573_v21, %v3117_v20  ;;  %v3078_v26 = vor.u32 %v3563_v23, %v3077_v22  ;;  %v3601_v28 = vld [vmem:[#allocation5 + $0x48] sm:$0xff]  ;;  %v3600_v29 = vld [vmem:[#allocation5 + $0x40] sm:$0xff] }
  0x97   : > { %v3560_v30 = vld [vmem:[%s4589_s3 + $0x4] sm:$0xf]  ;;  %v3071_v31 = vld [vmem:[%s4589_s3 + $0x8] sm:$0xf0]  ;;  %v3085_v32 = vld [vmem:[%s4589_s3 + $0x20] sm:$0xf] }
  0x98   : > { %3639 = vmatpush.bf16.msra.mxu1 %v3597_v4  ;;  %801 = vmatpush.bf16.msra.mxu0 %v3597_v4  ;;  %v3565_v33 = vld [vmem:[%s4589_s3 + $0x24] sm:$0xf0]  ;;  %v3074_v34 = vor.u32 %v3560_v30, %v3071_v31  ;;  %v3562_v36 = vld [vmem:[%s4589_s3 + $0x14] sm:$0xf]  ;;  %v3079_v37 = vld [vmem:[%s4589_s3 + $0x18] sm:$0xf0] }
  0x99   : > { %3641 = vmatpush.bf16.msra.mxu3 %v3597_v4  ;;  %3640 = vmatpush.bf16.msra.mxu2 %v3597_v4  ;;  %v3086_v35 = vor.u32 %v3565_v33, %v3085_v32  ;;  %v3093_v38 = vld [vmem:[%s4589_s3 + $0x30] sm:$0xf]  ;;  %v3567_v39 = vld [vmem:[%s4589_s3 + $0x34] sm:$0xf0]  ;;  %v3082_v40 = vor.u32 %v3562_v36, %v3079_v37  ;;  %v3622_v45 = vld [vmem:[#allocation7 + $0x74] sm:$0xf] }
  0x9a   : > { %v3094_v41 = vor.u32 %v3567_v39, %v3093_v38  ;;  %v3157_v42 = vld [vmem:[%s4589_s3 + $0xb0] sm:$0xf]  ;;  %v3583_v43 = vld [vmem:[%s4589_s3 + $0xb4] sm:$0xf0]  ;;  %v3320_v46 = vld [vmem:[#allocation7 + $0x78] sm:$0xf0] }
  0x9b   : > { %v3158_v44 = vor.u32 %v3583_v43, %v3157_v42  ;;  %v3323_v47 = vor.u32 %v3622_v45, %v3320_v46  ;;  %v3564_v48 = vld [vmem:[%s4589_s3 + $0x24] sm:$0xf]  ;;  %v3087_v49 = vld [vmem:[%s4589_s3 + $0x28] sm:$0xf0]  ;;  %v3101_v50 = vld [vmem:[%s4589_s3 + $0x40] sm:$0xf] }
  0x9c   : > { %3642 = vmatpush.bf16.msra.mxu1 %v3596_v5  ;;  %802 = vmatpush.bf16.msra.mxu0 %v3596_v5  ;;  %v3569_v51 = vld [vmem:[%s4589_s3 + $0x44] sm:$0xf0]  ;;  %v3090_v52 = vor.u32 %v3564_v48, %v3087_v49  ;;  %v3165_v54 = vld [vmem:[%s4589_s3 + $0xc0] sm:$0xf]  ;;  %v3620_v56 = vld [vmem:[#allocation7 + $0x64] sm:$0xf] }
  0x9d   : > { %3644 = vmatpush.bf16.msra.mxu3 %v3596_v5  ;;  %3643 = vmatpush.bf16.msra.mxu2 %v3596_v5  ;;  %v3102_v53 = vor.u32 %v3569_v51, %v3101_v50  ;;  %v3585_v55 = vld [vmem:[%s4589_s3 + $0xc4] sm:$0xf0]  ;;  %v3312_v58 = vld [vmem:[#allocation7 + $0x68] sm:$0xf0]  ;;  %v3125_v59 = vld [vmem:[%s4589_s3 + $0x70] sm:$0xf] }
  0x9e   : > { %v3166_v57 = vor.u32 %v3585_v55, %v3165_v54  ;;  %v3575_v60 = vld [vmem:[%s4589_s3 + $0x74] sm:$0xf0]  ;;  %v3315_v61 = vor.u32 %v3620_v56, %v3312_v58  ;;  %v3566_v63 = vld [vmem:[%s4589_s3 + $0x34] sm:$0xf]  ;;  %v3095_v0 = vld [vmem:[%s4589_s3 + $0x38] sm:$0xf0] }
  0x9f   : > { %v3126_v62 = vor.u32 %v3575_v60, %v3125_v59  ;;  %v3098_v1 = vor.u32 %v3566_v63, %v3095_v0  ;;  %v3618_v2 = vld [vmem:[#allocation7 + $0x54] sm:$0xf]  ;;  %v3304_v3 = vld [vmem:[#allocation7 + $0x58] sm:$0xf0]  ;;  %v3173_v4 = vld [vmem:[%s4589_s3 + $0xd0] sm:$0xf] }
  0xa0   : > { %3645 = vmatpush.bf16.msra.mxu1 %v3595_v6  ;;  %803 = vmatpush.bf16.msra.mxu0 %v3595_v6  ;;  %v3307_v5 = vor.u32 %v3618_v2, %v3304_v3  ;;  %v3133_v10 = vld [vmem:[%s4589_s3 + $0x80] sm:$0xf]  ;;  %v3577_v11 = vld [vmem:[%s4589_s3 + $0x84] sm:$0xf0]  ;;  %v3614_v22 = vld [vmem:[#allocation7 + $0x34] sm:$0xf] }
  0xa1   : > { %3647 = vmatpush.bf16.msra.mxu3 %v3595_v6  ;;  %3646 = vmatpush.bf16.msra.mxu2 %v3595_v6  ;;  %v3587_v6 = vld [vmem:[%s4589_s3 + $0xd4] sm:$0xf0]  ;;  %v3134_v13 = vor.u32 %v3577_v11, %v3133_v10  ;;  %v3589_v21 = vld [vmem:[%s4589_s3 + $0xe4] sm:$0xf0]  ;;  %v3288_v23 = vld [vmem:[#allocation7 + $0x38] sm:$0xf0] }
  0xa2   : > { %v3579_v30 = vld [vmem:[%s4589_s3 + $0x94] sm:$0xf0]  ;;  %v3570_v32 = vld [vmem:[%s4589_s3 + $0x54] sm:$0xf]  ;;  %v3111_v33 = vld [vmem:[%s4589_s3 + $0x58] sm:$0xf0] }
  0xa3   : > { %v3280_v36 = vld [vmem:[#allocation7 + $0x28] sm:$0xf0]  ;;  %v3302_v38 = vld [vmem:[#allocation7 + $0x50] sm:$0xf]  ;;  %v3619_v39 = vld [vmem:[#allocation7 + $0x54] sm:$0xf0] }
  0xa4   : > { %3648 = vmatpush.bf16.msra.mxu1 %v3594_v7  ;;  %804 = vmatpush.bf16.msra.mxu0 %v3594_v7  ;;  %v3591_v42 = vld [vmem:[%s4589_s3 + $0xf4] sm:$0xf0]  ;;  %v3272_v45 = vld [vmem:[#allocation7 + $0x18] sm:$0xf0]  ;;  %v3294_v46 = vld [vmem:[#allocation7 + $0x40] sm:$0xf] }
  0xa5   : > { %3650 = vmatpush.bf16.msra.mxu3 %v3594_v7  ;;  %3649 = vmatpush.bf16.msra.mxu2 %v3594_v7  ;;  %v3616_v7 = vld [vmem:[#allocation7 + $0x44] sm:$0xf]  ;;  %v3617_v48 = vld [vmem:[#allocation7 + $0x44] sm:$0xf0]  ;;  %v3149_v49 = vld [vmem:[%s4589_s3 + $0xa0] sm:$0xf] }
  0xa6   : > { %v3581_v50 = vld [vmem:[%s4589_s3 + $0xa4] sm:$0xf0]  ;;  %v3295_v51 = vor.u32 %v3617_v48, %v3294_v46  ;;  %v3119_v54 = vld [vmem:[%s4589_s3 + $0x68] sm:$0xf0]  ;;  %v3286_v55 = vld [vmem:[#allocation7 + $0x30] sm:$0xf] }
  0xa7   : > { %v3615_v56 = vld [vmem:[#allocation7 + $0x34] sm:$0xf0]  ;;  %v3278_v60 = vld [vmem:[#allocation7 + $0x20] sm:$0xf]  ;;  %v3608_v63 = vld [vmem:[#allocation7 + $0x4] sm:$0xf] }
  0xa8   : > { %3651 = vmatpush.bf16.msra.mxu1 %v3593_v8  ;;  %805 = vmatpush.bf16.msra.mxu0 %v3593_v8  ;;  %v3264_v0 = vld [vmem:[#allocation7 + $0x8] sm:$0xf0]  ;;  %v3270_v2 = vld [vmem:[#allocation7 + $0x10] sm:$0xf]  ;;  %v3611_v3 = vld [vmem:[#allocation7 + $0x14] sm:$0xf0] }
  0xa9   : > { %3653 = vmatpush.bf16.msra.mxu3 %v3593_v8  ;;  %3652 = vmatpush.bf16.msra.mxu2 %v3593_v8  ;;  %v3296_v8 = vld [vmem:[#allocation7 + $0x48] sm:$0xf0]  ;;  %v3127_v10 = vld [vmem:[%s4589_s3 + $0x78] sm:$0xf0]  ;;  %v3580_v48 = vld [vmem:[%s4589_s3 + $0xa4] sm:$0xf] }
  0xaa   : > { %v3299_v12 = vor.u32 %v3616_v7, %v3296_v8  ;;  %v3609_v7 = vld [vmem:[#allocation7 + $0x4] sm:$0xf0]  ;;  %s4144_s0 = scalar_lea.hbm %s6624_s23, 48 }
  0xac   : > { %3654 = vmatpush.bf16.msra.mxu1 %v3592_v9  ;;  %806 = vmatpush.bf16.msra.mxu0 %v3592_v9 }
  0xad   : > { %3656 = vmatpush.bf16.msra.mxu3 %v3592_v9  ;;  %3655 = vmatpush.bf16.msra.mxu2 %v3592_v9  ;;  %v3174_v9 = vor.u32 %v3587_v6, %v3173_v4  ;;  %v3271_v4 = vor.u32 %v3611_v3, %v3270_v2  ;;  %v3262_v6 = vld [vmem:[#allocation7] sm:$0xf]  ;;  %v3159_v2 = vld [vmem:[%s4589_s3 + $0xb8] sm:$0xf0] }
  0xae   : > { %v3263_v8 = vor.u32 %v3609_v7, %v3262_v6 }
  0xaf   : > { %832 = vmatmul.bf16.vlgmr.msra.gmra.mxu1 %v3110_v15  ;;  %807 = vmatmul.bf16.vlgmr.msra.gmra.mxu0 %v3070_v16  ;;  %v3103_v15 = vld [vmem:[%s4589_s3 + $0x48] sm:$0xf0] }
  0xb0   : > { %888 = vmatpush.bf16.msrb.mxu1 %v3607_v14  ;;  %862 = vmatmul.bf16.vlgmr.msra.gmra.mxu3 %v3158_v44  ;;  %v3568_v14 = vld [vmem:[%s4589_s3 + $0x44] sm:$0xf]  ;;  %v3610_v44 = vld [vmem:[#allocation7 + $0x14] sm:$0xf] }
  0xb1   : > { %1411 = vmatpush.bf16.msrb.mxu3 %v3323_v47  ;;  %842 = vmatmul.bf16.vlgmr.msra.gmra.mxu2 %v3126_v62  ;;  %v3106_v16 = vor.u32 %v3568_v14, %v3103_v15  ;;  %v3275_v47 = vor.u32 %v3610_v44, %v3272_v45 }
  0xb4   : > { %889 = vmatpush.bf16.msrb.mxu1 %v3606_v17  ;;  %v3318_v17 = vld [vmem:[#allocation7 + $0x70] sm:$0xf] }
  0xb5   : > { %1412 = vmatpush.bf16.msrb.mxu3 %v3315_v61  ;;  %v3613_v61 = vld [vmem:[#allocation7 + $0x24] sm:$0xf0] }
  0xb6   : > { %v3279_v62 = vor.u32 %v3613_v61, %v3278_v60 }
  0xb8   : > { %890 = vmatpush.bf16.msrb.mxu1 %v3605_v18  ;;  %v3623_v18 = vld [vmem:[#allocation7 + $0x74] sm:$0xf0] }
  0xb9   : > { %1413 = vmatpush.bf16.msrb.mxu3 %v3307_v5  ;;  %v3319_v20 = vor.u32 %v3623_v18, %v3318_v17  ;;  %v3576_v17 = vld [vmem:[%s4589_s3 + $0x84] sm:$0xf]  ;;  %v3135_v18 = vld [vmem:[%s4589_s3 + $0x88] sm:$0xf0] }
  0xbb   : > { %1322 = vmatpush.bf16.msrb.mxu2 %v3319_v20  ;;  %v3138_v20 = vor.u32 %v3576_v17, %v3135_v18 }
  0xbc   : > { %891 = vmatpush.bf16.msrb.mxu1 %v3604_v19  ;;  %v3181_v19 = vld [vmem:[%s4589_s3 + $0xe0] sm:$0xf] }
  0xbd   : > { %1414 = vmatpush.bf16.msrb.mxu3 %v3299_v12 }
  0xbf   : > { %837 = vmatmul.bf16.gmra.mxu1 %v3118_v25  ;;  %812 = vmatmul.bf16.gmra.mxu0 %v3078_v26  ;;  %v3291_v25 = vor.u32 %v3614_v22, %v3288_v23  ;;  %v3310_v26 = vld [vmem:[#allocation7 + $0x60] sm:$0xf] }
  0xc0   : > { %892 = vmatpush.bf16.msrb.mxu1 %v3603_v24  ;;  %867 = vmatmul.bf16.gmra.mxu3 %v3166_v57  ;;  %v3182_v24 = vor.u32 %v3589_v21, %v3181_v19  ;;  %v3287_v57 = vor.u32 %v3615_v56, %v3286_v55 }
  0xc1   : > { %847 = vmatmul.bf16.gmra.mxu2 %v3134_v13  ;;  %1415 = vmatpush.bf16.msrb.mxu3 %v3291_v25 }
  0xc4   : > { %893 = vmatpush.bf16.msrb.mxu1 %v3602_v27  ;;  %v3621_v27 = vld [vmem:[#allocation7 + $0x64] sm:$0xf0] }
  0xc8   : > { %894 = vmatpush.bf16.msrb.mxu1 %v3601_v28  ;;  %v3141_v28 = vld [vmem:[%s4589_s3 + $0x90] sm:$0xf] }
  0xc9   : > { %v3142_v31 = vor.u32 %v3579_v30, %v3141_v28 }
  0xcc   : > { %895 = vmatpush.bf16.msrb.mxu1 %v3600_v29  ;;  %v3311_v29 = vor.u32 %v3621_v27, %v3310_v26 }
  0xce   : > { %1323 = vmatpush.bf16.msrb.mxu2 %v3311_v29 }
  0xcf   : > { %896 = vmatmul.bf16.vlgmr.msrb.gmra.mxu1 %v3074_v34  ;;  %817 = vmatmul.bf16.gmra.mxu0 %v3086_v35  ;;  %v3114_v34 = vor.u32 %v3570_v32, %v3111_v33  ;;  %v3612_v35 = vld [vmem:[#allocation7 + $0x24] sm:$0xf]  ;;  %v3578_v33 = vld [vmem:[%s4589_s3 + $0x94] sm:$0xf] }
  0xd0   : > { %872 = vmatmul.bf16.gmra.mxu3 %v3174_v9  ;;  %v3283_v37 = vor.u32 %v3612_v35, %v3280_v36  ;;  %v3574_v9 = vld [vmem:[%s4589_s3 + $0x74] sm:$0xf] }
  0xd1   : > { %852 = vmatmul.bf16.gmra.mxu2 %v3142_v31  ;;  %v3130_v12 = vor.u32 %v3574_v9, %v3127_v10 }
  0xd2   : > { %1416 = vmatpush.bf16.msrb.mxu3 %v3283_v37 }
  0xd6   : > { %1417 = vmatpush.bf16.msrb.mxu3 %v3275_v47 }
  0xdf   : > { %901 = vmatmul.bf16.gmra.mxu1 %v3082_v40  ;;  %822 = vmatmul.bf16.gmra.mxu0 %v3094_v41  ;;  %v3189_v40 = vld [vmem:[%s4589_s3 + $0xf0] sm:$0xf]  ;;  %v3303_v41 = vor.u32 %v3619_v39, %v3302_v38 }
  0xe0   : > { %877 = vmatmul.bf16.gmra.mxu3 %v3182_v24  ;;  %v3190_v43 = vor.u32 %v3591_v42, %v3189_v40  ;;  %v4692_v24 = vstv %s3259_s18  ;;  %s6516_s18 = sld [smem:[#allocation43_spill]] }
  0xe1   : > { %1324 = vmatpush.bf16.msrb.mxu2 %v3303_v41 }
  0xe5   : > { %1325 = vmatpush.bf16.msrb.mxu2 %v3295_v51 }
  0xe6   : > { %s6517_s6 = smov %s6516_s18 }
  0xe9   : > { %1326 = vmatpush.bf16.msrb.mxu2 %v3287_v57 }
  0xed   : > { %1327 = vmatpush.bf16.msrb.mxu2 %v3279_v62 }
  0xef   : > { %906 = vmatmul.bf16.gmra.mxu1 %v3090_v52  ;;  %827 = vmatmul.bf16.gmra.mxu0 %v3102_v53  ;;  %v3150_v52 = vor.u32 %v3581_v50, %v3149_v49  ;;  %v3572_v53 = vld [vmem:[%s4589_s3 + $0x64] sm:$0xf]  ;;  %v3151_v49 = vld [vmem:[%s4589_s3 + $0xa8] sm:$0xf0] }
  0xf0   : > { %882 = vmatmul.bf16.gmra.mxu3 %v3190_v43  ;;  %v3122_v58 = vor.u32 %v3572_v53, %v3119_v54  ;;  %v3154_v51 = vor.u32 %v3580_v48, %v3151_v49 }
  0xf1   : > { %857 = vmatmul.bf16.gmra.mxu2 %v3150_v52 }
  0xf2   : > { %1328 = vmatpush.bf16.msrb.mxu2 %v3271_v4 }
  0xf6   : > { %1329 = vmatpush.bf16.msrb.mxu2 %v3263_v8 }
  0xff   : > { %911 = vmatmul.bf16.gmra.mxu1 %v3098_v1  ;;  %v3267_v1 = vor.u32 %v3608_v63, %v3264_v0 }
 0x101   : > { %1418 = vmatpush.bf16.msrb.mxu3 %v3267_v1  ;;  %v3582_v1 = vld [vmem:[%s4589_s3 + $0xb4] sm:$0xf] }
 0x102   : > { %v3162_v4 = vor.u32 %v3582_v1, %v3159_v2 }
 0x10f   : > { %916 = vmatmul.bf16.gmra.mxu1 %v3106_v16  ;;  %v1010_v16 = vlaneseq }
 0x111   : > { %v4688_v19 = vshrl.u32 %v1010_v16, 7 }
 0x113   : > { %v1012_v22 = vadd.s32 8, %v4688_v19  ;;  %v4696_v25 = vadd.s32 %v4692_v24, %v4688_v19  ;;  %v1013_v38 = vadd.s32 16, %v4688_v19  ;;  %v1014_v39 = vadd.s32 24, %v4688_v19 }
 0x114   : > { %v1015_v54 = vadd.s32 32, %v4688_v19  ;;  %v1016_v55 = vadd.s32 40, %v4688_v19  ;;  %v1017_v8 = vadd.s32 48, %v4688_v19  ;;  %v1018_v9 = vadd.s32 56, %v4688_v19 }
 0x115   : > { %v4699_v26 = vadd.s32 %v4692_v24, %v1012_v22  ;;  %vm6370_vm1 = vcmp.lt.s32.totalorder %v4696_v25, 1200  ;;  %v4722_v40 = vadd.s32 %v4692_v24, %v1013_v38  ;;  %v4725_v41 = vadd.s32 %v4692_v24, %v1014_v39  ;;  %v3584_v22 = vld [vmem:[%s4589_s3 + $0xc4] sm:$0xf] }
 0x116   : > { %v4748_v56 = vadd.s32 %v4692_v24, %v1015_v54  ;;  %v4751_v57 = vadd.s32 %v4692_v24, %v1016_v55  ;;  %v3175_v54 = vld [vmem:[%s4589_s3 + $0xd8] sm:$0xf0] }
 0x117   : > { %vm6405_vm2 = vcmp.lt.s32.totalorder %v4699_v26, 1200  ;;  %6462 = vst [vmem:[#allocation25_spill] sm:$0xff] %v4725_v41  ;;  %vm6404_vm4 = vcmp.lt.s32.totalorder %v4722_v40, 1200  ;;  %vm6399_vm5 = vcmp.lt.s32.totalorder %v4725_v41, 1200 }
 0x118   : > { %vm3324_vm3 = vmpackc.low %vm6405_vm2, %vm6370_vm1  ;;  %6463 = vst [vmem:[#allocation26_spill] sm:$0xff] %v4748_v56  ;;  %vm6398_vm7 = vcmp.lt.s32.totalorder %v4748_v56, 1200  ;;  %vm6393_vm8 = vcmp.lt.s32.totalorder %v4751_v57, 1200 }
 0x119   : > { %vm3327_vm6 = vmpackc.low %vm6399_vm5, %vm6404_vm4  ;;  %6464 = vst [vmem:[#allocation27_spill] sm:$0xff] %v4751_v57 }
 0x11a   : > { %vm3330_vm9 = vmpackc.low %vm6393_vm8, %vm6398_vm7 }
 0x11f   : > { %921 = vmatmul.bf16.gmra.mxu1 %v3114_v34  ;;  %v3143_v34 = vld [vmem:[%s4589_s3 + $0x98] sm:$0xf0] }
 0x120   : > { %v3146_v36 = vor.u32 %v3578_v33, %v3143_v34 }
 0x12c   : > { %v4676_v59 = vpop.f32.mrf.mxu1  ;;  %v808_v11 = vpop.f32.mrf.mxu0 }
 0x12f   : > { %926 = vmatmul.bf16.gmra.mxu1 %v3122_v58 }
 0x133   : > { %v4771_v7 = vpop.f32.mrf.mxu3 }
 0x134   : > { %v4678_v5 = vpop.f32.mrf.mxu1  ;;  %v810_v15 = vpop.f32.mrf.mxu0 }
 0x13b   : > { %v4787_v18 = vpop.f32.mrf.mxu3 }
 0x13c   : > { %v4682_v13 = vpop.f32.mrf.mxu1  ;;  %v813_v23 = vpop.f32.mrf.mxu0 }
 0x13f   : > { %931 = vmatmul.bf16.gmra.mxu1 %v3130_v12  ;;  %v4779_v12 = vadd.s32 %v4692_v24, %v1018_v9 }
 0x141   : > { %6466 = vst [vmem:[#allocation29_spill] sm:$0xff] %v4779_v12  ;;  %vm6386_vm11 = vcmp.lt.s32.totalorder %v4779_v12, 1200 }
 0x143   : > { %v4805_v38 = vpop.f32.mrf.mxu3 }
 0x144   : > { %v4684_v14 = vpop.f32.mrf.mxu1  ;;  %v815_v32 = vpop.f32.mrf.mxu0 }
 0x14b   : > { %v4836_v1 = vpop.f32.mrf.mxu3 }
 0x14c   : > { %v897_v21 = vpop.f32.mrf.mxu1  ;;  %v818_v42 = vpop.f32.mrf.mxu0 }
 0x14d   : > { %v4701_v27 = vadd.f32 %v897_v21, %v808_v11  ;;  %v4776_v11 = vadd.s32 %v4692_v24, %v1017_v8  ;;  %v3630_v8 = vld [vmem:[%s6469_s27 + $0x30] sm:$0xff] }
 0x14f   : > { %936 = vmatmul.bf16.gmra.mxu1 %v3138_v20  ;;  %v6368_v30 = vmax.f32 %v4701_v27, 0.0  ;;  %6465 = vst [vmem:[#allocation28_spill] sm:$0xff] %v4776_v11  ;;  %vm6392_vm10 = vcmp.lt.s32.totalorder %v4776_v11, 1200 }
 0x150   : > { %vm3333_vm12 = vmpackc.low %vm6386_vm11, %vm6392_vm10 }
 0x154   : > { %v899_v28 = vpop.f32.mrf.mxu1  ;;  %v820_v52 = vpop.f32.mrf.mxu0 }
 0x155   : > { %v4703_v29 = vadd.f32 %v899_v28, %v810_v15 }
 0x157   : > { %v6369_v31 = vmax.f32 %v4703_v29, 0.0 }
 0x159   : > { %v3325_v35 = vpack.c.bf16 %v6369_v31, %v6368_v30 }
 0x15b   : > { %3326 = vmatmul.msk.bf16.vlgmr.msrb.gmra.mxu2 %vm3324_vm3, %v3325_v35  ;;  %3374 = vmatmul.msk.bf16.vlgmr.msrb.gmra.mxu3 %vm3324_vm3, %v3325_v35  ;;  %v1019_v35 = vadd.s32 64, %v4688_v19 }
 0x15c   : > { %v902_v37 = vpop.f32.mrf.mxu1  ;;  %v823_v62 = vpop.f32.mrf.mxu0 }
 0x15d   : > { %v4727_v43 = vadd.f32 %v902_v37, %v813_v23  ;;  %v3167_v23 = vld [vmem:[%s4589_s3 + $0xc8] sm:$0xf0]  ;;  %v4803_v37 = vpop.f32.mrf.mxu2  ;;  %v4808_v39 = vadd.s32 %v4692_v24, %v1019_v35 }
 0x15e   : > { %v3170_v33 = vor.u32 %v3584_v22, %v3167_v23  ;;  %v3183_v35 = vld [vmem:[%s4589_s3 + $0xe8] sm:$0xf0] }
 0x15f   : > { %941 = vmatmul.bf16.gmra.mxu1 %v3146_v36  ;;  %v979_v46 = vmax.f32 %v4727_v43, 0.0  ;;  %v1020_v36 = vadd.s32 72, %v4688_v19  ;;  %6467 = vst [vmem:[#allocation30_spill] sm:$0xff] %v4808_v39  ;;  %vm6381_vm13 = vcmp.lt.s32.totalorder %v4808_v39, 1200 }
 0x164   : > { %v904_v44 = vpop.f32.mrf.mxu1  ;;  %v825_v10 = vpop.f32.mrf.mxu0 }
 0x165   : > { %v4729_v45 = vadd.f32 %v904_v44, %v815_v32  ;;  %v4827_v55 = vpop.f32.mrf.mxu2 }
 0x167   : > { %v980_v47 = vmax.f32 %v4729_v45, 0.0  ;;  %v3624_v45 = vld [vmem:[%s6469_s27] sm:$0xff] }
 0x169   : > { %v3328_v50 = vpack.c.bf16 %v980_v47, %v979_v46 }
 0x16b   : > { %3329 = vmatmul.msk.bf16.gmra.mxu2 %vm3327_vm6, %v3328_v50  ;;  %3377 = vmatmul.msk.bf16.gmra.mxu3 %vm3327_vm6, %v3328_v50 }
 0x16c   : > { %v907_v53 = vpop.f32.mrf.mxu1  ;;  %v828_v32 = vpop.f32.mrf.mxu0 }
 0x16d   : > { %v4753_v58 = vadd.f32 %v907_v53, %v818_v42  ;;  %v4811_v42 = vadd.s32 %v4692_v24, %v1020_v36  ;;  %v3586_v53 = vld [vmem:[%s4589_s3 + $0xd4] sm:$0xf] }
 0x16e   : > { %v3178_v2 = vor.u32 %v3586_v53, %v3175_v54  ;;  %v1023_v53 = vadd.s32 96, %v4688_v19  ;;  %v1024_v54 = vadd.s32 104, %v4688_v19 }
 0x16f   : > { %946 = vmatmul.bf16.gmra.mxu1 %v3154_v51  ;;  %v981_v63 = vmax.f32 %v4753_v58, 0.0  ;;  %6468 = vst [vmem:[#allocation31_spill] sm:$0xff] %v4811_v42  ;;  %vm6379_vm14 = vcmp.lt.s32.totalorder %v4811_v42, 1200 }
 0x170   : > { %vm3336_vm15 = vmpackc.low %vm6379_vm14, %vm6381_vm13 }
 0x174   : > { %v909_v60 = vpop.f32.mrf.mxu1  ;;  %v830_v48 = vpop.f32.mrf.mxu0 }
 0x175   : > { %v4755_v61 = vadd.f32 %v909_v60, %v820_v52 }
 0x177   : > { %v982_v0 = vmax.f32 %v4755_v61, 0.0 }
 0x179   : > { %v3331_v3 = vpack.c.bf16 %v982_v0, %v981_v63 }
 0x17b   : > { %3332 = vmatmul.msk.bf16.gmra.mxu2 %vm3330_vm9, %v3331_v3  ;;  %3380 = vmatmul.msk.bf16.gmra.mxu3 %vm3330_vm9, %v3331_v3 }
 0x17c   : > { %v912_v6 = vpop.f32.mrf.mxu1 }
 0x17d   : > { %v4781_v15 = vadd.f32 %v912_v6, %v823_v62  ;;  %v3631_v62 = vld [vmem:[%s6469_s27 + $0x38] sm:$0xff]  ;;  %v1022_v6 = vadd.s32 88, %v4688_v19 }
 0x17e   : > { %2256 = vmatpush.bf16.msrb.mxu0 %v3631_v62  ;;  %v3629_v62 = vld [vmem:[%s6469_s27 + $0x28] sm:$0xff] }
 0x17f   : > { %951 = vmatmul.bf16.gmra.mxu1 %v3162_v4  ;;  %v983_v20 = vmax.f32 %v4781_v15, 0.0  ;;  %v1021_v4 = vadd.s32 80, %v4688_v19 }
 0x181   : > { %v4844_v9 = vadd.s32 %v4692_v24, %v1021_v4 }
 0x182   : > { %2257 = vmatpush.bf16.msrb.mxu0 %v3630_v8 }
 0x183   : > { %6470 = vst [vmem:[#allocation32_spill] sm:$0xff] %v4844_v9  ;;  %vm6376_vm0 = vcmp.lt.s32.totalorder %v4844_v9, 1200 }
 0x184   : > { %v914_v16 = vpop.f32.mrf.mxu1 }
 0x185   : > { %v4783_v17 = vadd.f32 %v914_v16, %v825_v10  ;;  %v4847_v10 = vadd.s32 %v4692_v24, %v1022_v6  ;;  %v4849_v16 = vpop.f32.mrf.mxu2 }
 0x186   : > { %2258 = vmatpush.bf16.msrb.mxu0 %v3629_v62  ;;  %v1026_v62 = vadd.s32 120, %v4688_v19 }
 0x187   : > { %v984_v21 = vmax.f32 %v4783_v17, 0.0  ;;  %6471 = vst [vmem:[#allocation33_spill] sm:$0xff] %v4847_v10  ;;  %vm6375_vm3 = vcmp.lt.s32.totalorder %v4847_v10, 1200  ;;  %v3626_v17 = vld [vmem:[%s6469_s27 + $0x10] sm:$0xff] }
 0x188   : > { %vm3339_vm6 = vmpackc.low %vm6375_vm3, %vm6376_vm0 }
 0x189   : > { %v3334_v28 = vpack.c.bf16 %v984_v21, %v983_v20 }
 0x18b   : > { %3335 = vmatmul.msk.bf16.gmra.mxu2 %vm3333_vm12, %v3334_v28  ;;  %3383 = vmatmul.msk.bf16.gmra.mxu3 %vm3333_vm12, %v3334_v28  ;;  %v4854_v28 = vpop.f32.mrf.mxu3 }
 0x18c   : > { %v917_v34 = vpop.f32.mrf.mxu1 }
 0x18d   : > { %v4813_v44 = vadd.f32 %v917_v34, %v828_v32 }
 0x18f   : > { %956 = vmatmul.bf16.gmra.mxu1 %v3170_v33  ;;  %v985_v51 = vmax.f32 %v4813_v44, 0.0 }
 0x194   : > { %v919_v49 = vpop.f32.mrf.mxu1 }
 0x195   : > { %v4815_v50 = vadd.f32 %v919_v49, %v830_v48  ;;  %v850_v49 = vpop.f32.mrf.mxu2 }
 0x197   : > { %v986_v52 = vmax.f32 %v4815_v50, 0.0  ;;  %v1236_v50 = vld [vmem:[%s6476_s24] sm:$0x3] }
 0x198   : > { %v4990_v44 = vperm.slane %v1236_v50, 1 }
 0x199   : > { %v3337_v60 = vpack.c.bf16 %v986_v52, %v985_v51 }
 0x19b   : > { %3338 = vmatmul.msk.bf16.gmra.mxu2 %vm3336_vm15, %v3337_v60  ;;  %3386 = vmatmul.msk.bf16.gmra.mxu3 %vm3336_vm15, %v3337_v60  ;;  %v4875_v60 = vpop.f32.mrf.mxu3 }
 0x19c   : > { %v922_v3 = vpop.f32.mrf.mxu1 }
 0x19d   : > { %v4852_v22 = vadd.f32 %v922_v3, %v4676_v59  ;;  %v3588_v59 = vld [vmem:[%s4589_s3 + $0xe4] sm:$0xf]  ;;  %v4884_v3 = vadd.s32 %v4692_v24, %v1024_v54 }
 0x19e   : > { %v3186_v36 = vor.u32 %v3588_v59, %v3183_v35 }
 0x19f   : > { %961 = vmatmul.bf16.gmra.mxu1 %v3178_v2  ;;  %v987_v33 = vmax.f32 %v4852_v22, 0.0  ;;  %v4881_v2 = vadd.s32 %v4692_v24, %v1023_v53  ;;  %6473 = vst [vmem:[#allocation35_spill] sm:$0xff] %v4884_v3  ;;  %vm6373_vm12 = vcmp.lt.s32.totalorder %v4884_v3, 1200 }
 0x1a1   : > { %6472 = vst [vmem:[#allocation34_spill] sm:$0xff] %v4881_v2  ;;  %vm6374_vm9 = vcmp.lt.s32.totalorder %v4881_v2, 1200 }
 0x1a2   : > { %vm3342_vm15 = vmpackc.low %vm6373_vm12, %vm6374_vm9 }
 0x1a4   : > { %v924_v23 = vpop.f32.mrf.mxu1 }
 0x1a5   : > { %v4857_v32 = vadd.f32 %v924_v23, %v4678_v5  ;;  %v4890_v23 = vpop.f32.mrf.mxu2 }
 0x1a7   : > { %v988_v34 = vmax.f32 %v4857_v32, 0.0  ;;  %v3627_v32 = vld [vmem:[%s6469_s27 + $0x18] sm:$0xff] }
 0x1a9   : > { %v3340_v5 = vpack.c.bf16 %v988_v34, %v987_v33 }
 0x1ab   : > { %3341 = vmatmul.msk.bf16.gmra.mxu2 %vm3339_vm6, %v3340_v5  ;;  %3389 = vmatmul.msk.bf16.gmra.mxu3 %vm3339_vm6, %v3340_v5  ;;  %v4892_v5 = vpop.f32.mrf.mxu3 }
 0x1ac   : > { %v927_v48 = vpop.f32.mrf.mxu1 }
 0x1ad   : > { %v928_v4 = vadd.f32 %v927_v48, %v4682_v13  ;;  %v3191_v13 = vld [vmem:[%s4589_s3 + $0xf8] sm:$0xf0] }
 0x1af   : > { %966 = vmatmul.bf16.gmra.mxu1 %v3186_v36  ;;  %v989_v59 = vmax.f32 %v928_v4, 0.0  ;;  %v3590_v36 = vld [vmem:[%s4589_s3 + $0xf4] sm:$0xf]  ;;  %v1025_v4 = vadd.s32 112, %v4688_v19 }
 0x1b0   : > { %v3194_v53 = vor.u32 %v3590_v36, %v3191_v13 }
 0x1b1   : > { %v4911_v30 = vadd.s32 %v4692_v24, %v1025_v4 }
 0x1b3   : > { %6475 = vst [vmem:[#allocation37_spill] sm:$0xff] %v4911_v30  ;;  %v4913_v31 = vpop.f32.mrf.mxu3 }
 0x1b4   : > { %v929_v6 = vpop.f32.mrf.mxu1 }
 0x1b5   : > { %v930_v8 = vadd.f32 %v929_v6, %v4684_v14  ;;  %v3628_v14 = vld [vmem:[%s6469_s27 + $0x20] sm:$0xff]  ;;  %v4905_v6 = vpop.f32.mrf.mxu2 }
 0x1b6   : > { %2259 = vmatpush.bf16.msrb.mxu0 %v3628_v14 }
 0x1b7   : > { %v990_v35 = vmax.f32 %v930_v8, 0.0  ;;  %v4908_v8 = vadd.s32 %v4692_v24, %v1026_v62 }
 0x1b9   : > { %v3343_v48 = vpack.c.bf16 %v990_v35, %v989_v59  ;;  %6474 = vst [vmem:[#allocation36_spill] sm:$0xff] %v4908_v8  ;;  %vm6371_vm6 = vcmp.lt.s32.totalorder %v4908_v8, 1200 }
 0x1ba   : > { %2260 = vmatpush.bf16.msrb.mxu0 %v3627_v32 }
 0x1bb   : > { %3344 = vmatmul.msk.bf16.gmra.mxu2 %vm3342_vm15, %v3343_v48  ;;  %3392 = vmatmul.msk.bf16.gmra.mxu3 %vm3342_vm15, %v3343_v48  ;;  %vm6372_vm15 = vcmp.lt.s32.totalorder %v4911_v30, 1200 }
 0x1bc   : > { %v932_v54 = vpop.f32.mrf.mxu1  ;;  %vm3345_vm1 = vmpackc.low %vm6371_vm6, %vm6372_vm15 }
 0x1bd   : > { %v933_v48 = vadd.f32 %v932_v54, %v4803_v37  ;;  %v4925_v4 = vpop.f32.mrf.mxu2  ;;  %v4927_v37 = vpop.f32.mrf.mxu3  ;;  %v1027_v54 = vadd.s32 128, %v4688_v19 }
 0x1be   : > { %2261 = vmatpush.bf16.msrb.mxu0 %v3626_v17 }
 0x1bf   : > { %971 = vmatmul.bf16.gmra.mxu1 %v3194_v53  ;;  %v991_v14 = vmax.f32 %v933_v48, 0.0  ;;  %v1028_v48 = vadd.s32 136, %v4688_v19 }
 0x1c4   : > { %v934_v36 = vpop.f32.mrf.mxu1 }
 0x1c5   : > { %v935_v13 = vadd.f32 %v934_v36, %v4827_v55  ;;  %v4938_v36 = vadd.s32 %v4692_v24, %v1027_v54 }
 0x1c7   : > { %v992_v53 = vmax.f32 %v935_v13, 0.0  ;;  %v4941_v13 = vadd.s32 %v4692_v24, %v1028_v48 }
 0x1c9   : > { %v3346_v62 = vpack.c.bf16 %v992_v53, %v991_v14  ;;  %3518 = vmatpush.msk.msra.mxu1 %vm6371_vm6, %v992_v53  ;;  %vm6411_vm6 = vcmp.lt.s32.totalorder %v4941_v13, 1200 }
 0x1cb   : > { %3347 = vmatmul.msk.bf16.gmra.mxu2 %vm3345_vm1, %v3346_v62  ;;  %3395 = vmatmul.msk.bf16.gmra.mxu3 %vm3345_vm1, %v3346_v62  ;;  %vm6410_vm1 = vcmp.lt.s32.totalorder %v4938_v36, 1200 }
 0x1cc   : > { %3519 = vmatpush.msk.msra.mxu1 %vm6372_vm15, %v991_v14  ;;  %v937_v55 = vpop.f32.mrf.mxu1  ;;  %vm3348_vm15 = vmpackc.low %vm6411_vm6, %vm6410_vm1 }
 0x1cd   : > { %v4948_v14 = vadd.f32 %v937_v55, %v4849_v16  ;;  %v4963_v16 = vpop.f32.mrf.mxu3 }
 0x1ce   : > { %3520 = vmatpush.msk.msra.mxu1 %vm6373_vm12, %v990_v35  ;;  %v4954_v35 = vpop.f32.mrf.mxu2 }
 0x1cf   : > { %v6377_v22 = vmax.f32 %v4948_v14, 0.0 }
 0x1d0   : > { %3521 = vmatpush.msk.msra.mxu1 %vm6374_vm9, %v989_v59  ;;  %vm6479_vm9 = vcmp.lt.s32.totalorder %v4696_v25, 1200 }
 0x1d2   : > { %3522 = vmatpush.msk.msra.mxu1 %vm6375_vm3, %v988_v34  ;;  %v1029_v34 = vadd.s32 144, %v4688_v19 }
 0x1d4   : > { %3523 = vmatpush.msk.msra.mxu1 %vm6376_vm0, %v987_v33  ;;  %v939_v59 = vpop.f32.mrf.mxu1  ;;  %v5016_v61 = vadd.s32 %v4692_v24, %v1029_v34  ;;  %v1031_v34 = vadd.s32 160, %v4688_v19 }
 0x1d5   : > { %v4956_v53 = vadd.f32 %v939_v59, %v850_v49  ;;  %v1030_v49 = vadd.s32 152, %v4688_v19  ;;  %v6478_v59 = vmax.f32 %v4701_v27, 0.0 }
 0x1d6   : > { %3524 = vmatpush.msk.msra.mxu1 %vm6379_vm14, %v986_v52 }
 0x1d7   : > { %v6378_v33 = vmax.f32 %v4956_v53, 0.0 }
 0x1d8   : > { %3525 = vmatpush.msk.msra.mxu1 %vm6381_vm13, %v985_v51 }
 0x1d9   : > { %v3349_v52 = vpack.c.bf16 %v6378_v33, %v6377_v22 }
 0x1da   : > { %3526 = vmatpush.msk.msra.mxu1 %vm6386_vm11, %v984_v21 }
 0x1db   : > { %3350 = vmatmul.msk.bf16.gmra.mxu2 %vm3348_vm15, %v3349_v52  ;;  %3398 = vmatmul.msk.bf16.gmra.mxu3 %vm3348_vm15, %v3349_v52  ;;  %vm6415_vm15 = vcmp.lt.s32.totalorder %v5016_v61, 1200 }
 0x1dc   : > { %3527 = vmatpush.msk.msra.mxu1 %vm6392_vm10, %v983_v20  ;;  %v942_v51 = vpop.f32.mrf.mxu1  ;;  %v3625_v20 = vld [vmem:[%s6469_s27 + $0x8] sm:$0xff] }
 0x1dd   : > { %v5026_v54 = vadd.f32 %v942_v51, %v4890_v23  ;;  %2262 = vmatpush.bf16.msrb.mxu0 %v3625_v20 }
 0x1de   : > { %3528 = vmatpush.msk.msra.mxu1 %vm6393_vm8, %v982_v0  ;;  %v5005_v21 = vpop.f32.mrf.mxu2  ;;  %v1420_v15 = vpop.f32.mrf.mxu3  ;;  %v5019_v0 = vadd.s32 %v4692_v24, %v1030_v49  ;;  %v1032_v49 = vadd.s32 168, %v4688_v19 }
 0x1df   : > { %v1421_v62 = vadd.f32 %v1420_v15, %v4990_v44 }
 0x1e0   : > { %3529 = vmatpush.msk.msra.mxu1 %vm6398_vm7, %v981_v63  ;;  %vm6416_vm12 = vcmp.lt.s32.totalorder %v5019_v0, 1200 }
 0x1e1   : > { %v3420_v55 = vmul.f32 -1.442695, %v1421_v62  ;;  %2263 = vmatpush.bf16.msrb.mxu0 %v3624_v45  ;;  %vm3351_vm3 = vmpackc.low %vm6416_vm12, %vm6415_vm15  ;;  %v5071_v45 = vadd.s32 %v4692_v24, %v1032_v49 }
 0x1e2   : > { %3530 = vmatpush.msk.msra.mxu1 %vm6399_vm5, %v980_v47  ;;  %v6477_v47 = vmax.f32 %v4703_v29, 0.0 }
 0x1e3   : > { %3826 = vpow2.f32 %v3420_v55 }
 0x1e4   : > { %3531 = vmatpush.msk.msra.mxu1 %vm6404_vm4, %v979_v46  ;;  %v944_v58 = vpop.f32.mrf.mxu1  ;;  %v6380_v46 = vmax.f32 %v5026_v54, 0.0 }
 0x1e5   : > { %v5033_v63 = vadd.f32 %v944_v58, %v4905_v6  ;;  %v5068_v58 = vadd.s32 %v4692_v24, %v1031_v34 }
 0x1e6   : > { %3532 = vmatpush.msk.msra.mxu1 %vm6405_vm2, %v6477_v47  ;;  %v1333_v43 = vpop.f32.mrf.mxu2  ;;  %v1422_v23 = vpop.f32.mrf.mxu3 }
 0x1e7   : > { %v6382_v6 = vmax.f32 %v5033_v63, 0.0  ;;  %v1423_v48 = vadd.f32 %v1422_v23, %v4990_v44 }
 0x1e8   : > { %3533 = vmatpush.msk.msra.mxu1 %vm6479_vm9, %v6478_v59  ;;  %vm1097_vm9 = vcmp.lt.s32.totalorder %v5071_v45, 1200 }
 0x1e9   : > { %v3827_v29 = vpop.eup %3826  ;;  %v3352_v32 = vpack.c.bf16 %v6382_v6, %v6380_v46  ;;  %v3421_v52 = vmul.f32 -1.442695, %v1423_v48 }
 0x1ea   : > { %v5059_v51 = vadd.f32 1.0, %v3827_v29  ;;  %v5082_v29 = vperm.slane %v1236_v50, 0 }
 0x1eb   : > { %3828 = vpow2.f32 %v3421_v52  ;;  %3353 = vmatmul.msk.bf16.gmra.mxu2 %vm3351_vm3, %v3352_v32  ;;  %3401 = vmatmul.msk.bf16.gmra.mxu3 %vm3351_vm3, %v3352_v32  ;;  %vm1096_vm3 = vcmp.lt.s32.totalorder %v5068_v58, 1200 }
 0x1ec   : > { %3830 = vrcp.f32 %v5059_v51  ;;  %v947_v27 = vpop.f32.mrf.mxu1  ;;  %vm3354_vm0 = vmpackc.low %vm1097_vm9, %vm1096_vm3  ;;  %v1671_v46 = vand.u32 2147483648, %v5059_v51  ;;  %vm1665_vm13 = vweird.f32 %v5059_v51 }
 0x1ed   : > { %v5080_v59 = vadd.f32 %v947_v27, %v4925_v4 }
 0x1ee   : > { %v5064_v17 = vpop.f32.mrf.mxu2  ;;  %v1425_v15 = vpop.f32.mrf.mxu3 }
 0x1ef   : > { %v1426_v62 = vadd.f32 %v1425_v15, %v4990_v44  ;;  %v6383_v4 = vmax.f32 %v5080_v59, 0.0 }
 0x1f1   : > { %v3829_v20 = vpop.eup %3828  ;;  %v3422_v55 = vmul.f32 -1.442695, %v1426_v62 }
 0x1f2   : > { %v5073_v47 = vpop.eup %3830  ;;  %v5075_v23 = vadd.f32 1.0, %v3829_v20  ;;  %v1332_v20 = vadd.f32 %v5005_v21, %v5082_v29 }
 0x1f3   : > { %v1661_v48 = vmul.f32 %v5073_v47, %v5059_v51  ;;  %3832 = vpow2.f32 %v3422_v55  ;;  %vm1666_vm14 = vweird.f32 %v5073_v47 }
 0x1f4   : > { %3834 = vrcp.f32 %v5075_v23  ;;  %v949_v32 = vpop.f32.mrf.mxu1 }
 0x1f5   : > { %v1662_v52 = vsub.f32 1.0, %v1661_v48  ;;  %v5086_v34 = vadd.f32 %v949_v32, %v4954_v35 }
 0x1f6   : > { %v5090_v49 = vpop.f32.mrf.mxu2  ;;  %v1427_v15 = vpop.f32.mrf.mxu3 }
 0x1f7   : > { %v6384_v27 = vmax.f32 %v5086_v34, 0.0  ;;  %v1428_v50 = vadd.f32 %v1427_v15, %v4990_v44  ;;  %v1663_v62 = vmul.f32 %v5073_v47, %v1662_v52  ;;  %v1334_v15 = vadd.f32 %v1333_v43, %v5082_v29 }
 0x1f8   : > { %v1034_v43 = vadd.s32 184, %v4688_v19 }
 0x1f9   : > { %v3833_v35 = vpop.eup %3832  ;;  %v3355_v55 = vpack.c.bf16 %v6384_v27, %v6383_v4  ;;  %v3423_v48 = vmul.f32 -1.442695, %v1428_v50  ;;  %v1664_v33 = vadd.f32 %v5073_v47, %v1663_v62  ;;  %v1033_v50 = vadd.s32 176, %v4688_v19 }
 0x1fa   : > { %v3835_v32 = vpop.eup %3834  ;;  %v5107_v22 = vadd.f32 1.0, %v3833_v35  ;;  %v1684_v4 = vand.u32 2147483647, %v5075_v23  ;;  %v1686_v27 = vand.u32 2147483648, %v5075_v23  ;;  %v5134_v30 = vadd.s32 %v4692_v24, %v1034_v43 }
 0x1fb   : > { %v1676_v52 = vmul.f32 %v3835_v32, %v5075_v23  ;;  %3836 = vpow2.f32 %v3423_v48  ;;  %3356 = vmatmul.msk.bf16.gmra.mxu2 %vm3354_vm0, %v3355_v55  ;;  %3404 = vmatmul.msk.bf16.gmra.mxu3 %vm3354_vm0, %v3355_v55  ;;  %v1669_v48 = vand.u32 2147483647, %v5059_v51  ;;  %vm5120_vm0 = vmor %vm1665_vm13, %vm1666_vm14  ;;  %vm1681_vm11 = vweird.f32 %v3835_v32 }
 0x1fc   : > { %3838 = vrcp.f32 %v5107_v22  ;;  %v952_v21 = vpop.f32.mrf.mxu1  ;;  %v1672_v51 = vor.u32 1.1754944e-38, %v1671_v46  ;;  %vm1680_vm14 = vweird.f32 %v5075_v23  ;;  %vm1685_vm10 = vcmp.eq.f32.partialorder %v1684_v4, 8.507059e+37 }
 0x1fd   : > { %3840 = vtanh.f32 %v1332_v20  ;;  %v1677_v35 = vsub.f32 1.0, %v1676_v52  ;;  %v1668_v20 = vsel %vm5120_vm0, %v5073_v47, %v1664_v33  ;;  %vm1670_vm13 = vcmp.eq.f32.partialorder %v1669_v48, 8.507059e+37  ;;  %vm1682_vm0 = vmor %vm1680_vm14, %vm1681_vm11 }
 0x1fe   : > { %3842 = vtanh.f32 %v1334_v15  ;;  %v5118_v55 = vpop.f32.mrf.mxu2  ;;  %v1430_v62 = vpop.f32.mrf.mxu3  ;;  %v5131_v15 = vadd.s32 %v4692_v24, %v1033_v50  ;;  %v1673_v33 = vsel %vm1670_vm13, %v1672_v51, %v1668_v20  ;;  %v1687_v46 = vor.u32 1.1754944e-38, %v1686_v27 }
 0x1ff   : > { %v1431_v8 = vadd.f32 %v1430_v62, %v4990_v44  ;;  %v1678_v52 = vmul.f32 %v3835_v32, %v1677_v35  ;;  %v5142_v47 = vadd.f32 %v952_v21, %v4771_v7  ;;  %vm1099_vm11 = vcmp.lt.s32.totalorder %v5134_v30, 1200 }
 0x200   : > { %vm1098_vm8 = vcmp.lt.s32.totalorder %v5131_v15, 1200  ;;  %v1337_v51 = vadd.f32 %v5064_v17, %v5082_v29  ;;  %vm1695_vm14 = vweird.f32 %v5107_v22 }
 0x201   : > { %v3837_v3 = vpop.eup %3836  ;;  %v3424_v2 = vmul.f32 -1.442695, %v1431_v8  ;;  %v1679_v10 = vadd.f32 %v3835_v32, %v1678_v52 }
 0x202   : > { %v5137_v62 = vpop.eup %3838  ;;  %v5139_v9 = vadd.f32 1.0, %v3837_v3 }
 0x203   : > { %v3841_v6 = vpop.eup %3840  ;;  %3844 = vpow2.f32 %v3424_v2  ;;  %v1683_v50 = vsel %vm1682_vm0, %v3835_v32, %v1679_v10  ;;  %v1691_v8 = vmul.f32 %v5137_v62, %v5107_v22  ;;  %v6394_v32 = vmax.f32 %v5142_v47, 0.0 }
 0x204   : > { %v3843_v43 = vpop.eup %3842  ;;  %3846 = vrcp.f32 %v5139_v9  ;;  %v954_v23 = vpop.f32.mrf.mxu1  ;;  %v1688_v35 = vsel %vm1685_vm10, %v1687_v46, %v1683_v50  ;;  %v2140_v4 = vmul.f32 %v3841_v6, %v1673_v33  ;;  %vm3357_vm10 = vmpackc.low %vm1099_vm11, %vm1098_vm8  ;;  %v1339_v50 = vadd.f32 %v5090_v49, %v5082_v29 }
 0x205   : > { %v5150_v3 = vadd.f32 %v954_v23, %v4787_v18  ;;  %v2141_v7 = vmul.f32 %v3843_v43, %v1688_v35  ;;  %v1692_v27 = vsub.f32 1.0, %v1691_v8  ;;  %vm1696_vm13 = vweird.f32 %v5137_v62 }
 0x206   : > { %v5152_v2 = vpop.f32.mrf.mxu2  ;;  %v1432_v10 = vpop.f32.mrf.mxu3  ;;  %v1701_v35 = vand.u32 2147483648, %v5107_v22  ;;  %v1036_v49 = vadd.s32 200, %v4688_v19  ;;  %vm5183_vm0 = vmor %vm1695_vm14, %vm1696_vm13  ;;  %vm1710_vm14 = vweird.f32 %v5139_v9 }
 0x207   : > { %v6395_v21 = vmax.f32 %v5150_v3, 0.0  ;;  %v1433_v48 = vadd.f32 %v1432_v10, %v4990_v44  ;;  %v2172_v20 = vpack.c.bf16 %v2141_v7, %v2140_v4  ;;  %v1693_v18 = vmul.f32 %v5137_v62, %v1692_v27 }
 0x208   : > { %v1035_v4 = vadd.s32 192, %v4688_v19  ;;  %v1699_v7 = vand.u32 2147483647, %v5107_v22 }
 0x209   : > { %v3845_v52 = vpop.eup %3844  ;;  %v3358_v33 = vpack.c.bf16 %v6395_v21, %v6394_v32  ;;  %v3425_v46 = vmul.f32 -1.442695, %v1433_v48  ;;  %2264 = vmatmul.bf16.vlgmr.msrb.gmra.mxu0 %v2172_v20  ;;  %v1694_v43 = vadd.f32 %v5137_v62, %v1693_v18  ;;  %v1714_v18 = vand.u32 2147483647, %v5139_v9 }
 0x20a   : > { %v3847_v6 = vpop.eup %3846  ;;  %v5170_v8 = vadd.f32 1.0, %v3845_v52  ;;  %v1716_v52 = vand.u32 2147483648, %v5139_v9  ;;  %vm1700_vm13 = vcmp.eq.f32.partialorder %v1699_v7, 8.507059e+37 }
 0x20b   : > { %3848 = vpow2.f32 %v3425_v46  ;;  %3359 = vmatmul.msk.bf16.gmra.mxu2 %vm3357_vm10, %v3358_v33  ;;  %3407 = vmatmul.msk.bf16.gmra.mxu3 %vm3357_vm10, %v3358_v33  ;;  %v1706_v17 = vmul.f32 %v3847_v6, %v5139_v9  ;;  %vm1711_vm10 = vweird.f32 %v3847_v6  ;;  %v1702_v46 = vor.u32 1.1754944e-38, %v1701_v35 }
 0x20c   : > { %3850 = vrcp.f32 %v5170_v8  ;;  %v957_v23 = vpop.f32.mrf.mxu1  ;;  %vm1715_vm7 = vcmp.eq.f32.partialorder %v1714_v18, 8.507059e+37 }
 0x20d   : > { %3852 = vtanh.f32 %v1337_v51  ;;  %v1707_v27 = vsub.f32 1.0, %v1706_v17  ;;  %v1698_v51 = vsel %vm5183_vm0, %v5137_v62, %v1694_v43  ;;  %v5197_v17 = vadd.s32 %v4692_v24, %v1036_v49  ;;  %vm1712_vm0 = vmor %vm1710_vm14, %vm1711_vm10 }
 0x20e   : > { %3854 = vtanh.f32 %v1339_v50  ;;  %v5181_v10 = vpop.f32.mrf.mxu2  ;;  %v1435_v48 = vpop.f32.mrf.mxu3  ;;  %v5194_v50 = vadd.s32 %v4692_v24, %v1035_v4  ;;  %v1703_v62 = vsel %vm1700_vm13, %v1702_v46, %v1698_v51  ;;  %v1717_v43 = vor.u32 1.1754944e-38, %v1716_v52 }
 0x20f   : > { %v1436_v33 = vadd.f32 %v1435_v48, %v4990_v44  ;;  %v1708_v22 = vmul.f32 %v3847_v6, %v1707_v27  ;;  %v5205_v4 = vadd.f32 %v957_v23, %v4805_v38  ;;  %vm6423_vm10 = vcmp.lt.s32.totalorder %v5197_v17, 1200 }
 0x210   : > { %vm1100_vm5 = vcmp.lt.s32.totalorder %v5194_v50, 1200  ;;  %v1342_v46 = vadd.f32 %v5118_v55, %v5082_v29  ;;  %vm1725_vm14 = vweird.f32 %v5170_v8 }
 0x211   : > { %v3849_v32 = vpop.eup %3848  ;;  %v3426_v21 = vmul.f32 -1.442695, %v1436_v33  ;;  %v1709_v42 = vadd.f32 %v3847_v6, %v1708_v22 }
 0x212   : > { %v5200_v48 = vpop.eup %3850  ;;  %v5202_v39 = vadd.f32 1.0, %v3849_v32 }
 0x213   : > { %v3853_v35 = vpop.eup %3852  ;;  %3856 = vpow2.f32 %v3426_v21  ;;  %v1713_v49 = vsel %vm1712_vm0, %v3847_v6, %v1709_v42  ;;  %v1721_v7 = vmul.f32 %v5200_v48, %v5170_v8  ;;  %v6400_v6 = vmax.f32 %v5205_v4, 0.0 }
 0x214   : > { %v3855_v27 = vpop.eup %3854  ;;  %3858 = vrcp.f32 %v5202_v39  ;;  %v959_v9 = vpop.f32.mrf.mxu1  ;;  %v1718_v20 = vsel %vm1715_vm7, %v1717_v43, %v1713_v49  ;;  %v2142_v18 = vmul.f32 %v3853_v35, %v1703_v62  ;;  %vm3360_vm7 = vmpackc.low %vm6423_vm10, %vm1100_vm5  ;;  %v1344_v49 = vadd.f32 %v5152_v2, %v5082_v29 }
 0x215   : > { %v5213_v32 = vadd.f32 %v959_v9, %v4836_v1  ;;  %v2143_v38 = vmul.f32 %v3855_v27, %v1718_v20  ;;  %v1722_v23 = vsub.f32 1.0, %v1721_v7  ;;  %vm1726_vm13 = vweird.f32 %v5200_v48 }
 0x216   : > { %v5215_v21 = vpop.f32.mrf.mxu2  ;;  %v1437_v42 = vpop.f32.mrf.mxu3  ;;  %v1731_v20 = vand.u32 2147483648, %v5170_v8  ;;  %v1038_v2 = vadd.s32 216, %v4688_v19  ;;  %vm5246_vm0 = vmor %vm1725_vm14, %vm1726_vm13  ;;  %vm1740_vm14 = vweird.f32 %v5202_v39 }
 0x217   : > { %v6401_v52 = vmax.f32 %v5213_v32, 0.0  ;;  %v1438_v33 = vadd.f32 %v1437_v42, %v4990_v44  ;;  %v2173_v51 = vpack.c.bf16 %v2143_v38, %v2142_v18  ;;  %v1723_v1 = vmul.f32 %v5200_v48, %v1722_v23 }
 0x218   : > { %v1037_v18 = vadd.s32 208, %v4688_v19  ;;  %v1729_v38 = vand.u32 2147483647, %v5170_v8 }
 0x219   : > { %v3857_v22 = vpop.eup %3856  ;;  %v3361_v62 = vpack.c.bf16 %v6401_v52, %v6400_v6  ;;  %v3427_v43 = vmul.f32 -1.442695, %v1438_v33  ;;  %2269 = vmatmul.bf16.gmra.mxu0 %v2173_v51  ;;  %v1724_v27 = vadd.f32 %v5200_v48, %v1723_v1  ;;  %v1744_v1 = vand.u32 2147483647, %v5202_v39 }
 0x21a   : > { %v3859_v35 = vpop.eup %3858  ;;  %v5233_v7 = vadd.f32 1.0, %v3857_v22  ;;  %v1746_v22 = vand.u32 2147483648, %v5202_v39  ;;  %vm1730_vm13 = vcmp.eq.f32.partialorder %v1729_v38, 8.507059e+37 }
 0x21b   : > { %3860 = vpow2.f32 %v3427_v43  ;;  %3362 = vmatmul.msk.bf16.gmra.mxu2 %vm3360_vm7, %v3361_v62  ;;  %3410 = vmatmul.msk.bf16.gmra.mxu3 %vm3360_vm7, %v3361_v62  ;;  %v1736_v55 = vmul.f32 %v3859_v35, %v5202_v39  ;;  %vm1741_vm7 = vweird.f32 %v3859_v35  ;;  %v1732_v43 = vor.u32 1.1754944e-38, %v1731_v20 }
 0x21c   : > { %3862 = vrcp.f32 %v5233_v7  ;;  %v962_v9 = vpop.f32.mrf.mxu1  ;;  %vm1745_vm4 = vcmp.eq.f32.partialorder %v1744_v1, 8.507059e+37 }
 0x21d   : > { %3864 = vtanh.f32 %v1342_v46  ;;  %v1737_v23 = vsub.f32 1.0, %v1736_v55  ;;  %v1728_v46 = vsel %vm5246_vm0, %v5200_v48, %v1724_v27  ;;  %v5260_v55 = vadd.s32 %v4692_v24, %v1038_v2  ;;  %vm1742_vm0 = vmor %vm1740_vm14, %vm1741_vm7 }
 0x21e   : > { %3866 = vtanh.f32 %v1344_v49  ;;  %v5244_v42 = vpop.f32.mrf.mxu2  ;;  %v1440_v33 = vpop.f32.mrf.mxu3  ;;  %v5257_v49 = vadd.s32 %v4692_v24, %v1037_v18  ;;  %v1733_v48 = vsel %vm1730_vm13, %v1732_v43, %v1728_v46  ;;  %v1747_v27 = vor.u32 1.1754944e-38, %v1746_v22 }
 0x21f   : > { %v1441_v62 = vadd.f32 %v1440_v33, %v4990_v44  ;;  %v1738_v8 = vmul.f32 %v3859_v35, %v1737_v23  ;;  %v5268_v18 = vadd.f32 %v962_v9, %v4854_v28  ;;  %vm6421_vm7 = vcmp.lt.s32.totalorder %v5260_v55, 1200 }
 0x220   : > { %vm6422_vm2 = vcmp.lt.s32.totalorder %v5257_v49, 1200  ;;  %v1347_v43 = vadd.f32 %v5181_v10, %v5082_v29  ;;  %vm1755_vm14 = vweird.f32 %v5233_v7 }
 0x221   : > { %v3861_v6 = vpop.eup %3860  ;;  %v3428_v52 = vmul.f32 -1.442695, %v1441_v62  ;;  %v1739_v12 = vadd.f32 %v3859_v35, %v1738_v8 }
 0x222   : > { %v5263_v33 = vpop.eup %3862  ;;  %v5265_v11 = vadd.f32 1.0, %v3861_v6 }
 0x223   : > { %v3865_v20 = vpop.eup %3864  ;;  %3868 = vpow2.f32 %v3428_v52  ;;  %v1743_v2 = vsel %vm1742_vm0, %v3859_v35, %v1739_v12  ;;  %v1751_v38 = vmul.f32 %v5263_v33, %v5233_v7  ;;  %v6406_v35 = vmax.f32 %v5268_v18, 0.0 }
 0x224   : > { %v3867_v23 = vpop.eup %3866  ;;  %3870 = vrcp.f32 %v5265_v11  ;;  %v964_v39 = vpop.f32.mrf.mxu1  ;;  %v1748_v51 = vsel %vm1745_vm4, %v1747_v27, %v1743_v2  ;;  %v2144_v1 = vmul.f32 %v3865_v20, %v1733_v48  ;;  %vm3363_vm4 = vmpackc.low %vm6421_vm7, %vm6422_vm2  ;;  %v1349_v2 = vadd.f32 %v5215_v21, %v5082_v29 }
 0x225   : > { %v5276_v6 = vadd.f32 %v964_v39, %v4875_v60  ;;  %v2145_v28 = vmul.f32 %v3867_v23, %v1748_v51  ;;  %v1752_v9 = vsub.f32 1.0, %v1751_v38  ;;  %vm1756_vm13 = vweird.f32 %v5263_v33 }
 0x226   : > { %v5278_v52 = vpop.f32.mrf.mxu2  ;;  %v1442_v12 = vpop.f32.mrf.mxu3  ;;  %v1761_v51 = vand.u32 2147483648, %v5233_v7  ;;  %v1040_v21 = vadd.s32 232, %v4688_v19  ;;  %vm5309_vm0 = vmor %vm1755_vm14, %vm1756_vm13  ;;  %vm1770_vm14 = vweird.f32 %v5265_v11 }
 0x227   : > { %v6407_v22 = vmax.f32 %v5276_v6, 0.0  ;;  %v1443_v62 = vadd.f32 %v1442_v12, %v4990_v44  ;;  %v2174_v46 = vpack.c.bf16 %v2145_v28, %v2144_v1  ;;  %v1753_v60 = vmul.f32 %v5263_v33, %v1752_v9 }
 0x228   : > { %v1039_v1 = vadd.s32 224, %v4688_v19  ;;  %v1759_v28 = vand.u32 2147483647, %v5233_v7 }
 0x229   : > { %v3869_v8 = vpop.eup %3868  ;;  %v3364_v48 = vpack.c.bf16 %v6407_v22, %v6406_v35  ;;  %v3429_v27 = vmul.f32 -1.442695, %v1443_v62  ;;  %2274 = vmatmul.bf16.gmra.mxu0 %v2174_v46  ;;  %v1754_v23 = vadd.f32 %v5263_v33, %v1753_v60  ;;  %v1774_v60 = vand.u32 2147483647, %v5265_v11 }
 0x22a   : > { %v3871_v20 = vpop.eup %3870  ;;  %v5296_v38 = vadd.f32 1.0, %v3869_v8  ;;  %v1776_v8 = vand.u32 2147483648, %v5265_v11  ;;  %vm1760_vm13 = vcmp.eq.f32.partialorder %v1759_v28, 8.507059e+37 }
 0x22b   : > { %3872 = vpow2.f32 %v3429_v27  ;;  %3365 = vmatmul.msk.bf16.gmra.mxu2 %vm3363_vm4, %v3364_v48  ;;  %3413 = vmatmul.msk.bf16.gmra.mxu3 %vm3363_vm4, %v3364_v48  ;;  %v1766_v10 = vmul.f32 %v3871_v20, %v5265_v11  ;;  %vm1771_vm4 = vweird.f32 %v3871_v20  ;;  %v1762_v27 = vor.u32 1.1754944e-38, %v1761_v51 }
 0x22c   : > { %3874 = vrcp.f32 %v5296_v38  ;;  %v967_v39 = vpop.f32.mrf.mxu1  ;;  %vm1775_vm1 = vcmp.eq.f32.partialorder %v1774_v60, 8.507059e+37 }
 0x22d   : > { %3876 = vtanh.f32 %v1347_v43  ;;  %v1767_v9 = vsub.f32 1.0, %v1766_v10  ;;  %v1758_v43 = vsel %vm5309_vm0, %v5263_v33, %v1754_v23  ;;  %v5323_v10 = vadd.s32 %v4692_v24, %v1040_v21  ;;  %vm1772_vm0 = vmor %vm1770_vm14, %vm1771_vm4 }
 0x22e   : > { %3878 = vtanh.f32 %v1349_v2  ;;  %v5307_v12 = vpop.f32.mrf.mxu2  ;;  %v1445_v62 = vpop.f32.mrf.mxu3  ;;  %v5320_v2 = vadd.s32 %v4692_v24, %v1039_v1  ;;  %v1763_v33 = vsel %vm1760_vm13, %v1762_v27, %v1758_v43  ;;  %v1777_v23 = vor.u32 1.1754944e-38, %v1776_v8 }
 0x22f   : > { %v1446_v48 = vadd.f32 %v1445_v62, %v4990_v44  ;;  %v1768_v7 = vmul.f32 %v3871_v20, %v1767_v9  ;;  %v5331_v1 = vadd.f32 %v967_v39, %v4892_v5  ;;  %vm6419_vm4 = vcmp.lt.s32.totalorder %v5323_v10, 1200 }
 0x230   : > { %vm6420_vm6 = vcmp.lt.s32.totalorder %v5320_v2, 1200  ;;  %v1352_v27 = vadd.f32 %v5244_v42, %v5082_v29  ;;  %vm1785_vm14 = vweird.f32 %v5296_v38 }
 0x231   : > { %v3873_v35 = vpop.eup %3872  ;;  %v3430_v22 = vmul.f32 -1.442695, %v1446_v48  ;;  %v1769_v57 = vadd.f32 %v3871_v20, %v1768_v7 }
 0x232   : > { %v5326_v62 = vpop.eup %3874  ;;  %v5328_v56 = vadd.f32 1.0, %v3873_v35 }
 0x233   : > { %v3877_v51 = vpop.eup %3876  ;;  %3880 = vpow2.f32 %v3430_v22  ;;  %v1773_v21 = vsel %vm1772_vm0, %v3871_v20, %v1769_v57  ;;  %v1781_v28 = vmul.f32 %v5326_v62, %v5296_v38  ;;  %v6412_v20 = vmax.f32 %v5331_v1, 0.0 }
 0x234   : > { %v3879_v9 = vpop.eup %3878  ;;  %3882 = vrcp.f32 %v5328_v56  ;;  %v969_v11 = vpop.f32.mrf.mxu1  ;;  %v1778_v46 = vsel %vm1775_vm1, %v1777_v23, %v1773_v21  ;;  %v2146_v60 = vmul.f32 %v3877_v51, %v1763_v33  ;;  %vm3366_vm1 = vmpackc.low %vm6419_vm4, %vm6420_vm6  ;;  %v1354_v21 = vadd.f32 %v5278_v52, %v5082_v29 }
 0x235   : > { %v5339_v35 = vadd.f32 %v969_v11, %v4913_v31  ;;  %v2147_v5 = vmul.f32 %v3879_v9, %v1778_v46  ;;  %v1782_v39 = vsub.f32 1.0, %v1781_v28  ;;  %vm1786_vm13 = vweird.f32 %v5326_v62 }
 0x236   : > { %v5341_v22 = vpop.f32.mrf.mxu2  ;;  %v1447_v57 = vpop.f32.mrf.mxu3  ;;  %v1791_v46 = vand.u32 2147483648, %v5296_v38  ;;  %v1041_v52 = vadd.s32 240, %v4688_v19  ;;  %vm5372_vm0 = vmor %vm1785_vm14, %vm1786_vm13  ;;  %vm1800_vm14 = vweird.f32 %v5328_v56 }
 0x237   : > { %v6413_v8 = vmax.f32 %v5339_v35, 0.0  ;;  %v1448_v48 = vadd.f32 %v1447_v57, %v4990_v44  ;;  %v2175_v43 = vpack.c.bf16 %v2147_v5, %v2146_v60  ;;  %v1783_v31 = vmul.f32 %v5326_v62, %v1782_v39 }
 0x238   : > { %v1042_v60 = vadd.s32 248, %v4688_v19  ;;  %v1789_v5 = vand.u32 2147483647, %v5296_v38 }
 0x239   : > { %v3881_v7 = vpop.eup %3880  ;;  %v3367_v33 = vpack.c.bf16 %v6413_v8, %v6412_v20  ;;  %v3431_v23 = vmul.f32 -1.442695, %v1448_v48  ;;  %2279 = vmatmul.bf16.gmra.mxu0 %v2175_v43  ;;  %v1784_v9 = vadd.f32 %v5326_v62, %v1783_v31  ;;  %v1804_v31 = vand.u32 2147483647, %v5328_v56 }
 0x23a   : > { %v3883_v51 = vpop.eup %3882  ;;  %v5359_v28 = vadd.f32 1.0, %v3881_v7  ;;  %v1806_v7 = vand.u32 2147483648, %v5328_v56  ;;  %vm1790_vm13 = vcmp.eq.f32.partialorder %v1789_v5, 8.507059e+37 }
 0x23b   : > { %3884 = vpow2.f32 %v3431_v23  ;;  %3368 = vmatmul.msk.bf16.gmra.mxu2 %vm3366_vm1, %v3367_v33  ;;  %3416 = vmatmul.msk.bf16.gmra.mxu3 %vm3366_vm1, %v3367_v33  ;;  %v1796_v42 = vmul.f32 %v3883_v51, %v5328_v56  ;;  %vm1801_vm1 = vweird.f32 %v3883_v51  ;;  %v1792_v33 = vor.u32 1.1754944e-38, %v1791_v46 }
 0x23c   : > { %3886 = vrcp.f32 %v5359_v28  ;;  %v972_v11 = vpop.f32.mrf.mxu1  ;;  %v5383_v23 = vadd.s32 %v4692_v24, %v1042_v60  ;;  %vm1805_vm15 = vcmp.eq.f32.partialorder %v1804_v31, 8.507059e+37 }
 0x23d   : > { %3888 = vtanh.f32 %v1352_v27  ;;  %v1797_v39 = vsub.f32 1.0, %v1796_v42  ;;  %v1788_v27 = vsel %vm5372_vm0, %v5326_v62, %v1784_v9  ;;  %vm1802_vm0 = vmor %vm1800_vm14, %vm1801_vm1  ;;  %v1807_v9 = vor.u32 1.1754944e-38, %v1806_v7 }
 0x23e   : > { %3890 = vtanh.f32 %v1354_v21  ;;  %v5370_v57 = vpop.f32.mrf.mxu2  ;;  %v1450_v48 = vpop.f32.mrf.mxu3  ;;  %v5386_v21 = vadd.s32 %v4692_v24, %v1041_v52  ;;  %v1793_v62 = vsel %vm1790_vm13, %v1792_v33, %v1788_v27  ;;  %v973_v60 = vadd.f32 %v972_v11, %v4927_v37 }
 0x23f   : > { %v1451_v19 = vadd.f32 %v1450_v48, %v4990_v44  ;;  %v1798_v38 = vmul.f32 %v3883_v51, %v1797_v39  ;;  %vm6417_vm12 = vcmp.lt.s32.totalorder %v5383_v23, 1200  ;;  %vm1815_vm14 = vweird.f32 %v5359_v28 }
 0x240   : > { %vm6418_vm13 = vcmp.lt.s32.totalorder %v5386_v21, 1200 }
 0x241   : > { %v3885_v42 = vpop.eup %3884  ;;  %v3432_v20 = vmul.f32 -1.442695, %v1451_v19  ;;  %v1799_v8 = vadd.f32 %v3883_v51, %v1798_v38 }
 0x242   : > { %v5389_v48 = vpop.eup %3886  ;;  %v5391_v41 = vadd.f32 1.0, %v3885_v42 }
 0x243   : > { %v3889_v46 = vpop.eup %3888  ;;  %3892 = vpow2.f32 %v3432_v20  ;;  %v1803_v24 = vsel %vm1802_vm0, %v3883_v51, %v1799_v8  ;;  %v1811_v52 = vmul.f32 %v5389_v48, %v5359_v28  ;;  %v1007_v8 = vmax.f32 %v973_v60, 0.0 }
 0x244   : > { %v3891_v5 = vpop.eup %3890  ;;  %3894 = vrcp.f32 %v5391_v41  ;;  %v974_v56 = vpop.f32.mrf.mxu1  ;;  %v1808_v39 = vsel %vm1805_vm15, %v1807_v9, %v1803_v24  ;;  %v2148_v31 = vmul.f32 %v3889_v46, %v1793_v62  ;;  %vm3369_vm15 = vmpackc.low %vm6417_vm12, %vm6418_vm13  ;;  %v1359_v46 = vadd.f32 %v5341_v22, %v5082_v29 }
 0x245   : > { %v975_v43 = vadd.f32 %v974_v56, %v4963_v16  ;;  %v2149_v7 = vmul.f32 %v3891_v5, %v1808_v39  ;;  %v1812_v19 = vsub.f32 1.0, %v1811_v52  ;;  %v1357_v16 = vadd.f32 %v5307_v12, %v5082_v29 }
 0x246   : > { %v5400_v37 = vpop.f32.mrf.mxu2  ;;  %v1452_v20 = vpop.f32.mrf.mxu3  ;;  %vm1816_vm1 = vweird.f32 %v5389_v48  ;;  %v1821_v52 = vand.u32 2147483648, %v5359_v28  ;;  %v1819_v22 = vand.u32 2147483647, %v5359_v28  ;;  %v6490_v56 = vmax.f32 %v5339_v35, 0.0 }
 0x247   : > { %v1008_v51 = vmax.f32 %v975_v43, 0.0  ;;  %v1453_v11 = vadd.f32 %v1452_v20, %v4990_v44  ;;  %v2176_v27 = vpack.c.bf16 %v2149_v7, %v2148_v31  ;;  %v1813_v38 = vmul.f32 %v5389_v48, %v1812_v19  ;;  %vm5431_vm0 = vmor %vm1815_vm14, %vm1816_vm1 }
 0x248   : > { %v1834_v7 = vand.u32 2147483647, %v5391_v41  ;;  %v1836_v19 = vand.u32 2147483648, %v5391_v41  ;;  %vm1820_vm1 = vcmp.eq.f32.partialorder %v1819_v22, 8.507059e+37  ;;  %vm1830_vm14 = vweird.f32 %v5391_v41 }
 0x249   : > { %v3893_v33 = vpop.eup %3892  ;;  %v3370_v42 = vpack.c.bf16 %v1008_v51, %v1007_v8  ;;  %v3433_v62 = vmul.f32 -1.442695, %v1453_v11  ;;  %2284 = vmatmul.bf16.gmra.mxu0 %v2176_v27  ;;  %3534 = vmatpush.msk.msra.mxu2 %vm6417_vm12, %v1008_v51  ;;  %v1814_v24 = vadd.f32 %v5389_v48, %v1813_v38  ;;  %v1822_v51 = vor.u32 1.1754944e-38, %v1821_v52 }
 0x24a   : > { %v3895_v9 = vpop.eup %3894  ;;  %v5414_v60 = vadd.f32 1.0, %v3893_v33  ;;  %vm1835_vm12 = vcmp.eq.f32.partialorder %v1834_v7, 8.507059e+37 }
 0x24b   : > { %3896 = vpow2.f32 %v3433_v62  ;;  %3371 = vmatmul.msk.bf16.gmra.mxu2 %vm3369_vm15, %v3370_v42  ;;  %3419 = vmatmul.msk.bf16.gmra.mxu3 %vm3369_vm15, %v3370_v42  ;;  %v1826_v12 = vmul.f32 %v3895_v9, %v5391_v41  ;;  %v1818_v35 = vsel %vm5431_vm0, %v5389_v48, %v1814_v24  ;;  %vm1831_vm15 = vweird.f32 %v3895_v9 }
 0x24c   : > { %3898 = vrcp.f32 %v5414_v60  ;;  %3535 = vmatpush.msk.msra.mxu2 %vm6418_vm13, %v1007_v8  ;;  %v6493_v8 = vmax.f32 %v5331_v1, 0.0  ;;  %v6494_v48 = vmax.f32 %v5276_v6, 0.0  ;;  %v1823_v1 = vsel %vm1820_vm1, %v1822_v51, %v1818_v35  ;;  %vm1832_vm0 = vmor %vm1830_vm14, %vm1831_vm15 }
 0x24d   : > { %3900 = vtanh.f32 %v1357_v16  ;;  %v1827_v5 = vsub.f32 1.0, %v1826_v12  ;;  %v1837_v42 = vor.u32 1.1754944e-38, %v1836_v19  ;;  %v6495_v12 = vmax.f32 %v5268_v18, 0.0 }
 0x24e   : > { %3902 = vtanh.f32 %v1359_v46  ;;  %3536 = vmatpush.msk.msra.mxu2 %vm6419_vm4, %v6490_v56  ;;  %v5429_v39 = vpop.f32.mrf.mxu2  ;;  %v1455_v43 = vpop.f32.mrf.mxu3  ;;  %v6496_v56 = vmax.f32 %v5213_v32, 0.0  ;;  %v6497_v19 = vmax.f32 %v5205_v4, 0.0  ;;  %v1362_v32 = vadd.f32 %v5370_v57, %v5082_v29 }
 0x24f   : > { %v1456_v28 = vadd.f32 %v1455_v43, %v4990_v44  ;;  %v1828_v20 = vmul.f32 %v3895_v9, %v1827_v5  ;;  %vm1845_vm15 = vweird.f32 %v5414_v60  ;;  %vm6507_vm4 = vcmp.lt.s32.totalorder %v5016_v61, 1200 }
 0x250   : > { %3537 = vmatpush.msk.msra.mxu2 %vm6420_vm6, %v6493_v8  ;;  %v1364_v8 = vadd.f32 %v5400_v37, %v5082_v29  ;;  %v1851_v37 = vand.u32 2147483648, %v5414_v60 }
 0x251   : > { %v3897_v11 = vpop.eup %3896  ;;  %v3434_v27 = vmul.f32 -1.442695, %v1456_v28  ;;  %v1829_v38 = vadd.f32 %v3895_v9, %v1828_v20 }
 0x252   : > { %v5446_v33 = vpop.eup %3898  ;;  %v5448_v16 = vadd.f32 1.0, %v3897_v11  ;;  %3538 = vmatpush.msk.msra.mxu2 %vm6421_vm7, %v6494_v48  ;;  %v6498_v11 = vmax.f32 %v5150_v3, 0.0  ;;  %v1849_v3 = vand.u32 2147483647, %v5414_v60  ;;  %v6500_v48 = vmax.f32 %v5086_v34, 0.0 }
 0x253   : > { %v3901_v62 = vpop.eup %3900  ;;  %3904 = vpow2.f32 %v3434_v27  ;;  %v1833_v46 = vsel %vm1832_vm0, %v3895_v9, %v1829_v38  ;;  %v1841_v24 = vmul.f32 %v5446_v33, %v5414_v60  ;;  %v6499_v27 = vmax.f32 %v5142_v47, 0.0 }
 0x254   : > { %v3903_v41 = vpop.eup %3902  ;;  %3906 = vrcp.f32 %v5448_v16  ;;  %3539 = vmatpush.msk.msra.mxu2 %vm6422_vm2, %v6495_v12  ;;  %v1838_v6 = vsel %vm1835_vm12, %v1837_v42, %v1833_v46  ;;  %v2150_v52 = vmul.f32 %v3901_v62, %v1823_v1  ;;  %vm1846_vm12 = vweird.f32 %v5446_v33 }
 0x255   : > { %v2151_v22 = vmul.f32 %v3903_v41, %v1838_v6  ;;  %v1842_v5 = vsub.f32 1.0, %v1841_v24  ;;  %vm5500_vm1 = vmor %vm1845_vm15, %vm1846_vm12  ;;  %v1864_v62 = vand.u32 2147483647, %v5448_v16  ;;  %v1866_v46 = vand.u32 2147483648, %v5448_v16 }
 0x256   : > { %3540 = vmatpush.msk.msra.mxu2 %vm6423_vm10, %v6496_v56  ;;  %v5465_v9 = vpop.f32.mrf.mxu2  ;;  %v1457_v43 = vpop.f32.mrf.mxu3  ;;  %v6503_v41 = vmax.f32 %v5080_v59, 0.0  ;;  %v1852_v12 = vor.u32 1.1754944e-38, %v1851_v37  ;;  %vm1850_vm0 = vcmp.eq.f32.partialorder %v1849_v3, 8.507059e+37  ;;  %vm1860_vm12 = vweird.f32 %v5448_v16 }
 0x257   : > { %v1458_v31 = vadd.f32 %v1457_v43, %v4990_v44  ;;  %v2177_v7 = vpack.c.bf16 %v2151_v22, %v2150_v52  ;;  %v1843_v18 = vmul.f32 %v5446_v33, %v1842_v5  ;;  %v6504_v43 = vmax.f32 %v5033_v63, 0.0 }
 0x258   : > { %3541 = vmatpush.msk.msra.mxu2 %vm1100_vm5, %v6497_v19  ;;  %vm6505_vm15 = vcmp.lt.s32.totalorder %v5019_v0, 1200  ;;  %v1867_v59 = vor.u32 1.1754944e-38, %v1866_v46  ;;  %vm1865_vm13 = vcmp.eq.f32.partialorder %v1864_v62, 8.507059e+37  ;;  %v1367_v3 = vadd.f32 %v5429_v39, %v5082_v29 }
 0x259   : > { %v3905_v28 = vpop.eup %3904  ;;  %v3435_v35 = vmul.f32 -1.442695, %v1458_v31  ;;  %2289 = vmatmul.bf16.gmra.mxu0 %v2177_v7  ;;  %v1844_v4 = vadd.f32 %v5446_v33, %v1843_v18 }
 0x25a   : > { %v3907_v20 = vpop.eup %3906  ;;  %v5477_v51 = vadd.f32 1.0, %v3905_v28  ;;  %3542 = vmatpush.msk.msra.mxu2 %vm1099_vm11, %v6498_v11 }
 0x25b   : > { %3908 = vpow2.f32 %v3435_v35  ;;  %v1856_v57 = vmul.f32 %v3907_v20, %v5448_v16  ;;  %v1848_v34 = vsel %vm5500_vm1, %v5446_v33, %v1844_v4  ;;  %vm1861_vm14 = vweird.f32 %v3907_v20 }
 0x25c   : > { %3910 = vrcp.f32 %v5477_v51  ;;  %3543 = vmatpush.msk.msra.mxu2 %vm1098_vm8, %v6499_v27  ;;  %v1853_v33 = vsel %vm1850_vm0, %v1852_v12, %v1848_v34  ;;  %vm1862_vm1 = vmor %vm1860_vm12, %vm1861_vm14  ;;  %v6506_v16 = vmax.f32 %v5026_v54, 0.0  ;;  %vm6509_vm14 = vcmp.lt.s32.totalorder %v4941_v13, 1200 }
 0x25d   : > { %3912 = vtanh.f32 %v1362_v32  ;;  %v1857_v38 = vsub.f32 1.0, %v1856_v57  ;;  %v6510_v54 = vmax.f32 %v4948_v14, 0.0  ;;  %v1881_v14 = vand.u32 2147483648, %v5477_v51 }
 0x25e   : > { %3914 = vtanh.f32 %v1364_v8  ;;  %3544 = vmatpush.msk.msra.mxu2 %vm1097_vm9, %v6500_v48  ;;  %v5498_v1 = vpop.f32.mrf.mxu2  ;;  %v1460_v47 = vpop.f32.mrf.mxu3  ;;  %v6508_v8 = vmax.f32 %v4956_v53, 0.0  ;;  %v1369_v48 = vadd.f32 %v5465_v9, %v5082_v29  ;;  %vm1875_vm0 = vweird.f32 %v5477_v51 }
 0x25f   : > { %v1461_v60 = vadd.f32 %v1460_v47, %v4990_v44  ;;  %v1858_v24 = vmul.f32 %v3907_v20, %v1857_v38  ;;  %v1879_v39 = vand.u32 2147483647, %v5477_v51 }
 0x260   : > { %3545 = vmatpush.msk.msra.mxu2 %vm1096_vm3, %v6503_v41 }
 0x261   : > { %v3909_v6 = vpop.eup %3908  ;;  %v3436_v52 = vmul.f32 -1.442695, %v1461_v60  ;;  %v1859_v22 = vadd.f32 %v3907_v20, %v1858_v24 }
 0x262   : > { %v3911_v5 = vpop.eup %3910  ;;  %v5515_v56 = vadd.f32 1.0, %v3909_v6  ;;  %3546 = vmatpush.msk.msra.mxu2 %vm6505_vm15, %v6504_v43 }
 0x263   : > { %v3913_v31 = vpop.eup %3912  ;;  %v1871_v7 = vmul.f32 %v3911_v5, %v5477_v51  ;;  %3916 = vpow2.f32 %v3436_v52  ;;  %v1863_v18 = vsel %vm1862_vm1, %v3907_v20, %v1859_v22  ;;  %v1882_v51 = vor.u32 1.1754944e-38, %v1881_v14 }
 0x264   : > { %v3915_v19 = vpop.eup %3914  ;;  %3918 = vrcp.f32 %v5515_v56  ;;  %3547 = vmatpush.msk.msra.mxu2 %vm6507_vm4, %v6506_v16  ;;  %v1868_v63 = vsel %vm1865_vm13, %v1867_v59, %v1863_v18  ;;  %v2152_v32 = vmul.f32 %v3913_v31, %v1853_v33  ;;  %vm6511_vm4 = vcmp.lt.s32.totalorder %v4938_v36, 1200 }
 0x265   : > { %v1872_v28 = vsub.f32 1.0, %v1871_v7  ;;  %v2153_v35 = vmul.f32 %v3915_v19, %v1868_v63  ;;  %vm1876_vm13 = vweird.f32 %v3911_v5  ;;  %v1894_v24 = vand.u32 2147483647, %v5515_v56 }
 0x266   : > { %3548 = vmatpush.msk.msra.mxu2 %vm6509_vm14, %v6508_v8  ;;  %v5531_v11 = vpop.f32.mrf.mxu2  ;;  %v1462_v20 = vpop.f32.mrf.mxu3  ;;  %vm5551_vm12 = vmor %vm1875_vm0, %vm1876_vm13  ;;  %v1896_v41 = vand.u32 2147483648, %v5515_v56  ;;  %vm1880_vm1 = vcmp.eq.f32.partialorder %v1879_v39, 8.507059e+37  ;;  %vm1890_vm14 = vweird.f32 %v5515_v56 }
 0x267   : > { %v1463_v4 = vadd.f32 %v1462_v20, %v4990_v44  ;;  %v2178_v57 = vpack.c.bf16 %v2153_v35, %v2152_v32  ;;  %v1873_v27 = vmul.f32 %v3911_v5, %v1872_v28  ;;  %vm1895_vm13 = vcmp.eq.f32.partialorder %v1894_v24, 8.507059e+37 }
 0x268   : > { %3549 = vmatpush.msk.msra.mxu2 %vm6511_vm4, %v6510_v54  ;;  %v1897_v18 = vor.u32 1.1754944e-38, %v1896_v41 }
 0x269   : > { %v3917_v37 = vpop.eup %3916  ;;  %v3437_v53 = vmul.f32 -1.442695, %v1463_v4  ;;  %2294 = vmatmul.bf16.gmra.mxu0 %v2178_v57  ;;  %v1874_v62 = vadd.f32 %v3911_v5, %v1873_v27 }
 0x26a   : > { %v3919_v38 = vpop.eup %3918  ;;  %v5542_v47 = vadd.f32 1.0, %v3917_v37  ;;  %v1372_v37 = vadd.f32 %v5498_v1, %v5082_v29 }
 0x26b   : > { %v1886_v42 = vmul.f32 %v3919_v38, %v5515_v56  ;;  %3920 = vpow2.f32 %v3437_v53  ;;  %v1878_v6 = vsel %vm5551_vm12, %v3911_v5, %v1874_v62  ;;  %vm1891_vm15 = vweird.f32 %v3919_v38 }
 0x26c   : > { %3922 = vrcp.f32 %v5542_v47  ;;  %v1883_v7 = vsel %vm1880_vm1, %v1882_v51, %v1878_v6  ;;  %vm1892_vm4 = vmor %vm1890_vm14, %vm1891_vm15  ;;  %v1911_v14 = vand.u32 2147483648, %v5542_v47  ;;  %vm1905_vm12 = vweird.f32 %v5542_v47 }
 0x26d   : > { %3924 = vtanh.f32 %v1367_v3  ;;  %v1887_v46 = vsub.f32 1.0, %v1886_v42  ;;  %v1909_v1 = vand.u32 2147483647, %v5542_v47 }
 0x26e   : > { %3926 = vtanh.f32 %v1369_v48  ;;  %v5549_v60 = vpop.f32.mrf.mxu2  ;;  %v1465_v9 = vpop.f32.mrf.mxu3 }
 0x26f   : > { %v1466_v12 = vadd.f32 %v1465_v9, %v4990_v44  ;;  %v1888_v52 = vmul.f32 %v3919_v38, %v1887_v46  ;;  %vm1910_vm14 = vcmp.eq.f32.partialorder %v1909_v1, 8.507059e+37 }
 0x271   : > { %v3921_v22 = vpop.eup %3920  ;;  %v3438_v43 = vmul.f32 -1.442695, %v1466_v12  ;;  %v1889_v33 = vadd.f32 %v3919_v38, %v1888_v52 }
 0x272   : > { %v3923_v59 = vpop.eup %3922  ;;  %v5561_v31 = vadd.f32 1.0, %v3921_v22 }
 0x273   : > { %v3925_v19 = vpop.eup %3924  ;;  %v1901_v16 = vmul.f32 %v3923_v59, %v5542_v47  ;;  %3928 = vpow2.f32 %v3438_v43  ;;  %v1893_v5 = vsel %vm1892_vm4, %v3919_v38, %v1889_v33  ;;  %v1374_v38 = vadd.f32 %v5531_v11, %v5082_v29 }
 0x274   : > { %v3927_v63 = vpop.eup %3926  ;;  %3930 = vrcp.f32 %v5561_v31  ;;  %v1898_v28 = vsel %vm1895_vm13, %v1897_v18, %v1893_v5  ;;  %v2154_v35 = vmul.f32 %v3925_v19, %v1883_v7  ;;  %vm1906_vm0 = vweird.f32 %v3923_v59 }
 0x275   : > { %v1902_v32 = vsub.f32 1.0, %v1901_v16  ;;  %v2155_v8 = vmul.f32 %v3927_v63, %v1898_v28  ;;  %vm5581_vm15 = vmor %vm1905_vm12, %vm1906_vm0  ;;  %v1924_v34 = vand.u32 2147483647, %v5561_v31  ;;  %v1926_v24 = vand.u32 2147483648, %v5561_v31 }
 0x276   : > { %v5565_v56 = vpop.f32.mrf.mxu2  ;;  %v1467_v20 = vpop.f32.mrf.mxu3  ;;  %v1912_v47 = vor.u32 1.1754944e-38, %v1911_v14  ;;  %vm1920_vm4 = vweird.f32 %v5561_v31 }
 0x277   : > { %v1468_v4 = vadd.f32 %v1467_v20, %v4990_v44  ;;  %v2179_v57 = vpack.c.bf16 %v2155_v8, %v2154_v35  ;;  %v1903_v27 = vmul.f32 %v3923_v59, %v1902_v32  ;;  %v1927_v18 = vor.u32 1.1754944e-38, %v1926_v24 }
 0x278   : > { %vm1925_vm0 = vcmp.eq.f32.partialorder %v1924_v34, 8.507059e+37 }
 0x279   : > { %v3929_v54 = vpop.eup %3928  ;;  %v3439_v3 = vmul.f32 -1.442695, %v1468_v4  ;;  %2299 = vmatmul.bf16.gmra.mxu0 %v2179_v57  ;;  %v1904_v62 = vadd.f32 %v3923_v59, %v1903_v27 }
 0x27a   : > { %v3931_v53 = vpop.eup %3930  ;;  %v5572_v48 = vadd.f32 1.0, %v3929_v54 }
 0x27b   : > { %v1916_v42 = vmul.f32 %v3931_v53, %v5561_v31  ;;  %3932 = vpow2.f32 %v3439_v3  ;;  %v1908_v12 = vsel %vm5581_vm15, %v3923_v59, %v1904_v62  ;;  %vm1921_vm1 = vweird.f32 %v3931_v53  ;;  %v5601_v31 = vld [vmem:[%s6516_s18] ss:$0 sm:$0xff]  ;;  %s2809_s18 = scalar_lea.sflag [#allocation4], %s6625_s11 }
 0x27c   : > { %3934 = vrcp.f32 %v5572_v48  ;;  %v1913_v7 = vsel %vm1910_vm14, %v1912_v47, %v1908_v12  ;;  %vm1922_vm13 = vmor %vm1920_vm4, %vm1921_vm1  ;;  %v1379_v62 = vadd.f32 %v5565_v56, %v5082_v29  ;;  %vm1935_vm15 = vweird.f32 %v5572_v48 }
 0x27d   : > { %3936 = vtanh.f32 %v1372_v37  ;;  %v1917_v46 = vsub.f32 1.0, %v1916_v42  ;;  %v1939_v56 = vand.u32 2147483647, %v5572_v48 }
 0x27e   : > { %3938 = vtanh.f32 %v1374_v38  ;;  %v5579_v39 = vpop.f32.mrf.mxu2  ;;  %v1470_v11 = vpop.f32.mrf.mxu3 }
 0x27f   : > { %v1471_v41 = vadd.f32 %v1470_v11, %v4990_v44  ;;  %v1918_v6 = vmul.f32 %v3931_v53, %v1917_v46  ;;  %vm1940_vm4 = vcmp.eq.f32.partialorder %v1939_v56, 8.507059e+37 }
 0x281   : > { %v3933_v52 = vpop.eup %3932  ;;  %v3440_v51 = vmul.f32 -1.442695, %v1471_v41  ;;  %v1919_v22 = vadd.f32 %v3931_v53, %v1918_v6 }
 0x282   : > { %v5591_v43 = vpop.eup %3934  ;;  %v5593_v33 = vadd.f32 1.0, %v3933_v52 }
 0x283   : > { %v3937_v19 = vpop.eup %3936  ;;  %v1931_v59 = vmul.f32 %v5591_v43, %v5572_v48  ;;  %3940 = vpow2.f32 %v3440_v51  ;;  %v1923_v16 = vsel %vm1922_vm13, %v3931_v53, %v1919_v22  ;;  %v1377_v53 = vadd.f32 %v5549_v60, %v5082_v29 }
 0x284   : > { %v3939_v5 = vpop.eup %3938  ;;  %3942 = vrcp.f32 %v5593_v33  ;;  %v1928_v63 = vsel %vm1925_vm0, %v1927_v18, %v1923_v16  ;;  %v2156_v32 = vmul.f32 %v3937_v19, %v1913_v7  ;;  %vm1936_vm12 = vweird.f32 %v5591_v43 }
 0x285   : > { %v1932_v28 = vsub.f32 1.0, %v1931_v59  ;;  %v2157_v35 = vmul.f32 %v3939_v5, %v1928_v63  ;;  %v1941_v60 = vand.u32 2147483648, %v5572_v48  ;;  %vm5621_vm1 = vmor %vm1935_vm15, %vm1936_vm12  ;;  %v1954_v41 = vand.u32 2147483647, %v5593_v33 }
 0x286   : > { %v5603_v8 = vpop.f32.mrf.mxu2  ;;  %v1472_v20 = vpop.f32.mrf.mxu3  ;;  %v1956_v12 = vand.u32 2147483648, %v5593_v33  ;;  %vm1950_vm13 = vweird.f32 %v5593_v33 }
 0x287   : > { %v1473_v4 = vadd.f32 %v1472_v20, %v4990_v44  ;;  %v2265_v57 = vpop.f32.mrf.mxu0  ;;  %v2180_v27 = vpack.c.bf16 %v2157_v35, %v2156_v32  ;;  %v1933_v54 = vmul.f32 %v5591_v43, %v1932_v28  ;;  %v1942_v22 = vor.u32 1.1754944e-38, %v1941_v60 }
 0x288   : > { %v2266_v37 = vadd.f32 %v5601_v31, %v2265_v57  ;;  %v1957_v63 = vor.u32 1.1754944e-38, %v1956_v12  ;;  %vm1955_vm12 = vcmp.eq.f32.partialorder %v1954_v41, 8.507059e+37 }
 0x289   : > { %v3941_v3 = vpop.eup %3940  ;;  %v3441_v38 = vmul.f32 -1.442695, %v1473_v4  ;;  %2304 = vmatmul.bf16.gmra.mxu0 %v2180_v27  ;;  %v1934_v1 = vadd.f32 %v5591_v43, %v1933_v54 }
 0x28a   : > { %v3943_v42 = vpop.eup %3942  ;;  %v5612_v14 = vadd.f32 1.0, %v3941_v3  ;;  %2345 = vxpose.xlu1.b32.start [1/16] (narrow) %v2266_v37, 8 }
 0x28b   : > { %v1946_v46 = vmul.f32 %v3943_v42, %v5593_v33  ;;  %3944 = vpow2.f32 %v3441_v38  ;;  %v1938_v52 = vsel %vm5621_vm1, %v5591_v43, %v1934_v1  ;;  %vm1951_vm14 = vweird.f32 %v3943_v42 }
 0x28c   : > { %3946 = vrcp.f32 %v5612_v14  ;;  %v1943_v5 = vsel %vm1940_vm4, %v1942_v22, %v1938_v52  ;;  %vm1952_vm0 = vmor %vm1950_vm13, %vm1951_vm14  ;;  %v1384_v1 = vadd.f32 %v5603_v8, %v5082_v29  ;;  %v1971_v24 = vand.u32 2147483648, %v5612_v14 }
 0x28d   : > { %3948 = vtanh.f32 %v1377_v53  ;;  %v1947_v11 = vsub.f32 1.0, %v1946_v46  ;;  %vm1965_vm14 = vweird.f32 %v5612_v14 }
 0x28e   : > { %3950 = vtanh.f32 %v1379_v62  ;;  %v1386_v9 = vpop.f32.mrf.mxu2  ;;  %v1475_v34 = vpop.f32.mrf.mxu3 }
 0x28f   : > { %v1476_v6 = vadd.f32 %v1475_v34, %v4990_v44  ;;  %v2267_v47 = vpop.f32.mrf.mxu0  ;;  %v1948_v51 = vmul.f32 %v3943_v42, %v1947_v11  ;;  %v1969_v34 = vand.u32 2147483647, %v5612_v14  ;;  %v1387_v8 = vadd.f32 %v1386_v9, %v5082_v29 }
 0x290   : > { %v2268_v48 = vadd.f32 %v5601_v31, %v2267_v47 }
 0x291   : > { %v3945_v7 = vpop.eup %3944  ;;  %v3442_v18 = vmul.f32 -1.442695, %v1476_v6  ;;  %v1949_v19 = vadd.f32 %v3943_v42, %v1948_v51 }
 0x292   : > { %v5633_v59 = vpop.eup %3946  ;;  %v5635_v16 = vadd.f32 1.0, %v3945_v7  ;;  %2346 = vxpose.xlu1.b32.cont [2/16] (narrow) %v2268_v48, 8 }
 0x293   : > { %v3949_v43 = vpop.eup %3948  ;;  %v1961_v28 = vmul.f32 %v5633_v59, %v5612_v14  ;;  %3952 = vpow2.f32 %v3442_v18  ;;  %v1953_v32 = vsel %vm1952_vm0, %v3943_v42, %v1949_v19  ;;  %v1382_v42 = vadd.f32 %v5579_v39, %v5082_v29 }
 0x294   : > { %v3951_v35 = vpop.eup %3950  ;;  %3954 = vrcp.f32 %v5635_v16  ;;  %v1958_v20 = vsel %vm1955_vm12, %v1957_v63, %v1953_v32  ;;  %v2158_v4 = vmul.f32 %v3949_v43, %v1943_v5  ;;  %vm1966_vm15 = vweird.f32 %v5633_v59 }
 0x295   : > { %v1962_v33 = vsub.f32 1.0, %v1961_v28  ;;  %v2159_v57 = vmul.f32 %v3951_v35, %v1958_v20  ;;  %v1984_v12 = vand.u32 2147483647, %v5635_v16  ;;  %vm5658_vm4 = vmor %vm1965_vm14, %vm1966_vm15  ;;  %vm1980_vm13 = vweird.f32 %v5635_v16 }
 0x296   : > { %v1388_v27 = vpop.f32.mrf.mxu2  ;;  %v1477_v54 = vpop.f32.mrf.mxu3  ;;  %vm5665_vm0 = vcmp.eq.f32.partialorder %v1969_v34, 8.507059e+37  ;;  %v1986_v48 = vand.u32 2147483648, %v5635_v16  ;;  %v1972_v19 = vor.u32 1.1754944e-38, %v1971_v24  ;;  %vm6526_vm15 = vcmp.lt.s32.totalorder %v4696_v25, 1200 }
 0x297   : > { %v1478_v37 = vadd.f32 %v1477_v54, %v4990_v44  ;;  %v2270_v3 = vpop.f32.mrf.mxu0  ;;  %v2181_v53 = vpack.c.bf16 %v2159_v57, %v2158_v4  ;;  %v1963_v38 = vmul.f32 %v5633_v59, %v1962_v33  ;;  %vm2416_vm14 = vmpackc.low %vm6526_vm15, %vm6526_vm15  ;;  %v4319_v25 = vmov 0  }
 0x298   : > { %v2271_v62 = vadd.f32 %v5601_v31, %v2270_v3  ;;  %v2448_v35 = vsel %vm2416_vm14, 65537, %v4319_v25  ;;  %v1987_v4 = vor.u32 1.1754944e-38, %v1986_v48 }
 0x299   : > { %v3953_v46 = vpop.eup %3952  ;;  %v3443_v60 = vmul.f32 -1.442695, %v1478_v37  ;;  %2309 = vmatmul.bf16.gmra.mxu0 %v2181_v53  ;;  %v1964_v39 = vadd.f32 %v5633_v59, %v1963_v38  ;;  %v2480_v53 = vunpack.c.l.b16 %v2448_v35 }
 0x29a   : > { %v3955_v11 = vpop.eup %3954  ;;  %v5647_v56 = vadd.f32 1.0, %v3953_v46  ;;  %2347 = vxpose.xlu1.b32.cont [3/16] (narrow) %v2271_v62, 8 }
 0x29b   : > { %v1976_v41 = vmul.f32 %v3955_v11, %v5635_v16  ;;  %3956 = vpow2.f32 %v3443_v60  ;;  %vm1981_vm1 = vweird.f32 %v3955_v11  ;;  %v1968_v18 = vsel %vm5658_vm4, %v5633_v59, %v1964_v39 }
 0x29c   : > { %3958 = vrcp.f32 %v5647_v56  ;;  %vm5669_vm12 = vmor %vm1980_vm13, %vm1981_vm1  ;;  %vm5682_vm1 = vcmp.eq.f32.partialorder %v1984_v12, 8.507059e+37  ;;  %vm6529_vm13 = vcmp.lt.s32.totalorder %v4699_v26, 1200  ;;  %v1389_v59 = vadd.f32 %v1388_v27, %v5082_v29 }
 0x29d   : > { %3960 = vtanh.f32 %v1382_v42  ;;  %v1977_v6 = vsub.f32 1.0, %v1976_v41  ;;  %vm2417_vm6 = vmpackc.low %vm6529_vm13, %vm6529_vm13  ;;  %vm6530_vm4 = vcmp.lt.s32.totalorder %v4938_v36, 1200  ;;  %v1973_v26 = vsel %vm5665_vm0, %v1972_v19, %v1968_v18 }
 0x29e   : > { %3962 = vtanh.f32 %v1384_v1  ;;  %v5663_v52 = vpop.f32.mrf.mxu2  ;;  %v1480_v51 = vpop.f32.mrf.mxu3  ;;  %vm2432_vm15 = vmpackc.low %vm6530_vm4, %vm6530_vm4  ;;  %vm6531_vm13 = vcmp.lt.s32.totalorder %v4941_v13, 1200  ;;  %v2449_v36 = vsel %vm2417_vm6, 65537, %v4319_v25  ;;  %v2001_v9 = vand.u32 2147483648, %v5647_v56 }
 0x29f   : > { %v1481_v22 = vadd.f32 %v1480_v51, %v4990_v44  ;;  %v2272_v7 = vpop.f32.mrf.mxu0  ;;  %v1978_v5 = vmul.f32 %v3955_v11, %v1977_v6  ;;  %3964 = vtanh.f32 %v1387_v8  ;;  %vm2433_vm7 = vmpackc.low %vm6531_vm13, %vm6531_vm13  ;;  %v2464_v37 = vsel %vm2432_vm15, 65537, %v4319_v25 }
 0x2a0   : > { %v2273_v63 = vadd.f32 %v5601_v31, %v2272_v7  ;;  %v2465_v42 = vsel %vm2433_vm7, 65537, %v4319_v25  ;;  %v2481_v34 = vunpack.c.l.b16 %v2449_v36  ;;  %v1999_v6 = vand.u32 2147483647, %v5647_v56 }
 0x2a1   : > { %v3957_v16 = vpop.eup %3956  ;;  %v3444_v28 = vmul.f32 -1.442695, %v1481_v22  ;;  %v1979_v32 = vadd.f32 %v3955_v11, %v1978_v5  ;;  %v2497_v24 = vunpack.c.l.b16 %v2465_v42  ;;  %v3484_v14 = vunpack.i.l.s16 %v2480_v53 }
 0x2a2   : > { %v5694_v20 = vpop.eup %3958  ;;  %v5696_v33 = vadd.f32 1.0, %v3957_v16  ;;  %2348 = vxpose.xlu1.b32.cont [4/16] (narrow) %v2273_v63, 8  ;;  %v3485_v48 = vunpack.i.l.s16 %v2481_v34  ;;  %v5725_v19 = vunpack.c.l.b16 %v4319_v25  ;;  %vm6532_vm7 = vcmp.lt.s32.totalorder %v4722_v40, 1200 }
 0x2a3   : > { %v3961_v57 = vpop.eup %3960  ;;  %v1991_v27 = vmul.f32 %v5694_v20, %v5647_v56  ;;  %3966 = vpow2.f32 %v3444_v28  ;;  %v1983_v54 = vsel %vm5669_vm12, %v3955_v11, %v1979_v32  ;;  %v2496_v11 = vunpack.c.l.b16 %v2464_v37  ;;  %vm5730_vm0 = vmpackc.low %vm6532_vm7, %vm6532_vm7  ;;  %v6535_v32 = vld [vmem:[#allocation25_spill] sm:$0xff] }
 0x2a4   : > { %v3963_v3 = vpop.eup %3962  ;;  %3968 = vrcp.f32 %v5696_v33  ;;  %v1988_v13 = vsel %vm5682_vm1, %v1987_v4, %v1983_v54  ;;  %v2160_v62 = vmul.f32 %v3961_v57, %v1973_v26  ;;  %vm1996_vm6 = vweird.f32 %v5694_v20 }
 0x2a5   : > { %v1992_v38 = vsub.f32 1.0, %v1991_v27  ;;  %v2161_v46 = vmul.f32 %v3963_v3, %v1988_v13  ;;  %v5713_v1 = vpop.eup %3964  ;;  %3970 = vtanh.f32 %v1389_v59  ;;  %v5737_v16 = vunpack.c.h.b16 %v4319_v25 }
 0x2a6   : > { %v1482_v60 = vpop.f32.mrf.mxu3  ;;  %v5718_v47 = vpop.f32.mrf.mxu2  ;;  %v3500_v59 = vunpack.i.l.s16 %v2496_v11  ;;  %v3501_v28 = vunpack.i.l.s16 %v2497_v24  ;;  %vm6536_vm12 = vcmp.lt.s32.totalorder %v6535_v32, 1200  ;;  %vm1995_vm1 = vweird.f32 %v5647_v56 }
 0x2a7   : > { %v1483_v41 = vadd.f32 %v1482_v60, %v4990_v44  ;;  %v2275_v39 = vpop.f32.mrf.mxu0  ;;  %v2182_v8 = vpack.c.bf16 %v2161_v46, %v2160_v62  ;;  %v1993_v12 = vmul.f32 %v5694_v20, %v1992_v38  ;;  %vm5742_vm14 = vmpackc.low %vm6536_vm12, %vm6536_vm12  ;;  %v2014_v36 = vand.u32 2147483647, %v5696_v33 }
 0x2a8   : > { %v2276_v51 = vadd.f32 %v5601_v31, %v2275_v39  ;;  %vm5751_vm4 = vmor %vm1995_vm1, %vm1996_vm6  ;;  %vm2532_vm15 = vcmp.ne.s32.totalorder %v3484_v14, %v5725_v19  ;;  %vm2533_vm13 = vcmp.ne.s32.totalorder %v3485_v48, %v5737_v16  ;;  %v2016_v27 = vand.u32 2147483648, %v5696_v33 }
 0x2a9   : > { %v3967_v22 = vpop.eup %3966  ;;  %v3445_v7 = vmul.f32 -1.442695, %v1483_v41  ;;  %2314 = vmatmul.bf16.gmra.mxu0 %v2182_v8  ;;  %v1994_v18 = vadd.f32 %v5694_v20, %v1993_v12  ;;  %vm2534_vm7 = vmpackc.low %vm2533_vm13, %vm2532_vm15  ;;  %vm2588_vm12 = vcmp.ne.s32.totalorder %v3500_v59, %v5725_v19  ;;  %vm2589_vm2 = vcmp.ne.s32.totalorder %v3501_v28, %v5737_v16 }
 0x2aa   : > { %v3969_v5 = vpop.eup %3968  ;;  %v5734_v43 = vadd.f32 1.0, %v3967_v22  ;;  %2349 = vxpose.xlu1.b32.cont [5/16] (narrow) %v2276_v51, 8  ;;  %vm5764_vm6 = vcmp.eq.f32.partialorder %v1999_v6, 8.507059e+37  ;;  %v2002_v3 = vor.u32 1.1754944e-38, %v2001_v9  ;;  %vm2590_vm1 = vmpackc.low %vm2589_vm2, %vm2588_vm12  ;;  %v2640_v13 = vsel %vm2534_vm7, 65537, %v4319_v25 }
 0x2ab   : > { %v2006_v40 = vmul.f32 %v3969_v5, %v5696_v33  ;;  %3972 = vpow2.f32 %v3445_v7  ;;  %v3971_v26 = vpop.eup %3970  ;;  %v1998_v54 = vsel %vm5751_vm4, %v5694_v20, %v1994_v18  ;;  %vm2011_vm15 = vweird.f32 %v3969_v5 }
 0x2ac   : > { %3974 = vrcp.f32 %v5734_v43  ;;  %v2648_v46 = vsel %vm2590_vm1, 65537, %v4319_v25  ;;  %vm6543_vm13 = vcmp.lt.s32.totalorder %v5016_v61, 1200  ;;  %vm2010_vm2 = vweird.f32 %v5696_v33 }
 0x2ad   : > { %v2007_v57 = vsub.f32 1.0, %v2006_v40  ;;  %vm5774_vm10 = vmpackc.low %vm6543_vm13, %vm6543_vm13  ;;  %vm5780_vm4 = vcmp.eq.f32.partialorder %v2014_v36, 8.507059e+37  ;;  %3812 = vxpose.binary.xlu0.c.b16.start [1/16] (narrow) %v2648_v46, %v2640_v13, 16  ;;  %vm6548_vm7 = vcmp.lt.s32.totalorder %v5019_v0, 1200  ;;  %v2450_v61 = vsel %vm5730_vm0, 65537, %v4319_v25 }
 0x2ae   : > { %v1485_v56 = vpop.f32.mrf.mxu3  ;;  %vm5787_vm12 = vmpackc.low %vm6548_vm7, %vm6548_vm7  ;;  %v2003_v33 = vsel %vm5764_vm6, %v2002_v3, %v1998_v54  ;;  %v2017_v39 = vor.u32 1.1754944e-38, %v2016_v27  ;;  %v5800_v0 = vpop.f32.mrf.mxu2  ;;  %v2451_v6 = vsel %vm5742_vm14, 65537, %v4319_v25  ;;  %v2466_v51 = vsel %vm5774_vm10, 65537, %v4319_v25 }
 0x2af   : > { %v1486_v53 = vadd.f32 %v1485_v56, %v4990_v44  ;;  %v2277_v38 = vpop.f32.mrf.mxu0  ;;  %v2008_v62 = vmul.f32 %v3969_v5, %v2007_v57  ;;  %vm2012_vm1 = vmor %vm2010_vm2, %vm2011_vm15  ;;  %v2482_v9 = vunpack.c.l.b16 %v2450_v61  ;;  %v2467_v22 = vsel %vm5787_vm12, 65537, %v4319_v25 }
 0x2b0   : > { %v2278_v42 = vadd.f32 %v5601_v31, %v2277_v38  ;;  %v2162_v63 = vmul.f32 %v5713_v1, %v2003_v33  ;;  %v2483_v28 = vunpack.c.l.b16 %v2451_v6  ;;  %v2498_v35 = vunpack.c.l.b16 %v2466_v51  ;;  %v6551_v38 = vld [vmem:[#allocation26_spill] sm:$0xff] }
 0x2b1   : > { %v3973_v11 = vpop.eup %3972  ;;  %v3446_v24 = vmul.f32 -1.442695, %v1486_v53  ;;  %v2009_v41 = vadd.f32 %v3969_v5, %v2008_v62  ;;  %v2499_v40 = vunpack.c.l.b16 %v2467_v22  ;;  %v3486_v4 = vunpack.i.l.s16 %v2482_v9 }
 0x2b2   : > { %v5796_v8 = vpop.eup %3974  ;;  %v5798_v12 = vadd.f32 1.0, %v3973_v11  ;;  %2350 = vxpose.xlu1.b32.cont [6/16] (narrow) %v2278_v42, 8  ;;  %v1394_v54 = vadd.f32 %v5718_v47, %v5082_v29  ;;  %v3502_v13 = vunpack.i.l.s16 %v2498_v35  ;;  %vm6552_vm14 = vcmp.lt.s32.totalorder %v6551_v38, 1200 }
 0x2b3   : > { %v2021_v14 = vmul.f32 %v5796_v8, %v5734_v43  ;;  %3976 = vpow2.f32 %v3446_v24  ;;  %v2013_v48 = vsel %vm2012_vm1, %v3969_v5, %v2009_v41  ;;  %v1392_v5 = vadd.f32 %v5663_v52, %v5082_v29  ;;  %vm5831_vm6 = vmpackc.low %vm6552_vm14, %vm6552_vm14  ;;  %v6557_v41 = vld [vmem:[#allocation27_spill] sm:$0xff] }
 0x2b4   : > { %3978 = vrcp.f32 %v5798_v12  ;;  %v2018_v7 = vsel %vm5780_vm4, %v2017_v39, %v2013_v48  ;;  %vm2539_vm10 = vcmp.ne.s32.totalorder %v3486_v4, %v5725_v19  ;;  %vm2026_vm0 = vweird.f32 %v5796_v8 }
 0x2b5   : > { %v2022_v18 = vsub.f32 1.0, %v2021_v14  ;;  %v2163_v59 = vmul.f32 %v3971_v26, %v2018_v7  ;;  %v3487_v26 = vunpack.i.l.s16 %v2483_v28  ;;  %v2029_v52 = vand.u32 2147483647, %v5734_v43 }
 0x2b6   : > { %v1487_v32 = vpop.f32.mrf.mxu3  ;;  %v3503_v20 = vunpack.i.l.s16 %v2499_v40  ;;  %vm2025_vm13 = vweird.f32 %v5734_v43  ;;  %v2031_v60 = vand.u32 2147483648, %v5734_v43  ;;  %v1398_v34 = vpop.f32.mrf.mxu2  ;;  %v2044_v11 = vand.u32 2147483647, %v5798_v12 }
 0x2b7   : > { %v1488_v36 = vadd.f32 %v1487_v32, %v4990_v44  ;;  %v2280_v57 = vpop.f32.mrf.mxu0  ;;  %v2183_v27 = vpack.c.bf16 %v2163_v59, %v2162_v63  ;;  %v2023_v56 = vmul.f32 %v5796_v8, %v2022_v18  ;;  %vm2540_vm15 = vcmp.ne.s32.totalorder %v3487_v26, %v5737_v16  ;;  %vm5847_vm4 = vmor %vm2025_vm13, %vm2026_vm0 }
 0x2b8   : > { %v2281_v1 = vadd.f32 %v5601_v31, %v2280_v57  ;;  %vm2541_vm2 = vmpackc.low %vm2540_vm15, %vm2539_vm10  ;;  %vm2595_vm7 = vcmp.ne.s32.totalorder %v3502_v13, %v5725_v19  ;;  %vm2596_vm12 = vcmp.ne.s32.totalorder %v3503_v20, %v5737_v16  ;;  %v2046_v24 = vand.u32 2147483648, %v5798_v12 }
 0x2b9   : > { %v3977_v37 = vpop.eup %3976  ;;  %v3447_v3 = vmul.f32 -1.442695, %v1488_v36  ;;  %2319 = vmatmul.bf16.gmra.mxu0 %v2183_v27  ;;  %v2024_v46 = vadd.f32 %v5796_v8, %v2023_v56  ;;  %vm2597_vm1 = vmpackc.low %vm2596_vm12, %vm2595_vm7  ;;  %v2641_v33 = vsel %vm2541_vm2, 65537, %v4319_v25  ;;  %vm6558_vm10 = vcmp.lt.s32.totalorder %v6557_v41, 1200 }
 0x2ba   : > { %v3979_v53 = vpop.eup %3978  ;;  %v5835_v47 = vadd.f32 1.0, %v3977_v37  ;;  %2351 = vxpose.xlu1.b32.cont [7/16] (narrow) %v2281_v1, 8  ;;  %vm5859_vm0 = vmpackc.low %vm6558_vm10, %vm6558_vm10  ;;  %vm5866_vm14 = vcmp.eq.f32.partialorder %v2029_v52, 8.507059e+37  ;;  %v2649_v14 = vsel %vm2597_vm1, 65537, %v4319_v25  ;;  %v2032_v7 = vor.u32 1.1754944e-38, %v2031_v60 }
 0x2bb   : > { %v2036_v42 = vmul.f32 %v3979_v53, %v5798_v12  ;;  %3980 = vpow2.f32 %v3447_v3  ;;  %v2028_v51 = vsel %vm5847_vm4, %v5796_v8, %v2024_v46  ;;  %vm2041_vm15 = vweird.f32 %v3979_v53  ;;  %vm5875_vm13 = vmpackc.low %vm1096_vm3, %vm1096_vm3 }
 0x2bc   : > { %3982 = vrcp.f32 %v5835_v47  ;;  %vm2040_vm2 = vweird.f32 %v5798_v12  ;;  %vm5881_vm4 = vcmp.eq.f32.partialorder %v2044_v11, 8.507059e+37  ;;  %vm5888_vm7 = vmpackc.low %vm1097_vm9, %vm1097_vm9  ;;  %v2452_v58 = vsel %vm5831_vm6, 65537, %v4319_v25 }
 0x2bd   : > { %3984 = vtanh.f32 %v1392_v5  ;;  %v2037_v43 = vsub.f32 1.0, %v2036_v42  ;;  %3813 = vxpose.binary.xlu0.c.b16.cont [2/16] (narrow) %v2649_v14, %v2641_v33, 16  ;;  %v2033_v12 = vsel %vm5866_vm14, %v2032_v7, %v2028_v51  ;;  %v2047_v4 = vor.u32 1.1754944e-38, %v2046_v24  ;;  %vm2042_vm3 = vmor %vm2040_vm2, %vm2041_vm15 }
 0x2be   : > { %3986 = vtanh.f32 %v1394_v54  ;;  %v1490_v6 = vpop.f32.mrf.mxu3  ;;  %v2453_v45 = vsel %vm5859_vm0, 65537, %v4319_v25  ;;  %v2468_v57 = vsel %vm5875_vm13, 65537, %v4319_v25  ;;  %v2484_v27 = vunpack.c.l.b16 %v2452_v58  ;;  %v5916_v46 = vpop.f32.mrf.mxu2 }
 0x2bf   : > { %v1491_v48 = vadd.f32 %v1490_v6, %v4990_v44  ;;  %v2282_v22 = vpop.f32.mrf.mxu0  ;;  %v2038_v18 = vmul.f32 %v3979_v53, %v2037_v43  ;;  %v2469_v26 = vsel %vm5888_vm7, 65537, %v4319_v25  ;;  %v2485_v62 = vunpack.c.l.b16 %v2453_v45 }
 0x2c0   : > { %v2283_v8 = vadd.f32 %v5601_v31, %v2282_v22  ;;  %v2500_v42 = vunpack.c.l.b16 %v2468_v57  ;;  %v2501_v60 = vunpack.c.l.b16 %v2469_v26  ;;  %v1397_v61 = vadd.f32 %v5800_v0, %v5082_v29  ;;  %v6569_v22 = vld [vmem:[#allocation28_spill] sm:$0xff]  ;;  %v6587_v57 = vld [vmem:[#allocation30_spill] sm:$0xff] }
 0x2c1   : > { %v3981_v32 = vpop.eup %3980  ;;  %v3448_v35 = vmul.f32 -1.442695, %v1491_v48  ;;  %v2039_v40 = vadd.f32 %v3979_v53, %v2038_v18  ;;  %v1399_v41 = vadd.f32 %v1398_v34, %v5082_v29  ;;  %v3489_v6 = vunpack.i.l.s16 %v2485_v62 }
 0x2c2   : > { %v5897_v5 = vpop.eup %3982  ;;  %v5899_v36 = vadd.f32 1.0, %v3981_v32  ;;  %2352 = vxpose.xlu1.b32.cont [8/16] (narrow) %v2283_v8, 8  ;;  %v2059_v0 = vand.u32 2147483647, %v5835_v47  ;;  %v3504_v14 = vunpack.i.l.s16 %v2500_v42  ;;  %vm6570_vm12 = vcmp.lt.s32.totalorder %v6569_v22, 1200 }
 0x2c3   : > { %v3985_v56 = vpop.eup %3984  ;;  %v2051_v54 = vmul.f32 %v5897_v5, %v5835_v47  ;;  %3988 = vpow2.f32 %v3448_v35  ;;  %v2043_v1 = vsel %vm2042_vm3, %v3979_v53, %v2039_v40  ;;  %v3488_v53 = vunpack.i.l.s16 %v2484_v27  ;;  %vm5930_vm1 = vmpackc.low %vm6570_vm12, %vm6570_vm12 }
 0x2c4   : > { %v3987_v37 = vpop.eup %3986  ;;  %3990 = vrcp.f32 %v5899_v36  ;;  %v2048_v3 = vsel %vm5881_vm4, %v2047_v4, %v2043_v1  ;;  %v2164_v13 = vmul.f32 %v3985_v56, %v2033_v12  ;;  %vm2056_vm6 = vweird.f32 %v5897_v5  ;;  %v6575_v12 = vld [vmem:[#allocation29_spill] sm:$0xff]  ;;  %vm5974_vm12 = vmpackc.low %vm1098_vm8, %vm1098_vm8 }
 0x2c5   : > { %v2052_v52 = vsub.f32 1.0, %v2051_v54  ;;  %v2165_v38 = vmul.f32 %v3987_v37, %v2048_v3  ;;  %vm2546_vm9 = vcmp.ne.s32.totalorder %v3488_v53, %v5725_v19  ;;  %vm2547_vm10 = vcmp.ne.s32.totalorder %v3489_v6, %v5737_v16 }
 0x2c6   : > { %v1492_v20 = vpop.f32.mrf.mxu3  ;;  %v3505_v63 = vunpack.i.l.s16 %v2501_v60  ;;  %vm2055_vm0 = vweird.f32 %v5835_v47  ;;  %v2061_v59 = vand.u32 2147483648, %v5835_v47  ;;  %vm2548_vm14 = vmpackc.low %vm2547_vm10, %vm2546_vm9  ;;  %v2074_v58 = vand.u32 2147483647, %v5899_v36 }
 0x2c7   : > { %v1493_v11 = vadd.f32 %v1492_v20, %v4990_v44  ;;  %v2285_v43 = vpop.f32.mrf.mxu0  ;;  %v2184_v24 = vpack.c.bf16 %v2165_v38, %v2164_v13  ;;  %v2053_v33 = vmul.f32 %v5897_v5, %v2052_v52  ;;  %vm5946_vm15 = vmor %vm2055_vm0, %vm2056_vm6  ;;  %vm2602_vm13 = vcmp.ne.s32.totalorder %v3504_v14, %v5725_v19 }
 0x2c8   : > { %v2286_v39 = vadd.f32 %v5601_v31, %v2285_v43  ;;  %vm2603_vm2 = vcmp.ne.s32.totalorder %v3505_v63, %v5737_v16  ;;  %v2076_v47 = vand.u32 2147483648, %v5899_v36  ;;  %v2642_v35 = vsel %vm2548_vm14, 65537, %v4319_v25  ;;  %vm5987_vm14 = vmpackc.low %vm1099_vm11, %vm1099_vm11 }
 0x2c9   : > { %v3989_v51 = vpop.eup %3988  ;;  %v3449_v9 = vmul.f32 -1.442695, %v1493_v11  ;;  %2324 = vmatmul.bf16.gmra.mxu0 %v2184_v24  ;;  %v2054_v18 = vadd.f32 %v5897_v5, %v2053_v33  ;;  %vm2604_vm4 = vmpackc.low %vm2603_vm2, %vm2602_vm13  ;;  %vm6576_vm7 = vcmp.lt.s32.totalorder %v6575_v12, 1200  ;;  %vm5965_vm9 = vcmp.eq.f32.partialorder %v2059_v0, 8.507059e+37 }
 0x2ca   : > { %v3991_v48 = vpop.eup %3990  ;;  %v5934_v34 = vadd.f32 1.0, %v3989_v51  ;;  %2353 = vxpose.xlu1.b32.cont [9/16] (narrow) %v2286_v39, 8  ;;  %vm5958_vm3 = vmpackc.low %vm6576_vm7, %vm6576_vm7  ;;  %v2650_v27 = vsel %vm2604_vm4, 65537, %v4319_v25  ;;  %v2062_v1 = vor.u32 1.1754944e-38, %v2061_v59  ;;  %vm2070_vm10 = vweird.f32 %v5899_v36 }
 0x2cb   : > { %v2066_v8 = vmul.f32 %v3991_v48, %v5899_v36  ;;  %3992 = vpow2.f32 %v3449_v9  ;;  %v2058_v45 = vsel %vm5946_vm15, %v5897_v5, %v2054_v18  ;;  %vm2071_vm6 = vweird.f32 %v3991_v48  ;;  %v1403_v5 = vpop.f32.mrf.mxu2 }
 0x2cc   : > { %3994 = vrcp.f32 %v5934_v34  ;;  %vm5980_vm0 = vcmp.eq.f32.partialorder %v2074_v58, 8.507059e+37  ;;  %v2454_v13 = vsel %vm5930_vm1, 65537, %v4319_v25  ;;  %v2063_v36 = vsel %vm5965_vm9, %v2062_v1, %v2058_v45  ;;  %vm2072_vm8 = vmor %vm2070_vm10, %vm2071_vm6 }
 0x2cd   : > { %3996 = vtanh.f32 %v1397_v61  ;;  %v2067_v32 = vsub.f32 1.0, %v2066_v8  ;;  %3814 = vxpose.binary.xlu0.c.b16.cont [3/16] (narrow) %v2650_v27, %v2642_v35, 16  ;;  %v2077_v42 = vor.u32 1.1754944e-38, %v2076_v47  ;;  %v2455_v30 = vsel %vm5958_vm3, 65537, %v4319_v25 }
 0x2ce   : > { %3998 = vtanh.f32 %v1399_v41  ;;  %v1495_v4 = vpop.f32.mrf.mxu3  ;;  %v2470_v61 = vsel %vm5974_vm12, 65537, %v4319_v25  ;;  %v2486_v11 = vunpack.c.l.b16 %v2454_v13  ;;  %v2471_v41 = vsel %vm5987_vm14, 65537, %v4319_v25  ;;  %v6593_v13 = vld [vmem:[#allocation31_spill] sm:$0xff] }
 0x2cf   : > { %v1496_v56 = vadd.f32 %v1495_v4, %v4990_v44  ;;  %v2287_v54 = vpop.f32.mrf.mxu0  ;;  %v2068_v26 = vmul.f32 %v3991_v48, %v2067_v32  ;;  %v2487_v14 = vunpack.c.l.b16 %v2455_v30  ;;  %v1402_v22 = vadd.f32 %v5916_v46, %v5082_v29 }
 0x2d0   : > { %v2288_v3 = vadd.f32 %v5601_v31, %v2287_v54  ;;  %v2502_v18 = vunpack.c.l.b16 %v2470_v61  ;;  %v3490_v63 = vunpack.i.l.s16 %v2486_v11  ;;  %v1404_v8 = vadd.f32 %v1403_v5, %v5082_v29 }
 0x2d1   : > { %v3993_v38 = vpop.eup %3992  ;;  %v3450_v62 = vmul.f32 -1.442695, %v1496_v56  ;;  %v2069_v20 = vadd.f32 %v3991_v48, %v2068_v26  ;;  %v2089_v35 = vand.u32 2147483647, %v5934_v34  ;;  %v3491_v12 = vunpack.i.l.s16 %v2487_v14 }
 0x2d2   : > { %v5996_v60 = vpop.eup %3994  ;;  %v5998_v53 = vadd.f32 1.0, %v3993_v38  ;;  %2354 = vxpose.xlu1.b32.cont [10/16] (narrow) %v2288_v3, 8  ;;  %vm2553_vm11 = vcmp.ne.s32.totalorder %v3490_v63, %v5725_v19  ;;  %v3506_v45 = vunpack.i.l.s16 %v2502_v18  ;;  %vm6588_vm15 = vcmp.lt.s32.totalorder %v6587_v57, 1200 }
 0x2d3   : > { %v3997_v43 = vpop.eup %3996  ;;  %v2081_v24 = vmul.f32 %v5996_v60, %v5934_v34  ;;  %4000 = vpow2.f32 %v3450_v62  ;;  %v2073_v33 = vsel %vm2072_vm8, %v3991_v48, %v2069_v20  ;;  %v2503_v48 = vunpack.c.l.b16 %v2471_v41  ;;  %vm6028_vm13 = vmpackc.low %vm6588_vm15, %vm6588_vm15  ;;  %v1406_v56 = vpop.f32.mrf.mxu2 }
 0x2d4   : > { %v3999_v39 = vpop.eup %3998  ;;  %4002 = vrcp.f32 %v5998_v53  ;;  %v2078_v6 = vsel %vm5980_vm0, %v2077_v42, %v2073_v33  ;;  %v2166_v9 = vmul.f32 %v3997_v43, %v2063_v36  ;;  %vm2086_vm1 = vweird.f32 %v5996_v60 }
 0x2d5   : > { %v2082_v51 = vsub.f32 1.0, %v2081_v24  ;;  %v2167_v0 = vmul.f32 %v3999_v39, %v2078_v6  ;;  %v2091_v1 = vand.u32 2147483648, %v5934_v34  ;;  %vm2554_vm2 = vcmp.ne.s32.totalorder %v3491_v12, %v5737_v16 }
 0x2d6   : > { %v1497_v7 = vpop.f32.mrf.mxu3  ;;  %v3507_v26 = vunpack.i.l.s16 %v2503_v48  ;;  %vm2085_vm4 = vweird.f32 %v5934_v34  ;;  %vm2555_vm7 = vmpackc.low %vm2554_vm2, %vm2553_vm11  ;;  %v2106_v3 = vand.u32 2147483648, %v5998_v53  ;;  %vm2609_vm9 = vcmp.ne.s32.totalorder %v3506_v45, %v5725_v19 }
 0x2d7   : > { %v1498_v59 = vadd.f32 %v1497_v7, %v4990_v44  ;;  %v2290_v28 = vpop.f32.mrf.mxu0  ;;  %v2185_v58 = vpack.c.bf16 %v2167_v0, %v2166_v9  ;;  %v2083_v32 = vmul.f32 %v5996_v60, %v2082_v51  ;;  %vm6043_vm3 = vmor %vm2085_vm4, %vm2086_vm1  ;;  %v2643_v15 = vsel %vm2555_vm7, 65537, %v4319_v25 }
 0x2d8   : > { %v2291_v47 = vadd.f32 %v5601_v31, %v2290_v28  ;;  %vm2610_vm6 = vcmp.ne.s32.totalorder %v3507_v26, %v5737_v16  ;;  %vm6594_vm10 = vcmp.lt.s32.totalorder %v6593_v13, 1200  ;;  %vm2090_vm14 = vcmp.eq.f32.partialorder %v2089_v35, 8.507059e+37  ;;  %vm2440_vm1 = vmpackc.low %vm1100_vm5, %vm1100_vm5 }
 0x2d9   : > { %v4001_v46 = vpop.eup %4000  ;;  %v3451_v40 = vmul.f32 -1.442695, %v1498_v59  ;;  %2329 = vmatmul.bf16.gmra.mxu0 %v2185_v58  ;;  %v2084_v4 = vadd.f32 %v5996_v60, %v2083_v32  ;;  %vm2611_vm12 = vmpackc.low %vm2610_vm6, %vm2609_vm9  ;;  %v2092_v62 = vor.u32 1.1754944e-38, %v2091_v1  ;;  %vm2100_vm8 = vweird.f32 %v5998_v53  ;;  %v6598_v1 = vld [vmem:[#allocation32_spill] sm:$0xff] }
 0x2da   : > { %v4003_v44 = vpop.eup %4002  ;;  %v6032_v54 = vadd.f32 1.0, %v4001_v46  ;;  %2355 = vxpose.xlu1.b32.cont [11/16] (narrow) %v2291_v47, 8  ;;  %vm6057_vm0 = vmpackc.low %vm6594_vm10, %vm6594_vm10  ;;  %v2651_v36 = vsel %vm2611_vm12, 65537, %v4319_v25  ;;  %v2107_v11 = vor.u32 1.1754944e-38, %v2106_v3  ;;  %vm6597_vm15 = vcmp.lt.s32.totalorder %v5197_v17, 1200 }
 0x2db   : > { %v2096_v37 = vmul.f32 %v4003_v44, %v5998_v53  ;;  %4004 = vpow2.f32 %v3451_v40  ;;  %v2088_v34 = vsel %vm6043_vm3, %v5996_v60, %v2084_v4  ;;  %vm2101_vm11 = vweird.f32 %v4003_v44  ;;  %vm2441_vm2 = vmpackc.low %vm6597_vm15, %vm6597_vm15  ;;  %v1408_v63 = vpop.f32.mrf.mxu2 }
 0x2dc   : > { %4006 = vrcp.f32 %v6032_v54  ;;  %v2104_v60 = vand.u32 2147483647, %v5998_v53  ;;  %v2093_v61 = vsel %vm2090_vm14, %v2092_v62, %v2088_v34  ;;  %v2456_v43 = vsel %vm6028_vm13, 65537, %v4319_v25  ;;  %vm2102_vm5 = vmor %vm2100_vm8, %vm2101_vm11 }
 0x2dd   : > { %4008 = vtanh.f32 %v1402_v22  ;;  %v2097_v52 = vsub.f32 1.0, %v2096_v37  ;;  %3815 = vxpose.binary.xlu0.c.b16.cont [4/16] (narrow) %v2651_v36, %v2643_v15, 16  ;;  %v2457_v50 = vsel %vm6057_vm0, 65537, %v4319_v25  ;;  %v2472_v41 = vsel %vm2440_vm1, 65537, %v4319_v25  ;;  %v6602_v37 = vld [vmem:[#allocation33_spill] sm:$0xff] }
 0x2de   : > { %4010 = vtanh.f32 %v1404_v8  ;;  %v2473_v39 = vsel %vm2441_vm2, 65537, %v4319_v25  ;;  %v2488_v17 = vunpack.c.l.b16 %v2456_v43  ;;  %v2489_v9 = vunpack.c.l.b16 %v2457_v50 }
 0x2df   : > { %v2292_v20 = vpop.f32.mrf.mxu0  ;;  %v2098_v42 = vmul.f32 %v4003_v44, %v2097_v52  ;;  %v2504_v0 = vunpack.c.l.b16 %v2472_v41  ;;  %vm2105_vm13 = vcmp.eq.f32.partialorder %v2104_v60, 8.507059e+37  ;;  %v2505_v18 = vunpack.c.l.b16 %v2473_v39  ;;  %v6139_v60 = vld [vmem:[%s6517_s6] ss:$0 sm:$0xff] }
 0x2e0   : > { %v2293_v30 = vadd.f32 %v5601_v31, %v2292_v20  ;;  %v3492_v53 = vunpack.i.l.s16 %v2488_v17  ;;  %v1407_v32 = vadd.f32 %v1406_v56, %v5082_v29  ;;  %v3493_v47 = vunpack.i.l.s16 %v2489_v9 }
 0x2e1   : > { %v4005_v24 = vpop.eup %4004  ;;  %v2099_v33 = vadd.f32 %v4003_v44, %v2098_v42  ;;  %v3508_v35 = vunpack.i.l.s16 %v2504_v0  ;;  %v3509_v12 = vunpack.i.l.s16 %v2505_v18  ;;  %v1409_v46 = vadd.f32 %v1408_v63, %v5082_v29 }
 0x2e2   : > { %v6079_v6 = vpop.eup %4006  ;;  %v6081_v51 = vadd.f32 1.0, %v4005_v24  ;;  %2356 = vxpose.xlu1.b32.cont [12/16] (narrow) %v2293_v30, 8  ;;  %vm2560_vm4 = vcmp.ne.s32.totalorder %v3492_v53, %v5725_v19  ;;  %vm2561_vm7 = vcmp.ne.s32.totalorder %v3493_v47, %v5737_v16  ;;  %v2119_v29 = vand.u32 2147483647, %v6032_v54  ;;  %v6614_v53 = vld [vmem:[#allocation35_spill] sm:$0xff] }
 0x2e3   : > { %v4009_v14 = vpop.eup %4008  ;;  %v2111_v22 = vmul.f32 %v6079_v6, %v6032_v54  ;;  %v2103_v7 = vsel %vm2102_vm5, %v4003_v44, %v2099_v33  ;;  %vm2616_vm3 = vcmp.ne.s32.totalorder %v3508_v35, %v5725_v19  ;;  %vm2617_vm9 = vcmp.ne.s32.totalorder %v3509_v12, %v5737_v16  ;;  %vm2562_vm6 = vmpackc.low %vm2561_vm7, %vm2560_vm4 }
 0x2e4   : > { %v4011_v48 = vpop.eup %4010  ;;  %4012 = vrcp.f32 %v6081_v51  ;;  %v2108_v8 = vsel %vm2105_vm13, %v2107_v11, %v2103_v7  ;;  %v2168_v28 = vmul.f32 %v4009_v14, %v2093_v61  ;;  %v2121_v27 = vand.u32 2147483648, %v6032_v54  ;;  %vm2618_vm12 = vmpackc.low %vm2617_vm9, %vm2616_vm3 }
 0x2e5   : > { %v2112_v59 = vsub.f32 1.0, %v2111_v22  ;;  %v2169_v58 = vmul.f32 %v4011_v48, %v2108_v8  ;;  %4014 = vtanh.f32 %v1407_v32  ;;  %vm2116_vm10 = vweird.f32 %v6079_v6 }
 0x2e6   : > { %vm6599_vm0 = vcmp.lt.s32.totalorder %v6598_v1, 1200  ;;  %4016 = vtanh.f32 %v1409_v46  ;;  %vm6603_vm8 = vcmp.lt.s32.totalorder %v6602_v37, 1200  ;;  %vm2115_vm1 = vweird.f32 %v6032_v54  ;;  %v6618_v37 = vld [vmem:[#allocation37_spill] sm:$0xff] }
 0x2e7   : > { %v2295_v40 = vpop.f32.mrf.mxu0  ;;  %v2186_v4 = vpack.c.bf16 %v2169_v58, %v2168_v28  ;;  %v2113_v45 = vmul.f32 %v6079_v6, %v2112_v59  ;;  %vm6105_vm14 = vmpackc.low %vm6599_vm0, %vm6599_vm0  ;;  %v2644_v52 = vsel %vm2562_vm6, 65537, %v4319_v25  ;;  %v2652_v34 = vsel %vm2618_vm12, 65537, %v4319_v25  ;;  %v6612_v58 = vld [vmem:[#allocation34_spill] sm:$0xff] }
 0x2e8   : > { %v2296_v44 = vadd.f32 %v5601_v31, %v2295_v40  ;;  %vm6112_vm11 = vmpackc.low %vm6603_vm8, %vm6603_vm8  ;;  %vm6123_vm2 = vcmp.eq.f32.partialorder %v2119_v29, 8.507059e+37  ;;  %v2122_v38 = vor.u32 1.1754944e-38, %v2121_v27  ;;  %vm2130_vm5 = vweird.f32 %v6081_v51 }
 0x2e9   : > { %2334 = vmatmul.bf16.gmra.mxu0 %v2186_v4  ;;  %v2114_v31 = vadd.f32 %v6079_v6, %v2113_v45  ;;  %vm6119_vm15 = vmor %vm2115_vm1, %vm2116_vm10  ;;  %v2136_v62 = vand.u32 2147483648, %v6081_v51  ;;  %v2134_v42 = vand.u32 2147483647, %v6081_v51  ;;  %vm6610_vm4 = vcmp.lt.s32.totalorder %v5257_v49, 1200 }
 0x2ea   : > { %v4013_v57 = vpop.eup %4012  ;;  %2357 = vxpose.xlu1.b32.cont [13/16] (narrow) %v2296_v44, 8  ;;  %vm2442_vm7 = vmpackc.low %vm6610_vm4, %vm6610_vm4  ;;  %vm6611_vm3 = vcmp.lt.s32.totalorder %v5260_v55, 1200  ;;  %v2458_v61 = vsel %vm6105_vm14, 65537, %v4319_v25  ;;  %v2459_v49 = vsel %vm6112_vm11, 65537, %v4319_v25  ;;  %vm6616_vm4 = vcmp.lt.s32.totalorder %v5320_v2, 1200 }
 0x2eb   : > { %v2126_v56 = vmul.f32 %v4013_v57, %v6081_v51  ;;  %v2118_v54 = vsel %vm6119_vm15, %v6079_v6, %v2114_v31  ;;  %vm2131_vm13 = vweird.f32 %v4013_v57  ;;  %vm2443_vm9 = vmpackc.low %vm6611_vm3, %vm6611_vm3  ;;  %v2474_v11 = vsel %vm2442_vm7, 65537, %v4319_v25  ;;  %v4015_v43 = vpop.eup %4014 }
 0x2ec   : > { %v2475_v33 = vsel %vm2443_vm9, 65537, %v4319_v25  ;;  %v2490_v50 = vunpack.c.l.b16 %v2458_v61  ;;  %v2491_v41 = vunpack.c.l.b16 %v2459_v49  ;;  %v4017_v39 = vpop.eup %4016  ;;  %v2123_v55 = vsel %vm6123_vm2, %v2122_v38, %v2118_v54  ;;  %vm2132_vm6 = vmor %vm2130_vm5, %vm2131_vm13 }
 0x2ed   : > { %v2127_v3 = vsub.f32 1.0, %v2126_v56  ;;  %3816 = vxpose.binary.xlu0.c.b16.cont [5/16] (narrow) %v2652_v34, %v2644_v52, 16  ;;  %v2137_v6 = vor.u32 1.1754944e-38, %v2136_v62  ;;  %v2506_v17 = vunpack.c.l.b16 %v2474_v11  ;;  %v2507_v9 = vunpack.c.l.b16 %v2475_v33  ;;  %vm2444_vm7 = vmpackc.low %vm6616_vm4, %vm6616_vm4  ;;  %v6620_v34 = vld [vmem:[#allocation36_spill] sm:$0xff] }
 0x2ee   : > { %vm2135_vm12 = vcmp.eq.f32.partialorder %v2134_v42, 8.507059e+37  ;;  %v3494_v14 = vunpack.i.l.s16 %v2490_v50  ;;  %v3495_v22 = vunpack.i.l.s16 %v2491_v41  ;;  %v2170_v63 = vmul.f32 %v4015_v43, %v2123_v55 }
 0x2ef   : > { %v2297_v36 = vpop.f32.mrf.mxu0  ;;  %v2128_v20 = vmul.f32 %v4013_v57, %v2127_v3  ;;  %v3510_v18 = vunpack.i.l.s16 %v2506_v17  ;;  %v3511_v48 = vunpack.i.l.s16 %v2507_v9  ;;  %vm6613_vm15 = vcmp.lt.s32.totalorder %v6612_v58, 1200 }
 0x2f0   : > { %v2298_v30 = vadd.f32 %v6139_v60, %v2297_v36  ;;  %vm2567_vm10 = vcmp.ne.s32.totalorder %v3494_v14, %v5725_v19  ;;  %vm2568_vm0 = vcmp.ne.s32.totalorder %v3495_v22, %v5737_v16  ;;  %vm2428_vm2 = vmpackc.low %vm6613_vm15, %vm6613_vm15  ;;  %vm6615_vm5 = vcmp.lt.s32.totalorder %v6614_v53, 1200 }
 0x2f1   : > { %v2129_v24 = vadd.f32 %v4013_v57, %v2128_v20  ;;  %vm2623_vm14 = vcmp.ne.s32.totalorder %v3510_v18, %v5725_v19  ;;  %vm2624_vm8 = vcmp.ne.s32.totalorder %v3511_v48, %v5737_v16  ;;  %vm2569_vm11 = vmpackc.low %vm2568_vm0, %vm2567_vm10  ;;  %vm6617_vm3 = vcmp.lt.s32.totalorder %v5323_v10, 1200 }
 0x2f2   : > { %2358 = vxpose.xlu1.b32.cont [14/16] (narrow) %v2298_v30, 8  ;;  %vm2625_vm1 = vmpackc.low %vm2624_vm8, %vm2623_vm14  ;;  %v2645_v32 = vsel %vm2569_vm11, 65537, %v4319_v25  ;;  %v2460_v46 = vsel %vm2428_vm2, 65537, %v4319_v25  ;;  %v2476_v4 = vsel %vm2444_vm7, 65537, %v4319_v25  ;;  %vm6619_vm11 = vcmp.lt.s32.totalorder %v6618_v37, 1200 }
 0x2f3   : > { %v2133_v0 = vsel %vm2132_vm6, %v4013_v57, %v2129_v24  ;;  %vm2429_vm13 = vmpackc.low %vm6615_vm5, %vm6615_vm5  ;;  %v2653_v47 = vsel %vm2625_vm1, 65537, %v4319_v25  ;;  %v2492_v44 = vunpack.c.l.b16 %v2460_v46  ;;  %v2508_v2 = vunpack.c.l.b16 %v2476_v4 }
 0x2f4   : > { %v2138_v7 = vsel %vm2135_vm12, %v2137_v6, %v2133_v0  ;;  %vm2445_vm9 = vmpackc.low %vm6617_vm3, %vm6617_vm3  ;;  %v2461_v40 = vsel %vm2429_vm13, 65537, %v4319_v25  ;;  %vm6621_vm15 = vcmp.lt.s32.totalorder %v6620_v34, 1200  ;;  %vm6622_vm5 = vcmp.lt.s32.totalorder %v5386_v21, 1200 }
 0x2f5   : > { %v2171_v8 = vmul.f32 %v4017_v39, %v2138_v7  ;;  %v2477_v45 = vsel %vm2445_vm9, 65537, %v4319_v25  ;;  %v2493_v57 = vunpack.c.l.b16 %v2461_v40  ;;  %v3496_v27 = vunpack.i.l.s16 %v2492_v44  ;;  %vm2430_vm1 = vmpackc.low %vm6619_vm11, %vm6619_vm11 }
 0x2f6   : > { %v2509_v29 = vunpack.c.l.b16 %v2477_v45  ;;  %v3512_v31 = vunpack.i.l.s16 %v2508_v2  ;;  %vm2431_vm2 = vmpackc.low %vm6621_vm15, %vm6621_vm15  ;;  %v2462_v13 = vsel %vm2430_vm1, 65537, %v4319_v25  ;;  %vm6623_vm4 = vcmp.lt.s32.totalorder %v5383_v23, 1200 }
 0x2f7   : > { %v2300_v59 = vpop.f32.mrf.mxu0  ;;  %v2187_v28 = vpack.c.bf16 %v2171_v8, %v2170_v63  ;;  %v3497_v56 = vunpack.i.l.s16 %v2493_v57  ;;  %vm2574_vm6 = vcmp.ne.s32.totalorder %v3496_v27, %v5725_v19  ;;  %vm2446_vm13 = vmpackc.low %vm6622_vm5, %vm6622_vm5  ;;  %v2463_v38 = vsel %vm2431_vm2, 65537, %v4319_v25 }
 0x2f8   : > { %v2301_v51 = vadd.f32 %v6139_v60, %v2300_v59  ;;  %v3513_v1 = vunpack.i.l.s16 %v2509_v29  ;;  %vm2630_vm0 = vcmp.ne.s32.totalorder %v3512_v31, %v5725_v19  ;;  %vm2447_vm7 = vmpackc.low %vm6623_vm4, %vm6623_vm4  ;;  %v2478_v62 = vsel %vm2446_vm13, 65537, %v4319_v25 }
 0x2f9   : > { %2339 = vmatmul.bf16.gmra.mxu0 %v2187_v28  ;;  %vm2575_vm12 = vcmp.ne.s32.totalorder %v3497_v56, %v5737_v16  ;;  %v2494_v36 = vunpack.c.l.b16 %v2462_v13  ;;  %v2495_v54 = vunpack.c.l.b16 %v2463_v38  ;;  %v2479_v20 = vsel %vm2447_vm7, 65537, %v4319_v25 }
 0x2fa   : > { %2359 = vxpose.xlu1.b32.cont [15/16] (narrow) %v2301_v51, 8  ;;  %vm2576_vm10 = vmpackc.low %vm2575_vm12, %vm2574_vm6  ;;  %vm2631_vm14 = vcmp.ne.s32.totalorder %v3513_v1, %v5737_v16  ;;  %v2510_v42 = vunpack.c.l.b16 %v2478_v62  ;;  %v2511_v30 = vunpack.c.l.b16 %v2479_v20 }
 0x2fb   : > { %vm2632_vm8 = vmpackc.low %vm2631_vm14, %vm2630_vm0  ;;  %v2646_v5 = vsel %vm2576_vm10, 65537, %v4319_v25  ;;  %v3498_v21 = vunpack.i.l.s16 %v2494_v36  ;;  %v3499_v61 = vunpack.i.l.s16 %v2495_v54 }
 0x2fc   : > { %v2654_v3 = vsel %vm2632_vm8, 65537, %v4319_v25  ;;  %v3514_v49 = vunpack.i.l.s16 %v2510_v42  ;;  %v3515_v11 = vunpack.i.l.s16 %v2511_v30  ;;  %v2732_v30 = vld [vmem:[%s4616_s21] sm:$0xf] }
 0x2fd   : > { %3817 = vxpose.binary.xlu0.c.b16.cont [6/16] (narrow) %v2653_v47, %v2645_v32, 16  ;;  %vm2581_vm3 = vcmp.ne.s32.totalorder %v3498_v21, %v5725_v19  ;;  %vm2582_vm9 = vcmp.ne.s32.totalorder %v3499_v61, %v5737_v16 }
 0x2fe   : > { %vm2637_vm6 = vcmp.ne.s32.totalorder %v3514_v49, %v5725_v19  ;;  %vm2638_vm12 = vcmp.ne.s32.totalorder %v3515_v11, %v5737_v16  ;;  %vm2583_vm10 = vmpackc.low %vm2582_vm9, %vm2581_vm3 }
 0x2ff   : > { %v2302_v35 = vpop.f32.mrf.mxu0  ;;  %vm2639_vm0 = vmpackc.low %vm2638_vm12, %vm2637_vm6  ;;  %v2647_v24 = vsel %vm2583_vm10, 65537, %v4319_v25  ;;  %vm2412_vm6 = vcmask 1043456   ;;  %vm2756_vm10 = vcmask 3072  }
 0x300   : > { %v2303_v12 = vadd.f32 %v6139_v60, %v2302_v35  ;;  %v2655_v33 = vsel %vm2639_vm0, 65537, %v4319_v25 }
 0x302   : > { %2360 = vxpose.xlu1.b32.end [16/16] (narrow) %v2303_v12, 8 }
 0x307   : > { %v2305_v10 = vpop.f32.mrf.mxu0 }
 0x308   : > { %v2306_v26 = vadd.f32 %v6139_v60, %v2305_v10 }
 0x30a   : > { %2377 = vxpose.xlu2.b32.start [1/16] (narrow) %v2306_v26, 8 }
 0x30d   : > { %3818 = vxpose.binary.xlu0.c.b16.cont [7/16] (narrow) %v2654_v3, %v2646_v5, 16 }
 0x30f   : > { %v2307_v52 = vpop.f32.mrf.mxu0 }
 0x310   : > { %v2308_v15 = vadd.f32 %v6139_v60, %v2307_v52 }
 0x312   : > { %2378 = vxpose.xlu2.b32.cont [2/16] (narrow) %v2308_v15, 8 }
 0x317   : > { %v2310_v23 = vpop.f32.mrf.mxu0 }
 0x318   : > { %v2311_v43 = vadd.f32 %v6139_v60, %v2310_v23 }
 0x31a   : > { %2379 = vxpose.xlu2.b32.cont [3/16] (narrow) %v2311_v43, 8 }
 0x31d   : > { %3819 = vxpose.binary.xlu0.c.b16.end [8/16] (narrow) %v2655_v33, %v2647_v24, 16 }
 0x31f   : > { %v2312_v50 = vpop.f32.mrf.mxu0 }
 0x320   : > { %v2313_v41 = vadd.f32 %v6139_v60, %v2312_v50 }
 0x322   : > { %2380 = vxpose.xlu2.b32.cont [4/16] (narrow) %v2313_v41, 8 }
 0x327   : > { %v2315_v39 = vpop.f32.mrf.mxu0 }
 0x328   : > { %v2316_v55 = vadd.f32 %v6139_v60, %v2315_v39 }
 0x32a   : > { %2381 = vxpose.xlu2.b32.cont [5/16] (narrow) %v2316_v55, 8 }
 0x32e   : > { %v2361_v15 = vpop.trf.xlu1 }
 0x32f   : > { %v2317_v6 = vpop.f32.mrf.mxu0 }
 0x330   : > { %v2318_v17 = vadd.f32 %v6139_v60, %v2317_v6 }
 0x332   : > { %2382 = vxpose.xlu2.b32.cont [6/16] (narrow) %v2318_v17, 8 }
 0x337   : > { %v2320_v9 = vpop.f32.mrf.mxu0 }
 0x338   : > { %v2321_v0 = vadd.f32 %v6139_v60, %v2320_v9 }
 0x33a   : > { %2383 = vxpose.xlu2.b32.cont [7/16] (narrow) %v2321_v0, 8 }
 0x33f   : > { %v2322_v14 = vpop.f32.mrf.mxu0 }
 0x340   : > { %v2323_v22 = vadd.f32 %v6139_v60, %v2322_v14 }
 0x342   : > { %2384 = vxpose.xlu2.b32.cont [8/16] (narrow) %v2323_v22, 8 }
 0x347   : > { %v2325_v7 = vpop.f32.mrf.mxu0 }
 0x348   : > { %v2326_v18 = vadd.f32 %v6139_v60, %v2325_v7 }
 0x34a   : > { %2385 = vxpose.xlu2.b32.cont [9/16] (narrow) %v2326_v18, 8 }
 0x34f   : > { %v2327_v48 = vpop.f32.mrf.mxu0 }
 0x350   : > { %v2328_v63 = vadd.f32 %v6139_v60, %v2327_v48 }
 0x352   : > { %2386 = vxpose.xlu2.b32.cont [10/16] (narrow) %v2328_v63, 8 }
 0x355   : > { %3822 = vset.pattern.permute.xlu1 %v4319_v25 }
 0x357   : > { %v2330_v8 = vpop.f32.mrf.mxu0 }
 0x358   : > { %v2331_v59 = vadd.f32 %v6139_v60, %v2330_v8 }
 0x359   : > { %v3820_v58 = vpop.trf.xlu0 }
 0x35a   : > { %2387 = vxpose.xlu2.b32.cont [11/16] (narrow) %v2331_v59, 8  ;;  %v2688_v46 = vunpack.c.l.b16 %v3820_v58  ;;  %v2689_v40 = vunpack.c.h.b16 %v3820_v58 }
 0x35c   : > { %vm2692_vm14 = vcmp.ne.s32.totalorder %v2688_v46, %v5725_v19  ;;  %vm2693_vm8 = vcmp.ne.s32.totalorder %v2689_v40, %v5737_v16 }
 0x35d   : > { %vm2694_vm15 = vmpackc.low %vm2693_vm8, %vm2692_vm14 }
 0x35e   : > { %v2702_v2 = vsel %vm2694_vm15, 65537, %v4319_v25 }
 0x35f   : > { %v2332_v28 = vpop.f32.mrf.mxu0  ;;  %v2704_v31 = vunpack.c.l.b16 %v2702_v2 }
 0x360   : > { %v2333_v51 = vadd.f32 %v6139_v60, %v2332_v28 }
 0x361   : > { %v3821_v12 = vpop.trf.xlu0  ;;  %v3516_v10 = vunpack.i.l.s16 %v2704_v31 }
 0x362   : > { %2388 = vxpose.xlu2.b32.cont [12/16] (narrow) %v2333_v51, 8  ;;  %v2695_v4 = vunpack.c.l.b16 %v3821_v12  ;;  %v2696_v45 = vunpack.c.h.b16 %v3821_v12 }
 0x363   : > { %vm2711_vm5 = vcmp.ne.s32.totalorder %v3516_v10, %v5725_v19 }
 0x364   : > { %vm2699_vm11 = vcmp.ne.s32.totalorder %v2695_v4, %v5725_v19  ;;  %vm2700_vm1 = vcmp.ne.s32.totalorder %v2696_v45, %v5737_v16 }
 0x365   : > { %vm2701_vm2 = vmpackc.low %vm2700_vm1, %vm2699_vm11 }
 0x366   : > { %v2703_v29 = vsel %vm2701_vm2, 65537, %v4319_v25 }
 0x367   : > { %v2335_v53 = vpop.f32.mrf.mxu0  ;;  %v2705_v1 = vunpack.c.l.b16 %v2703_v29 }
 0x368   : > { %v2336_v32 = vadd.f32 %v6139_v60, %v2335_v53 }
 0x369   : > { %v3517_v26 = vunpack.i.l.s16 %v2705_v1 }
 0x36a   : > { %2389 = vxpose.xlu2.b32.cont [13/16] (narrow) %v2336_v32, 8 }
 0x36b   : > { %vm2712_vm13 = vcmp.ne.s32.totalorder %v3517_v26, %v5737_v16 }
 0x36c   : > { %vm2713_vm4 = vmpackc.low %vm2712_vm13, %vm2711_vm5 }
 0x36d   : > { %v2714_v37 = vsel %vm2713_vm4, 65537, %v4319_v25 }
 0x36e   : > { %v2715_v5 = vunpack.c.l.b16 %v2714_v37  ;;  %v2716_v3 = vunpack.c.h.b16 %v2714_v37 }
 0x36f   : > { %v2337_v47 = vpop.f32.mrf.mxu0 }
 0x370   : > { %v2338_v35 = vadd.f32 %v6139_v60, %v2337_v47  ;;  %vm2717_vm7 = vcmp.ne.s32.totalorder %v2715_v5, 0  ;;  %vm2718_vm3 = vcmp.ne.s32.totalorder %v2716_v3, 0 }
 0x371   : > { %v2719_v52 = vsel %vm2717_vm7, 1, %v4319_v25  ;;  %v2720_v34 = vsel %vm2718_vm3, 1, %v4319_v25 }
 0x372   : > { %2390 = vxpose.xlu2.b32.cont [14/16] (narrow) %v2338_v35, 8  ;;  %v2722_v13 = vperm.slane %v2720_v34, 0 }
 0x374   : > { %vm2724_vm12 = vcmp.eq.s32.totalorder %v2722_v13, 1 }
 0x377   : > { %v2340_v44 = vpop.f32.mrf.mxu0 }
 0x378   : > { %v2341_v57 = vadd.f32 %v6139_v60, %v2340_v44 }
 0x37a   : > { %2391 = vxpose.xlu2.b32.cont [15/16] (narrow) %v2341_v57, 8 }
 0x37f   : > { %v2342_v27 = vpop.f32.mrf.mxu0 }
 0x380   : > { %v2343_v56 = vadd.f32 %v6139_v60, %v2342_v27  ;;  %v2721_v60 = vperm.slane %v2719_v52, 0 }
 0x382   : > { %2392 = vxpose.xlu2.b32.end [16/16] (narrow) %v2343_v56, 8  ;;  %vm2723_vm9 = vcmp.eq.s32.totalorder %v2721_v60, 1 }
 0x383   : > { %v2725_v19 = vsel %vm2723_vm9, %v2361_v15, -1e+09 }
 0x384   : > { %3824 = vset.pattern.permute.xlu0 %v4319_v25  ;;  %v2727_v36 = vsel %vm2412_vm6, %v2725_v19, -inf }
 0x3a3   : > { %v2393_v16 = vpop.trf.xlu2 }
 0x3a4   : > { %v2411_v38 = vrot.slane %v2393_v16, 4  ;;  %v2726_v62 = vsel %vm2724_vm12, %v2393_v16, -1e+09 }
 0x3a5   : > { %v2728_v54 = vsel %vm2412_vm6, %v2726_v62, -inf }
 0x3a6   : > { %v2729_v20 = vmax.f32 %v2727_v36, %v2728_v54  ;;  %v2413_v42 = vsel %vm2412_vm6, %v2361_v15, %v2411_v38 }
 0x3a7   : > { %2415 = vst [vmem:[%s426_s14] sm:$0xff] %v2413_v42 }
 0x3a8   : > { %2730 = vmax.xlane.f32.xlu0 %v2729_v20 }
 0x3e4   : > { %3823 = vset.pattern.permute.xlu2 %v4319_v25 }
 0x41b   : > { %v2731_v21 = vpop.xlane.xlu0 %2730 }
 0x41c   : > { %v2733_v61 = vmax.f32 %v2732_v30, %v2731_v21 }
 0x41e   : > { %v2734_v49 = vsub.f32 %v2732_v30, %v2733_v61  ;;  %2807 = vst.msk [vmem:[%s4616_s21] sm:$0xf] %vm2756_vm10, %v2733_v61  ;;  %2739 = vperm.xlu1 %3822, %v2733_v61   ;;  %s3632_s21 = sshll.u32 %s4611_s28, 3 }
 0x41f   : > { %s2835_s9 = scalar_lea.hbm %s6624_s23, %s3632_s21 }
 0x420   : > { %v2735_v11 = vmul.f32 1.442695, %v2734_v49  ;;  %s2839_s3 = sshll.u32 %s2835_s9, 4  ;;  %s2840_s3 = int_to_ptr.hbm [resolvable:$true] %s2839_s3 }
 0x421   : > { %s4138_s24 = sshra.s32 %s2840_s3, 4  ;;  %s4139_s24 = int_to_ptr.hbm [resolvable:$true] %s4138_s24 }
 0x422   : > { %4018 = vpow2.f32 %v2735_v11  ;;  %s4140_s8 = scalar_lea.hbm %s4139_s24, 8  ;;  %p4145_p12 = scmp.lt.s32.totalorder %s4139_s24, %s6624_s23 }
 0x423   : > { %p4141_p0 = scmp.ne.s32.totalorder %s4139_s24, %s4140_s8  ;;  %p4146_p2 = scmp.lt.s32.totalorder %s4144_s0, %s4140_s8 }
 0x425   : > { %p4142_p5 = pnand %p4141_p0, %p6626_p1  ;;  %p4147_p13 = por %p4146_p2, %p4145_p12 }
 0x427   : > { %p4143_p11 = pneg %p4142_p5 }
 0x428   : > { %v4019_v23 = vpop.eup %4018 }
 0x429   : > { %2761 = vperm.xlu2 %3823, %v4019_v23   ;;  %p4148_p4 = pnand %p4147_p13, %p4143_p11 }
 0x490   : > { %v2740_v43 = vpop.permute.xlu1 %2739 }
 0x491   : > { %v2742_v24 = vsub.f32 %v2725_v19, %v2740_v43  ;;  %v2743_v33 = vsub.f32 %v2726_v62, %v2740_v43 }
 0x493   : > { %v2744_v50 = vmul.f32 1.442695, %v2742_v24  ;;  %v2746_v41 = vmul.f32 1.442695, %v2743_v33 }
 0x495   : > { %4020 = vpow2.f32 %v2744_v50 }
 0x496   : > { %4022 = vpow2.f32 %v2746_v41 }
 0x49b   : > { %v4021_v25 = vpop.eup %4020 }
 0x49c   : > { %v4023_v39 = vpop.eup %4022  ;;  %2781 = vmatmul.f32.vlgmr.msra.gmra.mxu1 %v4021_v25  ;;  %v2750_v55 = vsel %vm2412_vm6, %v4021_v25, 0.0 }
 0x49d   : > { %2801 = vmatmul.f32.vlgmr.msra.gmra.mxu2 %v4023_v39  ;;  %v2751_v6 = vsel %vm2412_vm6, %v4023_v39, 0.0 }
 0x49e   : > { %v2752_v17 = vadd.f32 %v2751_v6, %v2750_v55 }
 0x4a0   : > { %2753 = vadd.xlane.f32.xlu1 %v2752_v17 }
 0x4a1   : > { %4151 = shalt.err (!%p4148_p4)
}
 0x4a2   : > { %3666 = dma.vmem_to_hbm [thread:$0]  (%p6626_p1), %s2838_s15, 128, %s2840_s3, %s2809_s18   ;;  %v2748_v9 = vld [vmem:[%s4621_s5] sm:$0xf]  ;;  %v2758_v7 = vld [vmem:[%s4624_s2] sm:$0xf]  ;;  %v2762_v18 = vpop.permute.xlu2 %2761 }
 0x4a3   : > { %v2749_v0 = vmul.f32 %v4019_v23, %v2748_v9  ;;  %s3554_s0 = sshll.u32 %s4294_s19, 2  ;;  %s6627_s14 = sld [smem:[#allocation47_spill]]  ;;  %v2764_v8 = vmul.f32 %v2762_v18, %v2758_v7 }
 0x4a4   : > { %s2857_s4 = sshll.u32 %s4624_s2, 4  ;;  %s6629_s3 = sand.u32 1, %s4258_s10   ;;  %s2858_s4 = int_to_ptr.vmem [resolvable:$true] %s2857_s4 }
 0x4a9   : > { %s6628_s26 = smov %s6627_s14  ;;  %s2855_s9 = scalar_lea.hbm %s6627_s14, %s3554_s0 }
 0x4aa   : > { %s2859_s15 = sshll.u32 %s2855_s9, 4  ;;  %s4172_s8 = scalar_lea.hbm %s6628_s26, 8  ;;  %s2860_s15 = int_to_ptr.hbm [resolvable:$true] %s2859_s15 }
 0x4ab   : > { %s4166_s19 = sshra.s32 %s2860_s15, 4  ;;  %s4167_s19 = int_to_ptr.hbm [resolvable:$true] %s4166_s19 }
 0x4ac   : > { %s4168_s11 = scalar_lea.hbm %s4167_s19, 4  ;;  %p4173_p7 = scmp.lt.s32.totalorder %s4167_s19, %s6628_s26 }
 0x4ad   : > { %p4169_p6 = scmp.ne.s32.totalorder %s4167_s19, %s4168_s11  ;;  %p4174_p0 = scmp.lt.s32.totalorder %s4172_s8, %s4168_s11 }
 0x4af   : > { %p4170_p10 = pnand %p4169_p6, %p4515_p8  ;;  %p4175_p1 = por %p4174_p0, %p4173_p7 }
 0x4b1   : > { %p4171_p9 = pneg %p4170_p10 }
 0x4b3   : > { %p4176_p5 = pnand %p4175_p1, %p4171_p9 }
 0x513   : > { %v2754_v14 = vpop.xlane.xlu1 %2753 }
 0x514   : > { %v2755_v22 = vadd.f32 %v2754_v14, %v2749_v0 }
 0x516   : > { %2757 = vst.msk [vmem:[%s4621_s5] sm:$0xf] %vm2756_vm10, %v2755_v22  ;;  %s2822_s5 = scalar_lea.sflag [#allocation10], %s6629_s3 }
 0x519   : > { %v2782_v48 = vpop.f32.mrf.mxu1 }
 0x520   : > { %v2802_v63 = vpop.f32.mrf.mxu2 }
 0x521   : > { %v2803_v59 = vadd.f32 %v2802_v63, %v2782_v48 }
 0x523   : > { %v2805_v28 = vadd.f32 %v2803_v59, %v2764_v8 }
 0x525   : > { %2806 = vst [vmem:[%s4624_s2] sm:$0xf] %v2805_v28 }
 0x526   : > { %4179 = shalt.err (!%p4176_p5)
}
 0x527   : > { %3667 = dma.vmem_to_hbm [thread:$0]  (%p4515_p8), %s2858_s4, 64, %s2860_s15, %s2822_s5  }
 0x528 PF: > { %p3688_p11 = scmp.ge.s32.totalorder %s4306_s22, 2  ;;  %s2871_s2 = sand.u32 1, %s4266_s12  }
 0x529   : > { %s2872_s21 = scalar_lea.sflag [#allocation4], %s2871_s2 }
 0x52a   : > { %p3678_p12 = pnand %p3688_p11, %p4503_p3 }
 0x52c   : > { %p3679_p2 = pneg %p3678_p12 }
 0x52e   : > { %4245 = dma.done.wait (%p3679_p2), %s2872_s21, 128  }
 0x52f   : > { %4247 = vsyncadd (%p3679_p2), %s2872_s21, 4294967168  ;;  %s6630_s0 = sld [smem:[#allocation24_spill]]  ;;  %s2895_s29 = sand.u32 1, %s4254_s30  }
 0x530   : > { %s2896_s25 = scalar_lea.sflag [#allocation10], %s2895_s29 }
 0x535   : > { %p6631_p13 = scmp.ne.s32.totalorder %s6630_s0, 0 }
 0x537   : > { %p3681_p4 = pnand %p3688_p11, %p6631_p13 }
 0x539   : > { %p3682_p6 = pneg %p3681_p4 }
 0x53b   : > { %4249 = dma.done.wait (%p3682_p6), %s2896_s25, 64  }
 0x53c   : > { %4251 = vsyncadd (%p3682_p6), %s2896_s25, 4294967232  ;;  %s30_s22 = sadd.s32 1, %s4306_s22   ;;  %s6633_s7 = sld [smem:[#allocation15_spill]] }
 0x53d   : > { %p6298_p8 = scmp.ge.s32.totalorder %s30_s22, 8   ;;  %s6634_s11 = sld [smem:[#allocation23_spill]] }
 0x53e   : > { %s6635_s14 = sld [smem:[#allocation16_spill]]  ;;  %s6642_s30 = smov %s4258_s10 }
 0x53f   : > { %s6636_s9 = sld [smem:[#allocation21_spill]]  ;;  %s6644_s12 = smov %s4270_s13 }
 0x540   : > { %s6637_s4 = sld [smem:[#allocation22_spill]]  ;;  %s6647_s15 = smov %s4282_s16 }
 0x541   : > { %s6638_s18 = sld [smem:[#allocation17_spill]]  ;;  %s6648_s16 = smov %s4286_s17 }
 0x542   : > { %s6639_s19 = sld [smem:[#allocation18_spill]]  ;;  %s6643_s10 = smov %s6633_s7 }
 0x543   : > { %s6640_s20 = sld [smem:[#allocation19_spill]]  ;;  %29 = sbr.rel (!%p6298_p8) target bundleno = 24 (0x18), region = 142 }
 0x544   : > { %s6641_s21 = sld [smem:[#allocation20_spill]]  ;;  %s6645_s13 = smov %s6635_s14 }
 0x545   : > { %s6646_s14 = smov %s6636_s9 }
 0x546   : > { %s6649_s17 = smov %s6637_s4 }
 0x548   :  { %2902 = vsyncpa [#allocation3], 1 }
 0x549   :  { %2904 = vsyncpa [#allocation3 + $0x1], 1 }
 0x54a   :  { %2905 = vsyncpa [#allocation6], 1 }
 0x54b   :  { %2906 = vsyncpa [#allocation4], 1 }
 0x54c   :  { %2908 = vsyncpa [#allocation4 + $0x1], 1 }
 0x54d   :  { %2909 = vsyncpa [#allocation10], 1 }
 0x54e   :  { %2911 = vsyncpa [#allocation10 + $0x1], 1 }

</bundles_post_ra>
